<compile_context>
chip_gen: v7x
topology: tpu7x:2x2x1
jax: 0.10.0
libtpu: 0.0.40
codegen_flags: <defaults>
</compile_context>

<pallas_src>
import math
import jax
import jax.numpy as jnp
import numpy as np
from jax.experimental import pallas as pl
from jax.experimental.pallas import tpu as pltpu

# ----------------------------- problem sizes --------------------------------
B, S = 2, 8                 # batch, sequence length
INPUT_DIM = 4
HIDDEN = 32                 # d_model
NUM_LAYERS = 2
NUM_HEADS = 4
HEAD_DIM = HIDDEN // NUM_HEADS
FFN = 2048                  # PyTorch TransformerEncoderLayer default dim_feedforward
LN_EPS = 1e-5
BS = B * S


# ------------------------------- kernel -------------------------------------
def _layer_norm(x, w, b):
    mu = jnp.mean(x, axis=-1, keepdims=True)
    xc = x - mu
    var = jnp.mean(xc * xc, axis=-1, keepdims=True)
    return xc * jax.lax.rsqrt(var + LN_EPS) * w + b


def transformer_kernel(x_ref, bias_ref, pe_ref, win_ref, bin_ref,
                       wqkv_ref, bqkv_ref, wo_ref, bo_ref,
                       ln1w_ref, ln1b_ref, w1_ref, b1_ref, w2_ref, b2_ref,
                       ln2w_ref, ln2b_ref, fcw_ref, fcb_ref, o_ref):
    # Block-diagonal "same batch element" additive bias, precomputed on host.
    attn_bias = bias_ref[...]                              # (BS, BS), 0 / -1e30

    # input projection + positional encoding (batch fully flattened: M = B*S)
    x = x_ref[...].reshape(BS, INPUT_DIM)
    h = jnp.dot(x, win_ref[...], preferred_element_type=jnp.float32) + bin_ref[...]
    h = h + jnp.tile(pe_ref[...], (B, 1))

    for l in range(NUM_LAYERS):
        # ----- multi-head self-attention (post-norm residual block) -----
        # fused, lane-dense QKV projection; 1/sqrt(Dh) already folded into the Q part
        qkv = jnp.dot(h, wqkv_ref[l],
                      preferred_element_type=jnp.float32) + bqkv_ref[l]
        attn = jnp.zeros((BS, HIDDEN), jnp.float32)
        for hh in range(NUM_HEADS):                        # 4 static iters, 2-D tiles
            q = qkv[:, hh * HEAD_DIM:(hh + 1) * HEAD_DIM]
            k = qkv[:, HIDDEN + hh * HEAD_DIM:HIDDEN + (hh + 1) * HEAD_DIM]
            v = qkv[:, 2 * HIDDEN + hh * HEAD_DIM:2 * HIDDEN + (hh + 1) * HEAD_DIM]
            s = jnp.einsum('qd,kd->qk', q, k,
                           preferred_element_type=jnp.float32) + attn_bias
            s = s - jnp.max(s, axis=-1, keepdims=True)
            p = jnp.exp(s)
            p = p * pl.reciprocal(jnp.sum(p, axis=-1, keepdims=True), approx=True)
            ctx_h = jnp.dot(p, v, preferred_element_type=jnp.float32)   # (BS, Dh)
            # per-head output projection accumulation (sublane-aligned 8-row slice)
            attn = attn + jnp.dot(ctx_h,
                                  wo_ref[l][hh * HEAD_DIM:(hh + 1) * HEAD_DIM, :],
                                  preferred_element_type=jnp.float32)
        attn = attn + bo_ref[l]
        # TODO(synk): dropout on attention / FFN outputs omitted (eval mode => identity)
        h = _layer_norm(h + attn, ln1w_ref[l], ln1b_ref[l])

        # ----- feed-forward block (bf16 weights & activations, f32 accumulate) -----
        ff = jnp.maximum(
            jnp.dot(h.astype(jnp.bfloat16), w1_ref[l],
                    preferred_element_type=jnp.float32) + b1_ref[l],
            0.0).astype(jnp.bfloat16)                      # keep (BS, FFN) tile bf16
        ff = jnp.dot(ff, w2_ref[l], preferred_element_type=jnp.float32) + b2_ref[l]
        h = _layer_norm(h + ff, ln2w_ref[l], ln2b_ref[l])

    # mean pooling over sequence, then fc: (B, D) . (1, D) -> (B, 1)
    pooled = jnp.mean(h.reshape(B, S, HIDDEN), axis=1)
    o_ref[...] = jnp.sum(pooled * fcw_ref[...], axis=-1, keepdims=True) + fcb_ref[...]


# ------------------------------- wrapper -------------------------------------
_PARAM_ORDER = ['pe', 'win', 'bin', 'wqkv', 'bqkv', 'wo', 'bo',
                'ln1w', 'ln1b', 'w1', 'b1', 'w2', 'b2', 'ln2w', 'ln2b',
                'fcw', 'fcb']


def _build_attn_bias():
    """Block-diagonal additive mask (0 within a batch element, -1e30 across)."""
    idx = np.arange(BS) // S
    same = idx[:, None] == idx[None, :]
    return jnp.asarray(np.where(same, 0.0, -1e30).astype(np.float32))


def fold_qk_scale(params):
    """Fold 1/sqrt(HEAD_DIM) into the Q third of the fused QKV weights/biases."""
    scale = 1.0 / math.sqrt(HEAD_DIM)
    p = dict(params)
    p['wqkv'] = params['wqkv'].at[:, :, :HIDDEN].multiply(scale)
    p['bqkv'] = params['bqkv'].at[:, :, :HIDDEN].multiply(scale)
    return p


def transformer_regressor(x, kparams, attn_bias):
    """Single grid-less, fully-fused pallas_call (all generations)."""
    args = [x, attn_bias] + [kparams[k] for k in _PARAM_ORDER]
    vmem = pl.BlockSpec(memory_space=pltpu.MemorySpace.VMEM)
    out = pl.pallas_call(
        transformer_kernel,
        out_shape=jax.ShapeDtypeStruct((B, 1), jnp.float32),
        in_specs=[vmem] * len(args),
        out_specs=vmem,
    )(*args)
    return out


# --------------------------- parameter init ----------------------------------
def init_params(key):
    keys = iter(jax.random.split(key, 64))

    def lin(fan_in, fan_out):
        bound = 1.0 / math.sqrt(fan_in)
        w = jax.random.uniform(next(keys), (fan_in, fan_out), jnp.float32, -bound, bound)
        b = jax.random.uniform(next(keys), (1, fan_out), jnp.float32, -bound, bound)
        return w, b

    p = {}
    p['win'], p['bin'] = lin(INPUT_DIM, HIDDEN)

    # sinusoidal positional encoding (same formula as PositionalEncoding)
    pos = jnp.arange(S, dtype=jnp.float32)[:, None]
    div = jnp.exp(jnp.arange(0, HIDDEN, 2, dtype=jnp.float32)
                  * (-math.log(10000.0) / HIDDEN))
    pe = jnp.zeros((S, HIDDEN), jnp.float32)
    pe = pe.at[:, 0::2].set(jnp.sin(pos * div))
    pe = pe.at[:, 1::2].set(jnp.cos(pos * div))
    p['pe'] = pe

    wqkv, bqkv, wo, bo = [], [], [], []
    ln1w, ln1b, w1, b1, w2, b2, ln2w, ln2b = ([] for _ in range(8))
    for _ in range(NUM_LAYERS):
        w_, b_ = lin(HIDDEN, 3 * HIDDEN)          # fused, lane-dense QKV
        wqkv.append(w_); bqkv.append(b_)
        w_, b_ = lin(HIDDEN, HIDDEN)              # output projection
        wo.append(w_); bo.append(b_)
        ln1w.append(1.0 + 0.1 * jax.random.normal(next(keys), (1, HIDDEN), jnp.float32))
        ln1b.append(0.1 * jax.random.normal(next(keys), (1, HIDDEN), jnp.float32))
        w_, b_ = lin(HIDDEN, FFN); w1.append(w_); b1.append(b_)
        w_, b_ = lin(FFN, HIDDEN); w2.append(w_); b2.append(b_)
        ln2w.append(1.0 + 0.1 * jax.random.normal(next(keys), (1, HIDDEN), jnp.float32))
        ln2b.append(0.1 * jax.random.normal(next(keys), (1, HIDDEN), jnp.float32))

    stack = lambda lst: jnp.stack(lst, axis=0)
    p.update(wqkv=stack(wqkv), bqkv=stack(bqkv), wo=stack(wo), bo=stack(bo),
             ln1w=stack(ln1w), ln1b=stack(ln1b),
             # FFN weights kept in bf16 (shared by kernel and reference)
             w1=stack(w1).astype(jnp.bfloat16), b1=stack(b1),
             w2=stack(w2).astype(jnp.bfloat16), b2=stack(b2),
             ln2w=stack(ln2w), ln2b=stack(ln2b))

    fw, fb = lin(HIDDEN, 1)
    p['fcw'] = fw.T          # (1, HIDDEN), lane-dense
    p['fcb'] = fb            # (1, 1)
    return p


# ----------------------------- pure-JAX reference ----------------------------
def _ref_forward(x, p):
    """Reference uses the unfolded params and the explicit 1/sqrt(Dh) scale."""
    h = x @ p['win'] + p['bin'] + p['pe']                 # (B, S, D)
    for l in range(NUM_LAYERS):
        qkv = h @ p['wqkv'][l] + p['bqkv'][l]
        q, k, v = jnp.split(qkv, 3, axis=-1)
        q = q.reshape(B, S, NUM_HEADS, HEAD_DIM).transpose(0, 2, 1, 3)
        k = k.reshape(B, S, NUM_HEADS, HEAD_DIM).transpose(0, 2, 1, 3)
        v = v.reshape(B, S, NUM_HEADS, HEAD_DIM).transpose(0, 2, 1, 3)
        s = jnp.einsum('bhqd,bhkd->bhqk', q, k) / math.sqrt(HEAD_DIM)
        a = jax.nn.softmax(s, axis=-1)
        ctx = jnp.einsum('bhqk,bhkd->bhqd', a, v)
        ctx = ctx.transpose(0, 2, 1, 3).reshape(B, S, HIDDEN)
        attn = ctx @ p['wo'][l] + p['bo'][l]
        h = _layer_norm(h + attn, p['ln1w'][l], p['ln1b'][l])
        ff = jnp.maximum(h @ p['w1'][l].astype(jnp.float32) + p['b1'][l], 0.0)
        ff = ff @ p['w2'][l].astype(jnp.float32) + p['b2'][l]
        h = _layer_norm(h + ff, p['ln2w'][l], p['ln2b'][l])
    pooled = h.mean(axis=1)                               # (B, D)
    return jnp.sum(pooled * p['fcw'], axis=-1, keepdims=True) + p['fcb']


# --------------------------------- main ---------------------------------------
if __name__ == "__main__":
    key = jax.random.PRNGKey(0)
    kp, kx = jax.random.split(key)
    params = init_params(kp)
    kernel_params = fold_qk_scale(params)                 # Q-scale folded into weights
    attn_bias = _build_attn_bias()
    x = jax.random.normal(kx, (B, S, INPUT_DIM), jnp.float32)

    out = transformer_regressor(x, kernel_params, attn_bias)
    out = jax.block_until_ready(out)

    ref = _ref_forward(x, params)                         # (B, 1)
    # Tolerance covers the intentional bf16 FFN activations/weights and the
    # approximate (EUP) softmax reciprocal; structural bugs would be orders of
    # magnitude larger than this.
    np.testing.assert_allclose(np.asarray(out), np.asarray(ref),
                               rtol=3e-3, atol=3e-3)
    print("KERNEL_OK")
</pallas_src>

<mosaic_0001>
module attributes {stable_mosaic.version = 11 : i64} {
  func.func @transformer_kernel(%arg0: memref<2x8x4xf32, #tpu.memory_space<vmem>>, %arg1: memref<16x16xf32, #tpu.memory_space<vmem>>, %arg2: memref<8x32xf32, #tpu.memory_space<vmem>>, %arg3: memref<4x32xf32, #tpu.memory_space<vmem>>, %arg4: memref<1x32xf32, #tpu.memory_space<vmem>>, %arg5: memref<2x32x96xf32, #tpu.memory_space<vmem>>, %arg6: memref<2x1x96xf32, #tpu.memory_space<vmem>>, %arg7: memref<2x32x32xf32, #tpu.memory_space<vmem>>, %arg8: memref<2x1x32xf32, #tpu.memory_space<vmem>>, %arg9: memref<2x1x32xf32, #tpu.memory_space<vmem>>, %arg10: memref<2x1x32xf32, #tpu.memory_space<vmem>>, %arg11: memref<2x32x2048xbf16, #tpu.memory_space<vmem>>, %arg12: memref<2x1x2048xf32, #tpu.memory_space<vmem>>, %arg13: memref<2x2048x32xbf16, #tpu.memory_space<vmem>>, %arg14: memref<2x1x32xf32, #tpu.memory_space<vmem>>, %arg15: memref<2x1x32xf32, #tpu.memory_space<vmem>>, %arg16: memref<2x1x32xf32, #tpu.memory_space<vmem>>, %arg17: memref<1x32xf32, #tpu.memory_space<vmem>>, %arg18: memref<1x1xf32, #tpu.memory_space<vmem>>, %arg19: memref<2x1xf32, #tpu.memory_space<vmem>>) attributes {dimension_semantics = [], scalar_prefetch = 0 : i64, scratch_operands = 0 : i64, tpu.core_type = #tpu.core_type<tc>} {
    %c0 = arith.constant 0 : index
    %c0_0 = arith.constant 0 : index
    %0 = vector.load %arg1[%c0, %c0_0] : memref<16x16xf32, #tpu.memory_space<vmem>>, vector<16x16xf32>
    %c0_1 = arith.constant 0 : index
    %c0_2 = arith.constant 0 : index
    %c0_3 = arith.constant 0 : index
    %1 = vector.load %arg0[%c0_1, %c0_2, %c0_3] : memref<2x8x4xf32, #tpu.memory_space<vmem>>, vector<2x8x4xf32>
    %2 = vector.shape_cast %1 : vector<2x8x4xf32> to vector<16x4xf32>
    %c0_4 = arith.constant 0 : index
    %c0_5 = arith.constant 0 : index
    %3 = vector.load %arg3[%c0_4, %c0_5] : memref<4x32xf32, #tpu.memory_space<vmem>>, vector<4x32xf32>
    %cst = arith.constant dense<0.000000e+00> : vector<16x32xf32>
    %4 = tpu.matmul %2, %3, %cst {dimension_numbers = #tpu.dot_dimension_numbers<[1], [0], [0], [1], [0, 0, 1, 1], [], []>} : vector<16x4xf32>, vector<4x32xf32>, vector<16x32xf32> -> vector<16x32xf32>
    %c0_6 = arith.constant 0 : index
    %c0_7 = arith.constant 0 : index
    %5 = vector.load %arg4[%c0_6, %c0_7] : memref<1x32xf32, #tpu.memory_space<vmem>>, vector<1x32xf32>
    %6 = vector.broadcast %5 : vector<1x32xf32> to vector<16x32xf32>
    %7 = arith.addf %4, %6 : vector<16x32xf32>
    %c0_8 = arith.constant 0 : index
    %c0_9 = arith.constant 0 : index
    %8 = vector.load %arg2[%c0_8, %c0_9] : memref<8x32xf32, #tpu.memory_space<vmem>>, vector<8x32xf32>
    %9 = tpu.concatenate %8, %8 in 0 : vector<8x32xf32>, vector<8x32xf32> -> vector<16x32xf32>
    %10 = arith.addf %7, %9 : vector<16x32xf32>
    %c0_10 = arith.constant 0 : index
    %c0_11 = arith.constant 0 : index
    %c0_12 = arith.constant 0 : index
    %11 = vector.load %arg5[%c0_10, %c0_11, %c0_12] : memref<2x32x96xf32, #tpu.memory_space<vmem>>, vector<1x32x96xf32>
    %12 = vector.shape_cast %11 : vector<1x32x96xf32> to vector<32x96xf32>
    %cst_13 = arith.constant dense<0.000000e+00> : vector<16x96xf32>
    %13 = tpu.matmul %10, %12, %cst_13 {dimension_numbers = #tpu.dot_dimension_numbers<[1], [0], [0], [1], [0, 0, 1, 1], [], []>} : vector<16x32xf32>, vector<32x96xf32>, vector<16x96xf32> -> vector<16x96xf32>
    %c0_14 = arith.constant 0 : index
    %c0_15 = arith.constant 0 : index
    %c0_16 = arith.constant 0 : index
    %14 = vector.load %arg6[%c0_14, %c0_15, %c0_16] : memref<2x1x96xf32, #tpu.memory_space<vmem>>, vector<1x1x96xf32>
    %15 = vector.shape_cast %14 : vector<1x1x96xf32> to vector<1x96xf32>
    %16 = vector.broadcast %15 : vector<1x96xf32> to vector<16x96xf32>
    %17 = arith.addf %13, %16 : vector<16x96xf32>
    %cst_17 = arith.constant 0.000000e+00 : f32
    %18 = vector.broadcast %cst_17 : f32 to vector<16x32xf32>
    %19 = vector.extract_strided_slice %17 {offsets = [0, 0], sizes = [16, 8], strides = [1, 1]} : vector<16x96xf32> to vector<16x8xf32>
    %20 = vector.extract_strided_slice %17 {offsets = [0, 32], sizes = [16, 8], strides = [1, 1]} : vector<16x96xf32> to vector<16x8xf32>
    %21 = vector.extract_strided_slice %17 {offsets = [0, 64], sizes = [16, 8], strides = [1, 1]} : vector<16x96xf32> to vector<16x8xf32>
    "tpu.trace_start"() <{level = 10 : i32, message = "qd,kd->qk"}> : () -> ()
    %cst_18 = arith.constant dense<0.000000e+00> : vector<16x16xf32>
    %22 = tpu.matmul %19, %20, %cst_18 {dimension_numbers = #tpu.dot_dimension_numbers<[1], [1], [0], [0], [0, 0, 1, 0], [], []>} : vector<16x8xf32>, vector<16x8xf32>, vector<16x16xf32> -> vector<16x16xf32>
    "tpu.trace_stop"() : () -> ()
    %23 = arith.addf %22, %0 : vector<16x16xf32>
    %cst_19 = arith.constant dense<0xFF800000> : vector<16xf32>
    %24 = vector.multi_reduction <maximumf>, %23, %cst_19 [1] : vector<16x16xf32> to vector<16xf32>
    %25 = vector.shape_cast %24 : vector<16xf32> to vector<16x1xf32>
    %26 = vector.broadcast %25 : vector<16x1xf32> to vector<16x16xf32>
    %27 = arith.subf %23, %26 : vector<16x16xf32>
    %28 = math.exp %27 : vector<16x16xf32>
    %cst_20 = arith.constant dense<0.000000e+00> : vector<16xf32>
    %29 = vector.multi_reduction <add>, %28, %cst_20 [1] : vector<16x16xf32> to vector<16xf32>
    %30 = vector.shape_cast %29 : vector<16xf32> to vector<16x1xf32>
    %31 = tpu.reciprocal %30 {approx = true} : vector<16x1xf32> -> vector<16x1xf32>
    %32 = vector.broadcast %31 : vector<16x1xf32> to vector<16x16xf32>
    %33 = arith.mulf %28, %32 : vector<16x16xf32>
    %cst_21 = arith.constant dense<0.000000e+00> : vector<16x8xf32>
    %34 = tpu.matmul %33, %21, %cst_21 {dimension_numbers = #tpu.dot_dimension_numbers<[1], [0], [0], [1], [0, 0, 1, 1], [], []>} : vector<16x16xf32>, vector<16x8xf32>, vector<16x8xf32> -> vector<16x8xf32>
    %c0_22 = arith.constant 0 : index
    %c0_23 = arith.constant 0 : index
    %c0_24 = arith.constant 0 : index
    %35 = vector.load %arg7[%c0_22, %c0_23, %c0_24] : memref<2x32x32xf32, #tpu.memory_space<vmem>>, vector<1x32x32xf32>
    %36 = vector.shape_cast %35 : vector<1x32x32xf32> to vector<32x32xf32>
    %37 = vector.extract_strided_slice %36 {offsets = [0, 0], sizes = [8, 32], strides = [1, 1]} : vector<32x32xf32> to vector<8x32xf32>
    %cst_25 = arith.constant dense<0.000000e+00> : vector<16x32xf32>
    %38 = tpu.matmul %34, %37, %cst_25 {dimension_numbers = #tpu.dot_dimension_numbers<[1], [0], [0], [1], [0, 0, 1, 1], [], []>} : vector<16x8xf32>, vector<8x32xf32>, vector<16x32xf32> -> vector<16x32xf32>
    %39 = arith.addf %18, %38 : vector<16x32xf32>
    %40 = vector.extract_strided_slice %17 {offsets = [0, 8], sizes = [16, 8], strides = [1, 1]} : vector<16x96xf32> to vector<16x8xf32>
    %41 = vector.extract_strided_slice %17 {offsets = [0, 40], sizes = [16, 8], strides = [1, 1]} : vector<16x96xf32> to vector<16x8xf32>
    %42 = vector.extract_strided_slice %17 {offsets = [0, 72], sizes = [16, 8], strides = [1, 1]} : vector<16x96xf32> to vector<16x8xf32>
    "tpu.trace_start"() <{level = 10 : i32, message = "qd,kd->qk"}> : () -> ()
    %cst_26 = arith.constant dense<0.000000e+00> : vector<16x16xf32>
    %43 = tpu.matmul %40, %41, %cst_26 {dimension_numbers = #tpu.dot_dimension_numbers<[1], [1], [0], [0], [0, 0, 1, 0], [], []>} : vector<16x8xf32>, vector<16x8xf32>, vector<16x16xf32> -> vector<16x16xf32>
    "tpu.trace_stop"() : () -> ()
    %44 = arith.addf %43, %0 : vector<16x16xf32>
    %cst_27 = arith.constant dense<0xFF800000> : vector<16xf32>
    %45 = vector.multi_reduction <maximumf>, %44, %cst_27 [1] : vector<16x16xf32> to vector<16xf32>
    %46 = vector.shape_cast %45 : vector<16xf32> to vector<16x1xf32>
    %47 = vector.broadcast %46 : vector<16x1xf32> to vector<16x16xf32>
    %48 = arith.subf %44, %47 : vector<16x16xf32>
    %49 = math.exp %48 : vector<16x16xf32>
    %cst_28 = arith.constant dense<0.000000e+00> : vector<16xf32>
    %50 = vector.multi_reduction <add>, %49, %cst_28 [1] : vector<16x16xf32> to vector<16xf32>
    %51 = vector.shape_cast %50 : vector<16xf32> to vector<16x1xf32>
    %52 = tpu.reciprocal %51 {approx = true} : vector<16x1xf32> -> vector<16x1xf32>
    %53 = vector.broadcast %52 : vector<16x1xf32> to vector<16x16xf32>
    %54 = arith.mulf %49, %53 : vector<16x16xf32>
    %cst_29 = arith.constant dense<0.000000e+00> : vector<16x8xf32>
    %55 = tpu.matmul %54, %42, %cst_29 {dimension_numbers = #tpu.dot_dimension_numbers<[1], [0], [0], [1], [0, 0, 1, 1], [], []>} : vector<16x16xf32>, vector<16x8xf32>, vector<16x8xf32> -> vector<16x8xf32>
    %c0_30 = arith.constant 0 : index
    %c0_31 = arith.constant 0 : index
    %c0_32 = arith.constant 0 : index
    %56 = vector.load %arg7[%c0_30, %c0_31, %c0_32] : memref<2x32x32xf32, #tpu.memory_space<vmem>>, vector<1x32x32xf32>
    %57 = vector.shape_cast %56 : vector<1x32x32xf32> to vector<32x32xf32>
    %58 = vector.extract_strided_slice %57 {offsets = [8, 0], sizes = [8, 32], strides = [1, 1]} : vector<32x32xf32> to vector<8x32xf32>
    %cst_33 = arith.constant dense<0.000000e+00> : vector<16x32xf32>
    %59 = tpu.matmul %55, %58, %cst_33 {dimension_numbers = #tpu.dot_dimension_numbers<[1], [0], [0], [1], [0, 0, 1, 1], [], []>} : vector<16x8xf32>, vector<8x32xf32>, vector<16x32xf32> -> vector<16x32xf32>
    %60 = arith.addf %39, %59 : vector<16x32xf32>
    %61 = vector.extract_strided_slice %17 {offsets = [0, 16], sizes = [16, 8], strides = [1, 1]} : vector<16x96xf32> to vector<16x8xf32>
    %62 = vector.extract_strided_slice %17 {offsets = [0, 48], sizes = [16, 8], strides = [1, 1]} : vector<16x96xf32> to vector<16x8xf32>
    %63 = vector.extract_strided_slice %17 {offsets = [0, 80], sizes = [16, 8], strides = [1, 1]} : vector<16x96xf32> to vector<16x8xf32>
    "tpu.trace_start"() <{level = 10 : i32, message = "qd,kd->qk"}> : () -> ()
    %cst_34 = arith.constant dense<0.000000e+00> : vector<16x16xf32>
    %64 = tpu.matmul %61, %62, %cst_34 {dimension_numbers = #tpu.dot_dimension_numbers<[1], [1], [0], [0], [0, 0, 1, 0], [], []>} : vector<16x8xf32>, vector<16x8xf32>, vector<16x16xf32> -> vector<16x16xf32>
    "tpu.trace_stop"() : () -> ()
    %65 = arith.addf %64, %0 : vector<16x16xf32>
    %cst_35 = arith.constant dense<0xFF800000> : vector<16xf32>
    %66 = vector.multi_reduction <maximumf>, %65, %cst_35 [1] : vector<16x16xf32> to vector<16xf32>
    %67 = vector.shape_cast %66 : vector<16xf32> to vector<16x1xf32>
    %68 = vector.broadcast %67 : vector<16x1xf32> to vector<16x16xf32>
    %69 = arith.subf %65, %68 : vector<16x16xf32>
    %70 = math.exp %69 : vector<16x16xf32>
    %cst_36 = arith.constant dense<0.000000e+00> : vector<16xf32>
    %71 = vector.multi_reduction <add>, %70, %cst_36 [1] : vector<16x16xf32> to vector<16xf32>
    %72 = vector.shape_cast %71 : vector<16xf32> to vector<16x1xf32>
    %73 = tpu.reciprocal %72 {approx = true} : vector<16x1xf32> -> vector<16x1xf32>
    %74 = vector.broadcast %73 : vector<16x1xf32> to vector<16x16xf32>
    %75 = arith.mulf %70, %74 : vector<16x16xf32>
    %cst_37 = arith.constant dense<0.000000e+00> : vector<16x8xf32>
    %76 = tpu.matmul %75, %63, %cst_37 {dimension_numbers = #tpu.dot_dimension_numbers<[1], [0], [0], [1], [0, 0, 1, 1], [], []>} : vector<16x16xf32>, vector<16x8xf32>, vector<16x8xf32> -> vector<16x8xf32>
    %c0_38 = arith.constant 0 : index
    %c0_39 = arith.constant 0 : index
    %c0_40 = arith.constant 0 : index
    %77 = vector.load %arg7[%c0_38, %c0_39, %c0_40] : memref<2x32x32xf32, #tpu.memory_space<vmem>>, vector<1x32x32xf32>
    %78 = vector.shape_cast %77 : vector<1x32x32xf32> to vector<32x32xf32>
    %79 = vector.extract_strided_slice %78 {offsets = [16, 0], sizes = [8, 32], strides = [1, 1]} : vector<32x32xf32> to vector<8x32xf32>
    %cst_41 = arith.constant dense<0.000000e+00> : vector<16x32xf32>
    %80 = tpu.matmul %76, %79, %cst_41 {dimension_numbers = #tpu.dot_dimension_numbers<[1], [0], [0], [1], [0, 0, 1, 1], [], []>} : vector<16x8xf32>, vector<8x32xf32>, vector<16x32xf32> -> vector<16x32xf32>
    %81 = arith.addf %60, %80 : vector<16x32xf32>
    %82 = vector.extract_strided_slice %17 {offsets = [0, 24], sizes = [16, 8], strides = [1, 1]} : vector<16x96xf32> to vector<16x8xf32>
    %83 = vector.extract_strided_slice %17 {offsets = [0, 56], sizes = [16, 8], strides = [1, 1]} : vector<16x96xf32> to vector<16x8xf32>
    %84 = vector.extract_strided_slice %17 {offsets = [0, 88], sizes = [16, 8], strides = [1, 1]} : vector<16x96xf32> to vector<16x8xf32>
    "tpu.trace_start"() <{level = 10 : i32, message = "qd,kd->qk"}> : () -> ()
    %cst_42 = arith.constant dense<0.000000e+00> : vector<16x16xf32>
    %85 = tpu.matmul %82, %83, %cst_42 {dimension_numbers = #tpu.dot_dimension_numbers<[1], [1], [0], [0], [0, 0, 1, 0], [], []>} : vector<16x8xf32>, vector<16x8xf32>, vector<16x16xf32> -> vector<16x16xf32>
    "tpu.trace_stop"() : () -> ()
    %86 = arith.addf %85, %0 : vector<16x16xf32>
    %cst_43 = arith.constant dense<0xFF800000> : vector<16xf32>
    %87 = vector.multi_reduction <maximumf>, %86, %cst_43 [1] : vector<16x16xf32> to vector<16xf32>
    %88 = vector.shape_cast %87 : vector<16xf32> to vector<16x1xf32>
    %89 = vector.broadcast %88 : vector<16x1xf32> to vector<16x16xf32>
    %90 = arith.subf %86, %89 : vector<16x16xf32>
    %91 = math.exp %90 : vector<16x16xf32>
    %cst_44 = arith.constant dense<0.000000e+00> : vector<16xf32>
    %92 = vector.multi_reduction <add>, %91, %cst_44 [1] : vector<16x16xf32> to vector<16xf32>
    %93 = vector.shape_cast %92 : vector<16xf32> to vector<16x1xf32>
    %94 = tpu.reciprocal %93 {approx = true} : vector<16x1xf32> -> vector<16x1xf32>
    %95 = vector.broadcast %94 : vector<16x1xf32> to vector<16x16xf32>
    %96 = arith.mulf %91, %95 : vector<16x16xf32>
    %cst_45 = arith.constant dense<0.000000e+00> : vector<16x8xf32>
    %97 = tpu.matmul %96, %84, %cst_45 {dimension_numbers = #tpu.dot_dimension_numbers<[1], [0], [0], [1], [0, 0, 1, 1], [], []>} : vector<16x16xf32>, vector<16x8xf32>, vector<16x8xf32> -> vector<16x8xf32>
    %c0_46 = arith.constant 0 : index
    %c0_47 = arith.constant 0 : index
    %c0_48 = arith.constant 0 : index
    %98 = vector.load %arg7[%c0_46, %c0_47, %c0_48] : memref<2x32x32xf32, #tpu.memory_space<vmem>>, vector<1x32x32xf32>
    %99 = vector.shape_cast %98 : vector<1x32x32xf32> to vector<32x32xf32>
    %100 = vector.extract_strided_slice %99 {offsets = [24, 0], sizes = [8, 32], strides = [1, 1]} : vector<32x32xf32> to vector<8x32xf32>
    %cst_49 = arith.constant dense<0.000000e+00> : vector<16x32xf32>
    %101 = tpu.matmul %97, %100, %cst_49 {dimension_numbers = #tpu.dot_dimension_numbers<[1], [0], [0], [1], [0, 0, 1, 1], [], []>} : vector<16x8xf32>, vector<8x32xf32>, vector<16x32xf32> -> vector<16x32xf32>
    %102 = arith.addf %81, %101 : vector<16x32xf32>
    %c0_50 = arith.constant 0 : index
    %c0_51 = arith.constant 0 : index
    %c0_52 = arith.constant 0 : index
    %103 = vector.load %arg8[%c0_50, %c0_51, %c0_52] : memref<2x1x32xf32, #tpu.memory_space<vmem>>, vector<1x1x32xf32>
    %104 = vector.shape_cast %103 : vector<1x1x32xf32> to vector<1x32xf32>
    %105 = vector.broadcast %104 : vector<1x32xf32> to vector<16x32xf32>
    %106 = arith.addf %102, %105 : vector<16x32xf32>
    %107 = arith.addf %10, %106 : vector<16x32xf32>
    %c0_53 = arith.constant 0 : index
    %c0_54 = arith.constant 0 : index
    %c0_55 = arith.constant 0 : index
    %108 = vector.load %arg9[%c0_53, %c0_54, %c0_55] : memref<2x1x32xf32, #tpu.memory_space<vmem>>, vector<1x1x32xf32>
    %109 = vector.shape_cast %108 : vector<1x1x32xf32> to vector<1x32xf32>
    %c0_56 = arith.constant 0 : index
    %c0_57 = arith.constant 0 : index
    %c0_58 = arith.constant 0 : index
    %110 = vector.load %arg10[%c0_56, %c0_57, %c0_58] : memref<2x1x32xf32, #tpu.memory_space<vmem>>, vector<1x1x32xf32>
    %111 = vector.shape_cast %110 : vector<1x1x32xf32> to vector<1x32xf32>
    %cst_59 = arith.constant dense<0.000000e+00> : vector<16xf32>
    %112 = vector.multi_reduction <add>, %107, %cst_59 [1] : vector<16x32xf32> to vector<16xf32>
    %113 = vector.shape_cast %112 : vector<16xf32> to vector<16x1xf32>
    %cst_60 = arith.constant 3.200000e+01 : f32
    %114 = vector.broadcast %cst_60 : f32 to vector<16x1xf32>
    %115 = arith.divf %113, %114 : vector<16x1xf32>
    %116 = vector.broadcast %115 : vector<16x1xf32> to vector<16x32xf32>
    %117 = arith.subf %107, %116 : vector<16x32xf32>
    %118 = arith.mulf %117, %117 : vector<16x32xf32>
    %cst_61 = arith.constant dense<0.000000e+00> : vector<16xf32>
    %119 = vector.multi_reduction <add>, %118, %cst_61 [1] : vector<16x32xf32> to vector<16xf32>
    %120 = vector.shape_cast %119 : vector<16xf32> to vector<16x1xf32>
    %cst_62 = arith.constant 3.200000e+01 : f32
    %121 = vector.broadcast %cst_62 : f32 to vector<16x1xf32>
    %122 = arith.divf %120, %121 : vector<16x1xf32>
    %cst_63 = arith.constant 9.99999974E-6 : f32
    %123 = vector.broadcast %cst_63 : f32 to vector<16x1xf32>
    %124 = arith.addf %122, %123 : vector<16x1xf32>
    %125 = math.rsqrt %124 : vector<16x1xf32>
    %126 = vector.broadcast %125 : vector<16x1xf32> to vector<16x32xf32>
    %127 = arith.mulf %117, %126 : vector<16x32xf32>
    %128 = vector.broadcast %109 : vector<1x32xf32> to vector<16x32xf32>
    %129 = arith.mulf %127, %128 : vector<16x32xf32>
    %130 = vector.broadcast %111 : vector<1x32xf32> to vector<16x32xf32>
    %131 = arith.addf %129, %130 : vector<16x32xf32>
    %132 = arith.truncf %131 : vector<16x32xf32> to vector<16x32xbf16>
    %c0_64 = arith.constant 0 : index
    %c0_65 = arith.constant 0 : index
    %c0_66 = arith.constant 0 : index
    %133 = vector.load %arg11[%c0_64, %c0_65, %c0_66] : memref<2x32x2048xbf16, #tpu.memory_space<vmem>>, vector<1x32x2048xbf16>
    %134 = vector.shape_cast %133 : vector<1x32x2048xbf16> to vector<32x2048xbf16>
    %cst_67 = arith.constant dense<0.000000e+00> : vector<16x2048xf32>
    %135 = tpu.matmul %132, %134, %cst_67 {dimension_numbers = #tpu.dot_dimension_numbers<[1], [0], [0], [1], [0, 0, 1, 1], [], []>} : vector<16x32xbf16>, vector<32x2048xbf16>, vector<16x2048xf32> -> vector<16x2048xf32>
    %c0_68 = arith.constant 0 : index
    %c0_69 = arith.constant 0 : index
    %c0_70 = arith.constant 0 : index
    %136 = vector.load %arg12[%c0_68, %c0_69, %c0_70] : memref<2x1x2048xf32, #tpu.memory_space<vmem>>, vector<1x1x2048xf32>
    %137 = vector.shape_cast %136 : vector<1x1x2048xf32> to vector<1x2048xf32>
    %138 = vector.broadcast %137 : vector<1x2048xf32> to vector<16x2048xf32>
    %139 = arith.addf %135, %138 : vector<16x2048xf32>
    %cst_71 = arith.constant 0.000000e+00 : f32
    %140 = vector.broadcast %cst_71 : f32 to vector<16x2048xf32>
    %141 = arith.maximumf %139, %140 : vector<16x2048xf32>
    %142 = arith.truncf %141 : vector<16x2048xf32> to vector<16x2048xbf16>
    %c0_72 = arith.constant 0 : index
    %c0_73 = arith.constant 0 : index
    %c0_74 = arith.constant 0 : index
    %143 = vector.load %arg13[%c0_72, %c0_73, %c0_74] : memref<2x2048x32xbf16, #tpu.memory_space<vmem>>, vector<1x2048x32xbf16>
    %144 = vector.shape_cast %143 : vector<1x2048x32xbf16> to vector<2048x32xbf16>
    %cst_75 = arith.constant dense<0.000000e+00> : vector<16x32xf32>
    %145 = tpu.matmul %142, %144, %cst_75 {dimension_numbers = #tpu.dot_dimension_numbers<[1], [0], [0], [1], [0, 0, 1, 1], [], []>} : vector<16x2048xbf16>, vector<2048x32xbf16>, vector<16x32xf32> -> vector<16x32xf32>
    %c0_76 = arith.constant 0 : index
    %c0_77 = arith.constant 0 : index
    %c0_78 = arith.constant 0 : index
    %146 = vector.load %arg14[%c0_76, %c0_77, %c0_78] : memref<2x1x32xf32, #tpu.memory_space<vmem>>, vector<1x1x32xf32>
    %147 = vector.shape_cast %146 : vector<1x1x32xf32> to vector<1x32xf32>
    %148 = vector.broadcast %147 : vector<1x32xf32> to vector<16x32xf32>
    %149 = arith.addf %145, %148 : vector<16x32xf32>
    %150 = arith.addf %131, %149 : vector<16x32xf32>
    %c0_79 = arith.constant 0 : index
    %c0_80 = arith.constant 0 : index
    %c0_81 = arith.constant 0 : index
    %151 = vector.load %arg15[%c0_79, %c0_80, %c0_81] : memref<2x1x32xf32, #tpu.memory_space<vmem>>, vector<1x1x32xf32>
    %152 = vector.shape_cast %151 : vector<1x1x32xf32> to vector<1x32xf32>
    %c0_82 = arith.constant 0 : index
    %c0_83 = arith.constant 0 : index
    %c0_84 = arith.constant 0 : index
    %153 = vector.load %arg16[%c0_82, %c0_83, %c0_84] : memref<2x1x32xf32, #tpu.memory_space<vmem>>, vector<1x1x32xf32>
    %154 = vector.shape_cast %153 : vector<1x1x32xf32> to vector<1x32xf32>
    %cst_85 = arith.constant dense<0.000000e+00> : vector<16xf32>
    %155 = vector.multi_reduction <add>, %150, %cst_85 [1] : vector<16x32xf32> to vector<16xf32>
    %156 = vector.shape_cast %155 : vector<16xf32> to vector<16x1xf32>
    %cst_86 = arith.constant 3.200000e+01 : f32
    %157 = vector.broadcast %cst_86 : f32 to vector<16x1xf32>
    %158 = arith.divf %156, %157 : vector<16x1xf32>
    %159 = vector.broadcast %158 : vector<16x1xf32> to vector<16x32xf32>
    %160 = arith.subf %150, %159 : vector<16x32xf32>
    %161 = arith.mulf %160, %160 : vector<16x32xf32>
    %cst_87 = arith.constant dense<0.000000e+00> : vector<16xf32>
    %162 = vector.multi_reduction <add>, %161, %cst_87 [1] : vector<16x32xf32> to vector<16xf32>
    %163 = vector.shape_cast %162 : vector<16xf32> to vector<16x1xf32>
    %cst_88 = arith.constant 3.200000e+01 : f32
    %164 = vector.broadcast %cst_88 : f32 to vector<16x1xf32>
    %165 = arith.divf %163, %164 : vector<16x1xf32>
    %cst_89 = arith.constant 9.99999974E-6 : f32
    %166 = vector.broadcast %cst_89 : f32 to vector<16x1xf32>
    %167 = arith.addf %165, %166 : vector<16x1xf32>
    %168 = math.rsqrt %167 : vector<16x1xf32>
    %169 = vector.broadcast %168 : vector<16x1xf32> to vector<16x32xf32>
    %170 = arith.mulf %160, %169 : vector<16x32xf32>
    %171 = vector.broadcast %152 : vector<1x32xf32> to vector<16x32xf32>
    %172 = arith.mulf %170, %171 : vector<16x32xf32>
    %173 = vector.broadcast %154 : vector<1x32xf32> to vector<16x32xf32>
    %174 = arith.addf %172, %173 : vector<16x32xf32>
    %c1 = arith.constant 1 : index
    %c0_90 = arith.constant 0 : index
    %c0_91 = arith.constant 0 : index
    %175 = vector.load %arg5[%c1, %c0_90, %c0_91] : memref<2x32x96xf32, #tpu.memory_space<vmem>>, vector<1x32x96xf32>
    %176 = vector.shape_cast %175 : vector<1x32x96xf32> to vector<32x96xf32>
    %cst_92 = arith.constant dense<0.000000e+00> : vector<16x96xf32>
    %177 = tpu.matmul %174, %176, %cst_92 {dimension_numbers = #tpu.dot_dimension_numbers<[1], [0], [0], [1], [0, 0, 1, 1], [], []>} : vector<16x32xf32>, vector<32x96xf32>, vector<16x96xf32> -> vector<16x96xf32>
    %c1_93 = arith.constant 1 : index
    %c0_94 = arith.constant 0 : index
    %c0_95 = arith.constant 0 : index
    %178 = vector.load %arg6[%c1_93, %c0_94, %c0_95] : memref<2x1x96xf32, #tpu.memory_space<vmem>>, vector<1x1x96xf32>
    %179 = vector.shape_cast %178 : vector<1x1x96xf32> to vector<1x96xf32>
    %180 = vector.broadcast %179 : vector<1x96xf32> to vector<16x96xf32>
    %181 = arith.addf %177, %180 : vector<16x96xf32>
    %cst_96 = arith.constant 0.000000e+00 : f32
    %182 = vector.broadcast %cst_96 : f32 to vector<16x32xf32>
    %183 = vector.extract_strided_slice %181 {offsets = [0, 0], sizes = [16, 8], strides = [1, 1]} : vector<16x96xf32> to vector<16x8xf32>
    %184 = vector.extract_strided_slice %181 {offsets = [0, 32], sizes = [16, 8], strides = [1, 1]} : vector<16x96xf32> to vector<16x8xf32>
    %185 = vector.extract_strided_slice %181 {offsets = [0, 64], sizes = [16, 8], strides = [1, 1]} : vector<16x96xf32> to vector<16x8xf32>
    "tpu.trace_start"() <{level = 10 : i32, message = "qd,kd->qk"}> : () -> ()
    %cst_97 = arith.constant dense<0.000000e+00> : vector<16x16xf32>
    %186 = tpu.matmul %183, %184, %cst_97 {dimension_numbers = #tpu.dot_dimension_numbers<[1], [1], [0], [0], [0, 0, 1, 0], [], []>} : vector<16x8xf32>, vector<16x8xf32>, vector<16x16xf32> -> vector<16x16xf32>
    "tpu.trace_stop"() : () -> ()
    %187 = arith.addf %186, %0 : vector<16x16xf32>
    %cst_98 = arith.constant dense<0xFF800000> : vector<16xf32>
    %188 = vector.multi_reduction <maximumf>, %187, %cst_98 [1] : vector<16x16xf32> to vector<16xf32>
    %189 = vector.shape_cast %188 : vector<16xf32> to vector<16x1xf32>
    %190 = vector.broadcast %189 : vector<16x1xf32> to vector<16x16xf32>
    %191 = arith.subf %187, %190 : vector<16x16xf32>
    %192 = math.exp %191 : vector<16x16xf32>
    %cst_99 = arith.constant dense<0.000000e+00> : vector<16xf32>
    %193 = vector.multi_reduction <add>, %192, %cst_99 [1] : vector<16x16xf32> to vector<16xf32>
    %194 = vector.shape_cast %193 : vector<16xf32> to vector<16x1xf32>
    %195 = tpu.reciprocal %194 {approx = true} : vector<16x1xf32> -> vector<16x1xf32>
    %196 = vector.broadcast %195 : vector<16x1xf32> to vector<16x16xf32>
    %197 = arith.mulf %192, %196 : vector<16x16xf32>
    %cst_100 = arith.constant dense<0.000000e+00> : vector<16x8xf32>
    %198 = tpu.matmul %197, %185, %cst_100 {dimension_numbers = #tpu.dot_dimension_numbers<[1], [0], [0], [1], [0, 0, 1, 1], [], []>} : vector<16x16xf32>, vector<16x8xf32>, vector<16x8xf32> -> vector<16x8xf32>
    %c1_101 = arith.constant 1 : index
    %c0_102 = arith.constant 0 : index
    %c0_103 = arith.constant 0 : index
    %199 = vector.load %arg7[%c1_101, %c0_102, %c0_103] : memref<2x32x32xf32, #tpu.memory_space<vmem>>, vector<1x32x32xf32>
    %200 = vector.shape_cast %199 : vector<1x32x32xf32> to vector<32x32xf32>
    %201 = vector.extract_strided_slice %200 {offsets = [0, 0], sizes = [8, 32], strides = [1, 1]} : vector<32x32xf32> to vector<8x32xf32>
    %cst_104 = arith.constant dense<0.000000e+00> : vector<16x32xf32>
    %202 = tpu.matmul %198, %201, %cst_104 {dimension_numbers = #tpu.dot_dimension_numbers<[1], [0], [0], [1], [0, 0, 1, 1], [], []>} : vector<16x8xf32>, vector<8x32xf32>, vector<16x32xf32> -> vector<16x32xf32>
    %203 = arith.addf %182, %202 : vector<16x32xf32>
    %204 = vector.extract_strided_slice %181 {offsets = [0, 8], sizes = [16, 8], strides = [1, 1]} : vector<16x96xf32> to vector<16x8xf32>
    %205 = vector.extract_strided_slice %181 {offsets = [0, 40], sizes = [16, 8], strides = [1, 1]} : vector<16x96xf32> to vector<16x8xf32>
    %206 = vector.extract_strided_slice %181 {offsets = [0, 72], sizes = [16, 8], strides = [1, 1]} : vector<16x96xf32> to vector<16x8xf32>
    "tpu.trace_start"() <{level = 10 : i32, message = "qd,kd->qk"}> : () -> ()
    %cst_105 = arith.constant dense<0.000000e+00> : vector<16x16xf32>
    %207 = tpu.matmul %204, %205, %cst_105 {dimension_numbers = #tpu.dot_dimension_numbers<[1], [1], [0], [0], [0, 0, 1, 0], [], []>} : vector<16x8xf32>, vector<16x8xf32>, vector<16x16xf32> -> vector<16x16xf32>
    "tpu.trace_stop"() : () -> ()
    %208 = arith.addf %207, %0 : vector<16x16xf32>
    %cst_106 = arith.constant dense<0xFF800000> : vector<16xf32>
    %209 = vector.multi_reduction <maximumf>, %208, %cst_106 [1] : vector<16x16xf32> to vector<16xf32>
    %210 = vector.shape_cast %209 : vector<16xf32> to vector<16x1xf32>
    %211 = vector.broadcast %210 : vector<16x1xf32> to vector<16x16xf32>
    %212 = arith.subf %208, %211 : vector<16x16xf32>
    %213 = math.exp %212 : vector<16x16xf32>
    %cst_107 = arith.constant dense<0.000000e+00> : vector<16xf32>
    %214 = vector.multi_reduction <add>, %213, %cst_107 [1] : vector<16x16xf32> to vector<16xf32>
    %215 = vector.shape_cast %214 : vector<16xf32> to vector<16x1xf32>
    %216 = tpu.reciprocal %215 {approx = true} : vector<16x1xf32> -> vector<16x1xf32>
    %217 = vector.broadcast %216 : vector<16x1xf32> to vector<16x16xf32>
    %218 = arith.mulf %213, %217 : vector<16x16xf32>
    %cst_108 = arith.constant dense<0.000000e+00> : vector<16x8xf32>
    %219 = tpu.matmul %218, %206, %cst_108 {dimension_numbers = #tpu.dot_dimension_numbers<[1], [0], [0], [1], [0, 0, 1, 1], [], []>} : vector<16x16xf32>, vector<16x8xf32>, vector<16x8xf32> -> vector<16x8xf32>
    %c1_109 = arith.constant 1 : index
    %c0_110 = arith.constant 0 : index
    %c0_111 = arith.constant 0 : index
    %220 = vector.load %arg7[%c1_109, %c0_110, %c0_111] : memref<2x32x32xf32, #tpu.memory_space<vmem>>, vector<1x32x32xf32>
    %221 = vector.shape_cast %220 : vector<1x32x32xf32> to vector<32x32xf32>
    %222 = vector.extract_strided_slice %221 {offsets = [8, 0], sizes = [8, 32], strides = [1, 1]} : vector<32x32xf32> to vector<8x32xf32>
    %cst_112 = arith.constant dense<0.000000e+00> : vector<16x32xf32>
    %223 = tpu.matmul %219, %222, %cst_112 {dimension_numbers = #tpu.dot_dimension_numbers<[1], [0], [0], [1], [0, 0, 1, 1], [], []>} : vector<16x8xf32>, vector<8x32xf32>, vector<16x32xf32> -> vector<16x32xf32>
    %224 = arith.addf %203, %223 : vector<16x32xf32>
    %225 = vector.extract_strided_slice %181 {offsets = [0, 16], sizes = [16, 8], strides = [1, 1]} : vector<16x96xf32> to vector<16x8xf32>
    %226 = vector.extract_strided_slice %181 {offsets = [0, 48], sizes = [16, 8], strides = [1, 1]} : vector<16x96xf32> to vector<16x8xf32>
    %227 = vector.extract_strided_slice %181 {offsets = [0, 80], sizes = [16, 8], strides = [1, 1]} : vector<16x96xf32> to vector<16x8xf32>
    "tpu.trace_start"() <{level = 10 : i32, message = "qd,kd->qk"}> : () -> ()
    %cst_113 = arith.constant dense<0.000000e+00> : vector<16x16xf32>
    %228 = tpu.matmul %225, %226, %cst_113 {dimension_numbers = #tpu.dot_dimension_numbers<[1], [1], [0], [0], [0, 0, 1, 0], [], []>} : vector<16x8xf32>, vector<16x8xf32>, vector<16x16xf32> -> vector<16x16xf32>
    "tpu.trace_stop"() : () -> ()
    %229 = arith.addf %228, %0 : vector<16x16xf32>
    %cst_114 = arith.constant dense<0xFF800000> : vector<16xf32>
    %230 = vector.multi_reduction <maximumf>, %229, %cst_114 [1] : vector<16x16xf32> to vector<16xf32>
    %231 = vector.shape_cast %230 : vector<16xf32> to vector<16x1xf32>
    %232 = vector.broadcast %231 : vector<16x1xf32> to vector<16x16xf32>
    %233 = arith.subf %229, %232 : vector<16x16xf32>
    %234 = math.exp %233 : vector<16x16xf32>
    %cst_115 = arith.constant dense<0.000000e+00> : vector<16xf32>
    %235 = vector.multi_reduction <add>, %234, %cst_115 [1] : vector<16x16xf32> to vector<16xf32>
    %236 = vector.shape_cast %235 : vector<16xf32> to vector<16x1xf32>
    %237 = tpu.reciprocal %236 {approx = true} : vector<16x1xf32> -> vector<16x1xf32>
    %238 = vector.broadcast %237 : vector<16x1xf32> to vector<16x16xf32>
    %239 = arith.mulf %234, %238 : vector<16x16xf32>
    %cst_116 = arith.constant dense<0.000000e+00> : vector<16x8xf32>
    %240 = tpu.matmul %239, %227, %cst_116 {dimension_numbers = #tpu.dot_dimension_numbers<[1], [0], [0], [1], [0, 0, 1, 1], [], []>} : vector<16x16xf32>, vector<16x8xf32>, vector<16x8xf32> -> vector<16x8xf32>
    %c1_117 = arith.constant 1 : index
    %c0_118 = arith.constant 0 : index
    %c0_119 = arith.constant 0 : index
    %241 = vector.load %arg7[%c1_117, %c0_118, %c0_119] : memref<2x32x32xf32, #tpu.memory_space<vmem>>, vector<1x32x32xf32>
    %242 = vector.shape_cast %241 : vector<1x32x32xf32> to vector<32x32xf32>
    %243 = vector.extract_strided_slice %242 {offsets = [16, 0], sizes = [8, 32], strides = [1, 1]} : vector<32x32xf32> to vector<8x32xf32>
    %cst_120 = arith.constant dense<0.000000e+00> : vector<16x32xf32>
    %244 = tpu.matmul %240, %243, %cst_120 {dimension_numbers = #tpu.dot_dimension_numbers<[1], [0], [0], [1], [0, 0, 1, 1], [], []>} : vector<16x8xf32>, vector<8x32xf32>, vector<16x32xf32> -> vector<16x32xf32>
    %245 = arith.addf %224, %244 : vector<16x32xf32>
    %246 = vector.extract_strided_slice %181 {offsets = [0, 24], sizes = [16, 8], strides = [1, 1]} : vector<16x96xf32> to vector<16x8xf32>
    %247 = vector.extract_strided_slice %181 {offsets = [0, 56], sizes = [16, 8], strides = [1, 1]} : vector<16x96xf32> to vector<16x8xf32>
    %248 = vector.extract_strided_slice %181 {offsets = [0, 88], sizes = [16, 8], strides = [1, 1]} : vector<16x96xf32> to vector<16x8xf32>
    "tpu.trace_start"() <{level = 10 : i32, message = "qd,kd->qk"}> : () -> ()
    %cst_121 = arith.constant dense<0.000000e+00> : vector<16x16xf32>
    %249 = tpu.matmul %246, %247, %cst_121 {dimension_numbers = #tpu.dot_dimension_numbers<[1], [1], [0], [0], [0, 0, 1, 0], [], []>} : vector<16x8xf32>, vector<16x8xf32>, vector<16x16xf32> -> vector<16x16xf32>
    "tpu.trace_stop"() : () -> ()
    %250 = arith.addf %249, %0 : vector<16x16xf32>
    %cst_122 = arith.constant dense<0xFF800000> : vector<16xf32>
    %251 = vector.multi_reduction <maximumf>, %250, %cst_122 [1] : vector<16x16xf32> to vector<16xf32>
    %252 = vector.shape_cast %251 : vector<16xf32> to vector<16x1xf32>
    %253 = vector.broadcast %252 : vector<16x1xf32> to vector<16x16xf32>
    %254 = arith.subf %250, %253 : vector<16x16xf32>
    %255 = math.exp %254 : vector<16x16xf32>
    %cst_123 = arith.constant dense<0.000000e+00> : vector<16xf32>
    %256 = vector.multi_reduction <add>, %255, %cst_123 [1] : vector<16x16xf32> to vector<16xf32>
    %257 = vector.shape_cast %256 : vector<16xf32> to vector<16x1xf32>
    %258 = tpu.reciprocal %257 {approx = true} : vector<16x1xf32> -> vector<16x1xf32>
    %259 = vector.broadcast %258 : vector<16x1xf32> to vector<16x16xf32>
    %260 = arith.mulf %255, %259 : vector<16x16xf32>
    %cst_124 = arith.constant dense<0.000000e+00> : vector<16x8xf32>
    %261 = tpu.matmul %260, %248, %cst_124 {dimension_numbers = #tpu.dot_dimension_numbers<[1], [0], [0], [1], [0, 0, 1, 1], [], []>} : vector<16x16xf32>, vector<16x8xf32>, vector<16x8xf32> -> vector<16x8xf32>
    %c1_125 = arith.constant 1 : index
    %c0_126 = arith.constant 0 : index
    %c0_127 = arith.constant 0 : index
    %262 = vector.load %arg7[%c1_125, %c0_126, %c0_127] : memref<2x32x32xf32, #tpu.memory_space<vmem>>, vector<1x32x32xf32>
    %263 = vector.shape_cast %262 : vector<1x32x32xf32> to vector<32x32xf32>
    %264 = vector.extract_strided_slice %263 {offsets = [24, 0], sizes = [8, 32], strides = [1, 1]} : vector<32x32xf32> to vector<8x32xf32>
    %cst_128 = arith.constant dense<0.000000e+00> : vector<16x32xf32>
    %265 = tpu.matmul %261, %264, %cst_128 {dimension_numbers = #tpu.dot_dimension_numbers<[1], [0], [0], [1], [0, 0, 1, 1], [], []>} : vector<16x8xf32>, vector<8x32xf32>, vector<16x32xf32> -> vector<16x32xf32>
    %266 = arith.addf %245, %265 : vector<16x32xf32>
    %c1_129 = arith.constant 1 : index
    %c0_130 = arith.constant 0 : index
    %c0_131 = arith.constant 0 : index
    %267 = vector.load %arg8[%c1_129, %c0_130, %c0_131] : memref<2x1x32xf32, #tpu.memory_space<vmem>>, vector<1x1x32xf32>
    %268 = vector.shape_cast %267 : vector<1x1x32xf32> to vector<1x32xf32>
    %269 = vector.broadcast %268 : vector<1x32xf32> to vector<16x32xf32>
    %270 = arith.addf %266, %269 : vector<16x32xf32>
    %271 = arith.addf %174, %270 : vector<16x32xf32>
    %c1_132 = arith.constant 1 : index
    %c0_133 = arith.constant 0 : index
    %c0_134 = arith.constant 0 : index
    %272 = vector.load %arg9[%c1_132, %c0_133, %c0_134] : memref<2x1x32xf32, #tpu.memory_space<vmem>>, vector<1x1x32xf32>
    %273 = vector.shape_cast %272 : vector<1x1x32xf32> to vector<1x32xf32>
    %c1_135 = arith.constant 1 : index
    %c0_136 = arith.constant 0 : index
    %c0_137 = arith.constant 0 : index
    %274 = vector.load %arg10[%c1_135, %c0_136, %c0_137] : memref<2x1x32xf32, #tpu.memory_space<vmem>>, vector<1x1x32xf32>
    %275 = vector.shape_cast %274 : vector<1x1x32xf32> to vector<1x32xf32>
    %cst_138 = arith.constant dense<0.000000e+00> : vector<16xf32>
    %276 = vector.multi_reduction <add>, %271, %cst_138 [1] : vector<16x32xf32> to vector<16xf32>
    %277 = vector.shape_cast %276 : vector<16xf32> to vector<16x1xf32>
    %cst_139 = arith.constant 3.200000e+01 : f32
    %278 = vector.broadcast %cst_139 : f32 to vector<16x1xf32>
    %279 = arith.divf %277, %278 : vector<16x1xf32>
    %280 = vector.broadcast %279 : vector<16x1xf32> to vector<16x32xf32>
    %281 = arith.subf %271, %280 : vector<16x32xf32>
    %282 = arith.mulf %281, %281 : vector<16x32xf32>
    %cst_140 = arith.constant dense<0.000000e+00> : vector<16xf32>
    %283 = vector.multi_reduction <add>, %282, %cst_140 [1] : vector<16x32xf32> to vector<16xf32>
    %284 = vector.shape_cast %283 : vector<16xf32> to vector<16x1xf32>
    %cst_141 = arith.constant 3.200000e+01 : f32
    %285 = vector.broadcast %cst_141 : f32 to vector<16x1xf32>
    %286 = arith.divf %284, %285 : vector<16x1xf32>
    %cst_142 = arith.constant 9.99999974E-6 : f32
    %287 = vector.broadcast %cst_142 : f32 to vector<16x1xf32>
    %288 = arith.addf %286, %287 : vector<16x1xf32>
    %289 = math.rsqrt %288 : vector<16x1xf32>
    %290 = vector.broadcast %289 : vector<16x1xf32> to vector<16x32xf32>
    %291 = arith.mulf %281, %290 : vector<16x32xf32>
    %292 = vector.broadcast %273 : vector<1x32xf32> to vector<16x32xf32>
    %293 = arith.mulf %291, %292 : vector<16x32xf32>
    %294 = vector.broadcast %275 : vector<1x32xf32> to vector<16x32xf32>
    %295 = arith.addf %293, %294 : vector<16x32xf32>
    %296 = arith.truncf %295 : vector<16x32xf32> to vector<16x32xbf16>
    %c1_143 = arith.constant 1 : index
    %c0_144 = arith.constant 0 : index
    %c0_145 = arith.constant 0 : index
    %297 = vector.load %arg11[%c1_143, %c0_144, %c0_145] : memref<2x32x2048xbf16, #tpu.memory_space<vmem>>, vector<1x32x2048xbf16>
    %298 = vector.shape_cast %297 : vector<1x32x2048xbf16> to vector<32x2048xbf16>
    %cst_146 = arith.constant dense<0.000000e+00> : vector<16x2048xf32>
    %299 = tpu.matmul %296, %298, %cst_146 {dimension_numbers = #tpu.dot_dimension_numbers<[1], [0], [0], [1], [0, 0, 1, 1], [], []>} : vector<16x32xbf16>, vector<32x2048xbf16>, vector<16x2048xf32> -> vector<16x2048xf32>
    %c1_147 = arith.constant 1 : index
    %c0_148 = arith.constant 0 : index
    %c0_149 = arith.constant 0 : index
    %300 = vector.load %arg12[%c1_147, %c0_148, %c0_149] : memref<2x1x2048xf32, #tpu.memory_space<vmem>>, vector<1x1x2048xf32>
    %301 = vector.shape_cast %300 : vector<1x1x2048xf32> to vector<1x2048xf32>
    %302 = vector.broadcast %301 : vector<1x2048xf32> to vector<16x2048xf32>
    %303 = arith.addf %299, %302 : vector<16x2048xf32>
    %cst_150 = arith.constant 0.000000e+00 : f32
    %304 = vector.broadcast %cst_150 : f32 to vector<16x2048xf32>
    %305 = arith.maximumf %303, %304 : vector<16x2048xf32>
    %306 = arith.truncf %305 : vector<16x2048xf32> to vector<16x2048xbf16>
    %c1_151 = arith.constant 1 : index
    %c0_152 = arith.constant 0 : index
    %c0_153 = arith.constant 0 : index
    %307 = vector.load %arg13[%c1_151, %c0_152, %c0_153] : memref<2x2048x32xbf16, #tpu.memory_space<vmem>>, vector<1x2048x32xbf16>
    %308 = vector.shape_cast %307 : vector<1x2048x32xbf16> to vector<2048x32xbf16>
    %cst_154 = arith.constant dense<0.000000e+00> : vector<16x32xf32>
    %309 = tpu.matmul %306, %308, %cst_154 {dimension_numbers = #tpu.dot_dimension_numbers<[1], [0], [0], [1], [0, 0, 1, 1], [], []>} : vector<16x2048xbf16>, vector<2048x32xbf16>, vector<16x32xf32> -> vector<16x32xf32>
    %c1_155 = arith.constant 1 : index
    %c0_156 = arith.constant 0 : index
    %c0_157 = arith.constant 0 : index
    %310 = vector.load %arg14[%c1_155, %c0_156, %c0_157] : memref<2x1x32xf32, #tpu.memory_space<vmem>>, vector<1x1x32xf32>
    %311 = vector.shape_cast %310 : vector<1x1x32xf32> to vector<1x32xf32>
    %312 = vector.broadcast %311 : vector<1x32xf32> to vector<16x32xf32>
    %313 = arith.addf %309, %312 : vector<16x32xf32>
    %314 = arith.addf %295, %313 : vector<16x32xf32>
    %c1_158 = arith.constant 1 : index
    %c0_159 = arith.constant 0 : index
    %c0_160 = arith.constant 0 : index
    %315 = vector.load %arg15[%c1_158, %c0_159, %c0_160] : memref<2x1x32xf32, #tpu.memory_space<vmem>>, vector<1x1x32xf32>
    %316 = vector.shape_cast %315 : vector<1x1x32xf32> to vector<1x32xf32>
    %c1_161 = arith.constant 1 : index
    %c0_162 = arith.constant 0 : index
    %c0_163 = arith.constant 0 : index
    %317 = vector.load %arg16[%c1_161, %c0_162, %c0_163] : memref<2x1x32xf32, #tpu.memory_space<vmem>>, vector<1x1x32xf32>
    %318 = vector.shape_cast %317 : vector<1x1x32xf32> to vector<1x32xf32>
    %cst_164 = arith.constant dense<0.000000e+00> : vector<16xf32>
    %319 = vector.multi_reduction <add>, %314, %cst_164 [1] : vector<16x32xf32> to vector<16xf32>
    %320 = vector.shape_cast %319 : vector<16xf32> to vector<16x1xf32>
    %cst_165 = arith.constant 3.200000e+01 : f32
    %321 = vector.broadcast %cst_165 : f32 to vector<16x1xf32>
    %322 = arith.divf %320, %321 : vector<16x1xf32>
    %323 = vector.broadcast %322 : vector<16x1xf32> to vector<16x32xf32>
    %324 = arith.subf %314, %323 : vector<16x32xf32>
    %325 = arith.mulf %324, %324 : vector<16x32xf32>
    %cst_166 = arith.constant dense<0.000000e+00> : vector<16xf32>
    %326 = vector.multi_reduction <add>, %325, %cst_166 [1] : vector<16x32xf32> to vector<16xf32>
    %327 = vector.shape_cast %326 : vector<16xf32> to vector<16x1xf32>
    %cst_167 = arith.constant 3.200000e+01 : f32
    %328 = vector.broadcast %cst_167 : f32 to vector<16x1xf32>
    %329 = arith.divf %327, %328 : vector<16x1xf32>
    %cst_168 = arith.constant 9.99999974E-6 : f32
    %330 = vector.broadcast %cst_168 : f32 to vector<16x1xf32>
    %331 = arith.addf %329, %330 : vector<16x1xf32>
    %332 = math.rsqrt %331 : vector<16x1xf32>
    %333 = vector.broadcast %332 : vector<16x1xf32> to vector<16x32xf32>
    %334 = arith.mulf %324, %333 : vector<16x32xf32>
    %335 = vector.broadcast %316 : vector<1x32xf32> to vector<16x32xf32>
    %336 = arith.mulf %334, %335 : vector<16x32xf32>
    %337 = vector.broadcast %318 : vector<1x32xf32> to vector<16x32xf32>
    %338 = arith.addf %336, %337 : vector<16x32xf32>
    %339 = vector.shape_cast %338 : vector<16x32xf32> to vector<2x8x32xf32>
    %cst_169 = arith.constant dense<0.000000e+00> : vector<2x32xf32>
    %340 = vector.multi_reduction <add>, %339, %cst_169 [1] : vector<2x8x32xf32> to vector<2x32xf32>
    %cst_170 = arith.constant 8.000000e+00 : f32
    %341 = vector.broadcast %cst_170 : f32 to vector<2x32xf32>
    %342 = arith.divf %340, %341 : vector<2x32xf32>
    %c0_171 = arith.constant 0 : index
    %c0_172 = arith.constant 0 : index
    %343 = vector.load %arg17[%c0_171, %c0_172] : memref<1x32xf32, #tpu.memory_space<vmem>>, vector<1x32xf32>
    %344 = vector.broadcast %343 : vector<1x32xf32> to vector<2x32xf32>
    %345 = arith.mulf %342, %344 : vector<2x32xf32>
    %cst_173 = arith.constant dense<0.000000e+00> : vector<2xf32>
    %346 = vector.multi_reduction <add>, %345, %cst_173 [1] : vector<2x32xf32> to vector<2xf32>
    %347 = vector.shape_cast %346 : vector<2xf32> to vector<2x1xf32>
    %c0_174 = arith.constant 0 : index
    %c0_175 = arith.constant 0 : index
    %348 = vector.load %arg18[%c0_174, %c0_175] : memref<1x1xf32, #tpu.memory_space<vmem>>, vector<1x1xf32>
    %349 = vector.broadcast %348 : vector<1x1xf32> to vector<2x1xf32>
    %350 = arith.addf %347, %349 : vector<2x1xf32>
    %c0_176 = arith.constant 0 : index
    %c0_177 = arith.constant 0 : index
    %351 = vector.load %arg19[%c0_176, %c0_177] : memref<2x1xf32, #tpu.memory_space<vmem>>, vector<2x1xf32>
    tpu.vector_store %arg19[%c0_176, %c0_177], %350 {strides = array<i32>} : memref<2x1xf32, #tpu.memory_space<vmem>>, vector<2x1xf32>,
    return
  }
}

</mosaic_0001>

<bundles_post_ra>
// kernel: tpu_custom_call.1
= control target key start
LH: loop header
LB: loop body
LE: loop exit
PB: predicated region body
PF: predicated region fallthrough
CT: control target
= control target key end

     0   :  { %vm84_vm0 = vcmask 1043456   ;;  %vm77_vm1 = vcmask 31744   ;;  %vm177_vm2 = vcmask 261120   ;;  %vm265_vm3 = vcmask 64512   ;;  %s8842_s29 = smov 64   ;;  %s8844_s30 = smov 120   ;;  %s10524_s3 = inlined_call_operand.vmem [shape: f32[4,32], index: 3, kind: input, shape index: {}]   ;;  %s10525_s0 = inlined_call_operand.vmem [shape: f32[2,8,4], index: 0, kind: input, shape index: {}]   ;;  %s10526_s5 = inlined_call_operand.vmem [shape: f32[2,32,96], index: 5, kind: input, shape index: {}]   ;;  %s10527_s4 = inlined_call_operand.vmem [shape: f32[1,32], index: 4, kind: input, shape index: {}]   ;;  %s10528_s2 = inlined_call_operand.vmem [shape: f32[8,32], index: 2, kind: input, shape index: {}]   ;;  %s10529_s6 = inlined_call_operand.vmem [shape: f32[2,1,96], index: 6, kind: input, shape index: {}]   ;;  %s10530_s1 = inlined_call_operand.vmem [shape: f32[16,16], index: 1, kind: input, shape index: {}]   ;;  %s10531_s7 = inlined_call_operand.vmem [shape: f32[2,32,32], index: 7, kind: input, shape index: {}]   ;;  %s10532_s8 = inlined_call_operand.vmem [shape: f32[2,1,32], index: 8, kind: input, shape index: {}]   ;;  %s10533_s11 = inlined_call_operand.vmem [shape: bf16[2,32,2048], index: 11, kind: input, shape index: {}]   ;;  %s10534_s13 = inlined_call_operand.vmem [shape: bf16[2,2048,32], index: 13, kind: input, shape index: {}]   ;;  %s10535_s9 = inlined_call_operand.vmem [shape: f32[2,1,32], index: 9, kind: input, shape index: {}]   ;;  %s10536_s10 = inlined_call_operand.vmem [shape: f32[2,1,32], index: 10, kind: input, shape index: {}]   ;;  %s10537_s12 = inlined_call_operand.vmem [shape: f32[2,1,2048], index: 12, kind: input, shape index: {}]   ;;  %s10538_s14 = inlined_call_operand.vmem [shape: f32[2,1,32], index: 14, kind: input, shape index: {}]   ;;  %s10539_s15 = inlined_call_operand.vmem [shape: f32[2,1,32], index: 15, kind: input, shape index: {}]   ;;  %s10540_s16 = inlined_call_operand.vmem [shape: f32[2,1,32], index: 16, kind: input, shape index: {}]   ;;  %s10541_s18 = inlined_call_operand.<no memory space> [shape: f32[1,1], index: 18, kind: input, shape index: {}]   ;;  %s10542_s17 = inlined_call_operand.vmem [shape: f32[1,32], index: 17, kind: input, shape index: {}]   ;;  %s10543_s19 = inlined_call_operand.vmem [shape: f32[2,1], index: 19, kind: output, shape index: {}]  }
   0x1   :  { %10554 = sst [smem:[#allocation3_spill]] %s10524_s3  ;;  %v163_v12 = vld [vmem:[%s10528_s2] sm:$0xff]  ;;  %s8841_s2 = smov 96   ;;  %vm9005_vm4 = vmpackc.low %vm265_vm3, %vm265_vm3  ;;  %v9018_v28 = vld [vmem:[%s10530_s1 + $0x8] sm:$0xff]  ;;  %vm349_vm5 = vcmask 130048   ;;  %vm6919_vm6 = vcmask 1041409  }
   0x2   :  { %10555 = sst [smem:[#allocation4_spill]] %s10525_s0  ;;  %s10558_s20 = sld [smem:[#allocation3_spill]]  ;;  %v6944_v17 = vld [vmem:[%s10529_s6] ss:$0 sm:$0xff]  ;;  %vm6922_vm7 = vcmask 254976   ;;  %vm6934_vm8 = vcmask 1024  }
   0x3   :  { %10556 = sst [smem:[#allocation5_spill]] %s10526_s5  ;;  %s10559_s22 = sld [smem:[#allocation4_spill]]  ;;  %v9023_v29 = vld [vmem:[%s10530_s1] sm:$0xff] }
   0x4   :  { %10557 = sst [smem:[#allocation6_spill]] %s10527_s4  ;;  %s10560_s4 = sld [smem:[#allocation5_spill]] }
   0x5   :  { %s10561_s0 = sld [smem:[#allocation6_spill]]  ;;  %s8843_s3 = smov 88  }
   0x6   :  { %s10552_s21 = smov 112   ;;  %s10548_s5 = smov 104  }
   0x7   :  { %s10547_s23 = smov 48   ;;  %s10546_s24 = smov 40  }
   0x8   :  { %v69_v0 = vld [vmem:[%s10558_s20] sm:$0xf]  ;;  %s8845_s20 = smov 80   ;;  %s10569_s28 = smov 40  }
   0x9   :  { %v67_v1 = vld [vmem:[%s10559_s22] sm:$0xff]  ;;  %v68_v2 = vld [vmem:[%s10559_s22 + $0x8] sm:$0xff]  ;;  %8124 = vmatprep.subr.msk.mxu0 %vm84_vm0, %v69_v0  ;;  %s10551_s22 = smov 72  }
   0xa   :  { %8126 = vmatprep.mubr.msk.f32.mxu0 %vm77_vm1, %v67_v1  ;;  %v166_v3 = vld [vmem:[%s10560_s4] sm:$0xff]  ;;  %v167_v4 = vld [vmem:[%s10560_s4 + $0x8] sm:$0xff]  ;;  %8125 = vmatpush3.msk.msra.mxu0 %vm84_vm0, %v69_v0  ;;  %v168_v6 = vld [vmem:[%s10560_s4 + $0x10] sm:$0xff] }
   0xb   :  { %v8303_v5 = vpack.c.bf16 %v167_v4, %v166_v3  ;;  %8127 = vmatmul.mubr.msk.f32.vlgmr.msra.gmra.mrb[0].mxu0 %vm77_vm1, %v68_v2  ;;  %v169_v7 = vld [vmem:[%s10560_s4 + $0x18] sm:$0xff]  ;;  %v6940_v9 = vld [vmem:[%s10561_s0] ss:$0 sm:$0xff]  ;;  %s10550_s0 = smov 56  }
   0xc   :  { %v8307_v8 = vpack.c.bf16 %v169_v7, %v168_v6 }
   0xd   :  { %8304 = vmatprep.subr.bf16.mxu1 %v8303_v5 }
   0xe   :  { %8306 = vmatpush3.bf16.msra.mxu1 %v8303_v5 }
   0xf   :  { %8308 = vmatprep.subr.bf16.mxu1 %v8307_v8 }
  0x12   :  { %8310 = vmatpush3.bf16.msra.mxu1 %v8307_v8 }
  0xde   :  { %v8128_v10 = vpop.f32.mrb[0].mxu0 }
  0xdf   :  { %v160_v11 = vadd.f32 %v8128_v10, %v6940_v9  ;;  %v154_v13 = vpop.f32.mrb[1].mxu0 }
  0xe0   :  { %v155_v14 = vadd.f32 %v6940_v9, %v154_v13 }
  0xe1   :  { %v8982_v16 = vadd.f32 %v163_v12, %v160_v11 }
  0xe2   :  { %v8980_v15 = vadd.f32 %v163_v12, %v155_v14 }
  0xe4   :  { %8137 = vmatprep.mubr.msk.f32.mxu1 %vm177_vm2, %v8980_v15 }
  0xe5   :  { %8138 = vmatmul.mubr.msk.f32.vlgmr.msra.gmra.mrb[0].mxu1 %vm177_vm2, %v8982_v16 }
 0x1b8   :  { %v8139_v18 = vpop.f32.mrb[0].mxu1 }
 0x1b9   :  { %v8991_v19 = vadd.f32 %v8139_v18, %v6944_v17  ;;  %v250_v20 = vpop.f32.mrb[1].mxu1 }
 0x1ba   :  { %v8993_v21 = vadd.f32 %v6944_v17, %v250_v20 }
 0x1bc   :  { %8144 = vmatprep.mubr.msk.f32.mxu0 %vm265_vm3, %v8993_v21  ;;  %v8999_v22 = vpack.i.bf16 %v8991_v19, %v8993_v21 }
 0x1be   :  { %8424 = vrot.lane.b32.xlu0 %v8999_v22, %s8841_s2 }
 0x230   :  { %v8425_v23 = vpop.permute.xlu0 %8424 }
 0x231   :  { %v8427_v24 = vunpack.i.h.bf16 %v8425_v23  ;;  %v8426_v25 = vunpack.i.l.bf16 %v8425_v23 }
 0x233   :  { %v8311_v27 = vpack.c.bf16 %v8427_v24, %v8426_v25 }
 0x235   :  { %8313 = vmatprep.subr.msk.bf16.mxu0 %vm9005_vm4, %v8311_v27 }
 0x236   :  { %8316 = vmatpush3.bf16.xpose.msk.msra.mxu0 %vm9005_vm4, %v8311_v27 }
 0x23d   :  { %8145 = vmatmul.mubr.msk.f32.vlgmr.msra.gmra.mrb[2].mxu0 %vm265_vm3, %v8991_v19 }
 0x310   :  { %v8146_v30 = vpop.f32.mrb[2].mxu0 }
 0x311   :  { %v346_v31 = vadd.f32 %v8146_v30, %v9018_v28  ;;  %v340_v32 = vpop.f32.mrb[3].mxu0 }
 0x312   :  { %v341_v33 = vadd.f32 %v340_v32, %v9023_v29 }
 0x313   :  { %v353_v34 = vsel %vm349_vm5, %v346_v31, -inf }
 0x314   :  { %354 = vmax.xlane.f32.xlu1 %v353_v34  ;;  %v350_v35 = vsel %vm349_vm5, %v341_v33, -inf }
 0x315   :  { %351 = vmax.xlane.f32.xlu0 %v350_v35 }
 0x325   :  { %8429 = vrot.lane.b32.xlu1 %v8999_v22, %s8842_s29 }
 0x329   :  { %8434 = vrot.lane.b32.xlu1 %v8999_v22, %s8843_s3 }
 0x32b   :  { %462 = vrot.lane.b32.xlu0 %v8991_v19, %s8844_s30 }
 0x3a1   :  { %v355_v36 = vpop.xlane.xlu1 %354 }
 0x3a2   :  { %v357_v37 = vsub.f32 %v346_v31, %v355_v36  ;;  %v352_v38 = vpop.xlane.xlu0 %351 }
 0x3a3   :  { %v356_v39 = vsub.f32 %v341_v33, %v352_v38 }
 0x3a4   :  { %v360_v40 = vmul.f32 1.442695, %v357_v37 }
 0x3a5   :  { %v358_v41 = vmul.f32 1.442695, %v356_v39  ;;  %v8430_v42 = vpop.permute.xlu1 %8429 }
 0x3a6   :  { %8759 = vpow2.f32 %v360_v40  ;;  %v8432_v43 = vunpack.i.h.bf16 %v8430_v42  ;;  %v8431_v44 = vunpack.i.l.bf16 %v8430_v42  ;;  %v463_v1 = vpop.permute.xlu0 %462 }
 0x3a7   :  { %8761 = vpow2.f32 %v358_v41 }
 0x3a8   :  { %v8317_v45 = vpack.c.bf16 %v8432_v43, %v8431_v44 }
 0x3a9   :  { %v8435_v46 = vpop.permute.xlu1 %8434 }
 0x3aa   :  { %v8437_v47 = vunpack.i.h.bf16 %v8435_v46  ;;  %v8436_v48 = vunpack.i.l.bf16 %v8435_v46  ;;  %8318 = vmatprep.subr.bf16.mxu0 %v8317_v45 }
 0x3ab   :  { %8320 = vmatpush3.bf16.msra.mxu0 %v8317_v45 }
 0x3ac   :  { %v8321_v49 = vpack.c.bf16 %v8437_v47, %v8436_v48 }
 0x3ae   :  { %8323 = vmatprep.subr.msk.bf16.mxu0 %vm9005_vm4, %v8321_v49 }
 0x3b0   :  { %v8760_v50 = vpop.eup %8759 }
 0x3b1   :  { %v365_v51 = vsel %vm349_vm5, %v8760_v50, 0.0  ;;  %v8762_v52 = vpop.eup %8761 }
 0x3b2   :  { %366 = vadd.xlane.f32.xlu1 %v365_v51  ;;  %v362_v53 = vsel %vm349_vm5, %v8762_v52, 0.0 }
 0x3b6   :  { %363 = vadd.xlane.f32.xlu1 %v362_v53 }
 0x3c7   :  { %460 = vrot.lane.b32.xlu1 %v8993_v21, %s8844_s30 }
 0x3cb   :  { %8439 = vrot.lane.b32.xlu1 %v8999_v22, %s8845_s20 }
 0x3cf   :  { %823 = vrot.lane.b32.xlu1 %v8993_v21, %s10552_s21 }
 0x3d3   :  { %825 = vrot.lane.b32.xlu1 %v8991_v19, %s10552_s21 }
 0x43f   :  { %v367_v54 = vpop.xlane.xlu1 %366 }
 0x440   :  { %8763 = vrcp.f32 %v367_v54 }
 0x443   :  { %v364_v55 = vpop.xlane.xlu1 %363 }
 0x444   :  { %8765 = vrcp.f32 %v364_v55 }
 0x447   :  { %v461_v56 = vpop.permute.xlu1 %460 }
 0x44a   :  { %v8764_v58 = vpop.eup %8763 }
 0x44b   :  { %v8440_v57 = vpop.permute.xlu1 %8439  ;;  %v371_v63 = vmul.f32 %v8764_v58, %v8760_v50 }
 0x44c   :  { %v8442_v60 = vunpack.i.h.bf16 %v8440_v57  ;;  %v8441_v61 = vunpack.i.l.bf16 %v8440_v57 }
 0x44e   :  { %v8766_v59 = vpop.eup %8765  ;;  %v8331_v0 = vpack.c.bf16 %v8442_v60, %v8441_v61  ;;  %v459_v60 = vld [vmem:[%s10531_s7] sm:$0xff] }
 0x44f   :  { %v370_v62 = vmul.f32 %v8766_v59, %v8762_v52  ;;  %v824_v2 = vpop.permute.xlu1 %823  ;;  %v660_v59 = vld [vmem:[%s10531_s7 + $0x8] sm:$0xff] }
 0x451   :  { %8151 = vmatprep.mubr.msk.f32.mxu0 %vm349_vm5, %v370_v62 }
 0x452   :  { %8152 = vmatmul.mubr.msk.f32.vlgmr.msra.gmra.mrb[4].mxu0 %vm349_vm5, %v371_v63 }
 0x453   :  { %8326 = vmatpush3.bf16.xpose.msk.msra.mxu0 %vm9005_vm4, %v8321_v49  ;;  %8158 = vmatprep.mubr.msk.f32.mxu0 %vm265_vm3, %v461_v56  ;;  %v826_v3 = vpop.permute.xlu1 %825 }
 0x454   :  { %8333 = vmatprep.subr.msk.bf16.mxu0 %vm9005_vm4, %v8331_v0 }
 0x45a   :  { %8159 = vmatmul.mubr.msk.f32.vlgmr.msra.gmra.mrb[6].mxu0 %vm265_vm3, %v463_v1 }
 0x45b   :  { %8336 = vmatpush3.bf16.xpose.msk.msra.mxu0 %vm9005_vm4, %v8331_v0  ;;  %8182 = vmatprep.mubr.msk.f32.mxu0 %vm265_vm3, %v824_v2 }
 0x462   :  { %8183 = vmatmul.mubr.msk.f32.vlgmr.msra.gmra.mrb[8].mxu0 %vm265_vm3, %v826_v3 }
 0x525   :  { %v9059_v4 = vpop.f32.mrb[4].mxu0 }
 0x526   :  { %v9061_v5 = vpop.f32.mrb[5].mxu0 }
 0x52d   :  { %v8160_v6 = vpop.f32.mrb[6].mxu0 }
 0x52e   :  { %v548_v7 = vadd.f32 %v8160_v6, %v9018_v28  ;;  %v542_v8 = vpop.f32.mrb[7].mxu0 }
 0x52f   :  { %v543_v9 = vadd.f32 %v542_v8, %v9023_v29 }
 0x530   :  { %v554_v10 = vsel %vm349_vm5, %v548_v7, -inf }
 0x531   :  { %555 = vmax.xlane.f32.xlu0 %v554_v10  ;;  %v551_v11 = vsel %vm349_vm5, %v543_v9, -inf }
 0x532   :  { %552 = vmax.xlane.f32.xlu1 %v551_v11 }
 0x535   :  { %v8184_v12 = vpop.f32.mrb[8].mxu0 }
 0x536   :  { %v905_v13 = vpop.f32.mrb[9].mxu0  ;;  %v911_v34 = vadd.f32 %v8184_v12, %v9018_v28 }
 0x537   :  { %v906_v32 = vadd.f32 %v905_v13, %v9023_v29 }
 0x538   :  { %v917_v35 = vsel %vm349_vm5, %v911_v34, -inf }
 0x539   :  { %v914_v33 = vsel %vm349_vm5, %v906_v32, -inf }
 0x5be   :  { %v556_v14 = vpop.xlane.xlu0 %555 }
 0x5bf   :  { %v558_v17 = vsub.f32 %v548_v7, %v556_v14  ;;  %v553_v18 = vpop.xlane.xlu1 %552 }
 0x5c0   :  { %v557_v20 = vsub.f32 %v543_v9, %v553_v18 }
 0x5c1   :  { %v561_v23 = vmul.f32 1.442695, %v558_v17 }
 0x5c2   :  { %v559_v24 = vmul.f32 1.442695, %v557_v20 }
 0x5c3   :  { %8767 = vpow2.f32 %v561_v23 }
 0x5c4   :  { %8769 = vpow2.f32 %v559_v24 }
 0x5cd   :  { %v8768_v25 = vpop.eup %8767 }
 0x5ce   :  { %v8770_v27 = vpop.eup %8769  ;;  %v566_v30 = vsel %vm349_vm5, %v8768_v25, 0.0 }
 0x5cf   :  { %567 = vadd.xlane.f32.xlu0 %v566_v30  ;;  %v563_v31 = vsel %vm349_vm5, %v8770_v27, 0.0 }
 0x5d0   :  { %564 = vadd.xlane.f32.xlu1 %v563_v31 }
 0x5e1   :  { %8444 = vrot.lane.b32.xlu1 %v8999_v22, %s10550_s0 }
 0x5e5   :  { %8449 = vrot.lane.b32.xlu0 %v8999_v22, %s10551_s22  ;;  %1107 = vrot.lane.b32.xlu1 %v8993_v21, %s10548_s5 }
 0x5e9   :  { %1109 = vrot.lane.b32.xlu1 %v8991_v19, %s10548_s5 }
 0x604   :  { %915 = vmax.xlane.f32.xlu0 %v914_v33 }
 0x60d   :  { %918 = vmax.xlane.f32.xlu1 %v917_v35 }
 0x61e   :  { %8454 = vrot.lane.b32.xlu1 %v8999_v22, %s10547_s23 }
 0x622   :  { %8459 = vrot.lane.b32.xlu1 %v8999_v22, %s10546_s24 }
 0x65c   :  { %v568_v21 = vpop.xlane.xlu0 %567 }
 0x65d   :  { %8771 = vrcp.f32 %v568_v21  ;;  %v565_v19 = vpop.xlane.xlu1 %564 }
 0x65e   :  { %8773 = vrcp.f32 %v565_v19 }
 0x660   :  { %v8450_v36 = vpop.permute.xlu0 %8449 }
 0x661   :  { %v8452_v37 = vunpack.i.h.bf16 %v8450_v36  ;;  %v8451_v38 = vunpack.i.l.bf16 %v8450_v36  ;;  %v8445_v39 = vpop.permute.xlu1 %8444  ;;  %v1307_v36 = vld [vmem:[%s10531_s7 + $0x18] sm:$0xff] }
 0x662   :  { %v8447_v40 = vunpack.i.h.bf16 %v8445_v39  ;;  %v8446_v41 = vunpack.i.l.bf16 %v8445_v39 }
 0x663   :  { %v8341_v42 = vpack.c.bf16 %v8452_v37, %v8451_v38 }
 0x664   :  { %v8327_v43 = vpack.c.bf16 %v8447_v40, %v8446_v41 }
 0x665   :  { %8343 = vmatprep.subr.msk.bf16.mxu0 %vm9005_vm4, %v8341_v42  ;;  %v1108_v44 = vpop.permute.xlu1 %1107 }
 0x666   :  { %8328 = vmatprep.subr.bf16.mxu1 %v8327_v43  ;;  %8346 = vmatpush3.bf16.xpose.msk.msra.mxu0 %vm9005_vm4, %v8341_v42 }
 0x667   :  { %v8772_v22 = vpop.eup %8771  ;;  %8201 = vmatprep.mubr.msk.f32.mxu0 %vm265_vm3, %v1108_v44  ;;  %8330 = vmatpush3.bf16.msra.mxu1 %v8327_v43 }
 0x668   :  { %v8774_v45 = vpop.eup %8773  ;;  %v572_v47 = vmul.f32 %v8772_v22, %v8768_v25  ;;  %8168 = vmatprep.subr.mxu1 %v660_v59  ;;  %v6979_v22 = vld [vmem:[%s10532_s8] ss:$0 sm:$0xff] }
 0x669   :  { %v571_v46 = vmul.f32 %v8774_v45, %v8770_v27  ;;  %v1110_v48 = vpop.permute.xlu1 %1109 }
 0x66b   :  { %8165 = vmatprep.mubr.msk.f32.mxu1 %vm349_vm5, %v571_v46 }
 0x66c   :  { %8166 = vmatmul.mubr.msk.f32.vlgmr.msra.gmra.mrb[2].mxu1 %vm349_vm5, %v572_v47 }
 0x66d   :  { %8202 = vmatmul.mubr.msk.f32.vlgmr.msra.gmra.mrb[10].mxu0 %vm265_vm3, %v1110_v48  ;;  %8169 = vmatpush3.msra.mxu1 %v660_v59 }
 0x66e   :  { %8173 = vmatprep.subr.mxu1 %v459_v60 }
 0x691   :  { %v916_v49 = vpop.xlane.xlu0 %915 }
 0x692   :  { %v920_v50 = vsub.f32 %v906_v32, %v916_v49 }
 0x694   :  { %v922_v51 = vmul.f32 1.442695, %v920_v50 }
 0x696   :  { %8775 = vpow2.f32 %v922_v51 }
 0x69a   :  { %v919_v52 = vpop.xlane.xlu1 %918 }
 0x69b   :  { %v921_v53 = vsub.f32 %v911_v34, %v919_v52 }
 0x69d   :  { %v924_v54 = vmul.f32 1.442695, %v921_v53 }
 0x69e   :  { %v8455_v62 = vpop.permute.xlu1 %8454 }
 0x69f   :  { %8777 = vpow2.f32 %v924_v54  ;;  %v8457_v0 = vunpack.i.h.bf16 %v8455_v62  ;;  %v8456_v1 = vunpack.i.l.bf16 %v8455_v62  ;;  %v1456_v62 = vld [vmem:[%s10533_s11 + $0x40] sm:$0xff] }
 0x6a0   :  { %v8776_v55 = vpop.eup %8775 }
 0x6a1   :  { %v926_v56 = vsel %vm349_vm5, %v8776_v55, 0.0  ;;  %v8337_v8 = vpack.c.bf16 %v8457_v0, %v8456_v1  ;;  %v1457_v1 = vld [vmem:[%s10533_s11 + $0x48] sm:$0xff] }
 0x6a2   :  { %927 = vadd.xlane.f32.xlu0 %v926_v56  ;;  %v8460_v13 = vpop.permute.xlu1 %8459 }
 0x6a3   :  { %v8462_v20 = vunpack.i.h.bf16 %v8460_v13  ;;  %v8461_v23 = vunpack.i.l.bf16 %v8460_v13 }
 0x6a9   :  { %v8778_v57 = vpop.eup %8777 }
 0x6aa   :  { %v929_v58 = vsel %vm349_vm5, %v8778_v57, 0.0 }
 0x6ab   :  { %930 = vadd.xlane.f32.xlu0 %v929_v58 }
 0x72f   :  { %v928_v61 = vpop.xlane.xlu0 %927 }
 0x730   :  { %8779 = vrcp.f32 %v928_v61  ;;  %v1448_v61 = vld [vmem:[%s10533_s11] sm:$0xff] }
 0x731   :  { %v6983_v0 = vcombine.high %v1448_v61, %v1456_v62 }
 0x733   :  { %1727 = vmatprep.subr.bf16.mxu0 %v6983_v0 }
 0x738   :  { %v931_v63 = vpop.xlane.xlu0 %930 }
 0x739   :  { %8781 = vrcp.f32 %v931_v63  ;;  %v1449_v63 = vld [vmem:[%s10533_s11 + $0x8] sm:$0xff] }
 0x73a   :  { %v8780_v12 = vpop.eup %8779 }
 0x73b   :  { %v934_v18 = vmul.f32 %v8780_v12, %v8776_v55 }
 0x73f   :  { %v8167_v2 = vpop.f32.mrb[2].mxu1 }
 0x740   :  { %v651_v3 = vpop.f32.mrb[3].mxu1  ;;  %v8203_v6 = vpop.f32.mrb[10].mxu0 }
 0x741   :  { %8170 = vmatprep.mubr.msk.f32.mxu1 %vm265_vm3, %v651_v3  ;;  %v1189_v7 = vpop.f32.mrb[11].mxu0  ;;  %v1195_v10 = vadd.f32 %v8203_v6, %v9018_v28  ;;  %v6984_v3 = vcombine.low %v1449_v63, %v1457_v1  ;;  %v6985_v6 = vcombine.high %v1449_v63, %v1457_v1  ;;  %v1463_v63 = vld [vmem:[%s10533_s11 + $0x78] sm:$0xff] }
 0x742   :  { %v1190_v9 = vadd.f32 %v1189_v7, %v9023_v29  ;;  %8171 = vmatmul.mubr.msk.f32.vlgmr.msra.gmra.mrb[4].mxu1 %vm265_vm3, %v8167_v2  ;;  %v1023_v29 = vld [vmem:[%s10531_s7 + $0x10] sm:$0xff]  ;;  %v6982_v2 = vcombine.low %v1448_v61, %v1456_v62  ;;  %v1464_v7 = vld [vmem:[%s10533_s11 + $0x80] sm:$0xff]  ;;  %v1455_v62 = vld [vmem:[%s10533_s11 + $0x38] sm:$0xff] }
 0x743   :  { %8174 = vmatpush3.msra.mxu1 %v459_v60  ;;  %8175 = vmatprep.mubr.msk.f32.mxu1 %vm265_vm3, %v9061_v5  ;;  %v1201_v14 = vsel %vm349_vm5, %v1195_v10, -inf  ;;  %v8782_v17 = vpop.eup %8781  ;;  %v8347_v5 = vpack.c.bf16 %v8462_v20, %v8461_v23  ;;  %v8852_v20 = vmov 0   ;;  %v1462_v61 = vld [vmem:[%s10533_s11 + $0x70] sm:$0xff] }
 0x744   :  { %8338 = vmatprep.subr.bf16.mxu1 %v8337_v8  ;;  %v1198_v11 = vsel %vm349_vm5, %v1190_v9, -inf  ;;  %v935_v28 = vmul.f32 %v8782_v17, %v8778_v57  ;;  %1728 = vmatpush1.bf16.msra.mxu0 %v6982_v2  ;;  %v1450_v17 = vld [vmem:[%s10533_s11 + $0x10] sm:$0xff] }
 0x745   :  { %1199 = vmax.xlane.f32.xlu0 %v1198_v11  ;;  %v1473_v11 = vld [vmem:[%s10533_s11 + $0xc8] sm:$0xff]  ;;  %1759 = vmatprep.mubr.bf16.mxu0 %v8852_v20 }
 0x749   :  { %1202 = vmax.xlane.f32.xlu0 %v1201_v14 }
 0x74a   :  { %8176 = vmatmul.mubr.msk.f32.vlgmr.msra.gmra.mrb[4].mxu1 %vm265_vm3, %v9059_v4 }
 0x74b   :  { %8340 = vmatpush3.bf16.msra.mxu1 %v8337_v8  ;;  %8189 = vmatprep.mubr.msk.f32.mxu1 %vm349_vm5, %v934_v18  ;;  %v1472_v8 = vld [vmem:[%s10533_s11 + $0xc0] sm:$0xff]  ;;  %v1458_v18 = vld [vmem:[%s10533_s11 + $0x50] sm:$0xff] }
 0x74c   :  { %8192 = vmatprep.subr.mxu1 %v1023_v29  ;;  %v6998_v12 = vcombine.low %v1464_v7, %v1472_v8  ;;  %v6987_v23 = vcombine.high %v1450_v17, %v1458_v18 }
 0x74e   :  { %8190 = vmatmul.mubr.msk.f32.vlgmr.msra.gmra.mrb[6].mxu1 %vm349_vm5, %v935_v28  ;;  %v1459_v28 = vld [vmem:[%s10533_s11 + $0x58] sm:$0xff] }
 0x74f   :  { %8193 = vmatpush3.msra.mxu1 %v1023_v29  ;;  %v1451_v29 = vld [vmem:[%s10533_s11 + $0x18] sm:$0xff] }
 0x750   :  { %8348 = vmatprep.subr.bf16.mxu1 %v8347_v5 }
 0x7d2   :  { %v1200_v24 = vpop.xlane.xlu0 %1199 }
 0x7d3   :  { %v1204_v25 = vsub.f32 %v1190_v9, %v1200_v24  ;;  %v1465_v9 = vld [vmem:[%s10533_s11 + $0x88] sm:$0xff]  ;;  %v6988_v24 = vcombine.low %v1451_v29, %v1459_v28 }
 0x7d4   :  { %v7000_v13 = vcombine.low %v1465_v9, %v1473_v11  ;;  %v7001_v14 = vcombine.high %v1465_v9, %v1473_v11  ;;  %v1479_v9 = vld [vmem:[%s10533_s11 + $0xf8] sm:$0xff]  ;;  %v6997_v11 = vcombine.high %v1455_v62, %v1463_v63 }
 0x7d5   :  { %v1206_v27 = vmul.f32 1.442695, %v1204_v25  ;;  %v6989_v25 = vcombine.high %v1451_v29, %v1459_v28  ;;  %v8504_v29 = vld [vmem:[%s10534_s13 + $0xc0] sm:$0xff]  }
 0x7d6   :  { %v1203_v30 = vpop.xlane.xlu0 %1202 }
 0x7d7   :  { %8783 = vpow2.f32 %v1206_v27  ;;  %v1205_v31 = vsub.f32 %v1195_v10, %v1203_v30  ;;  %v6999_v10 = vcombine.high %v1464_v7, %v1472_v8  ;;  %v1478_v7 = vld [vmem:[%s10533_s11 + $0xf0] sm:$0xff]  ;;  %v1471_v8 = vld [vmem:[%s10533_s11 + $0xb8] sm:$0xff] }
 0x7d8   :  { %v7012_v28 = vcombine.low %v1471_v8, %v1479_v9 }
 0x7d9   :  { %v1208_v32 = vmul.f32 1.442695, %v1205_v31  ;;  %1729 = vmatprep.subr.bf16.mxu0 %v6999_v10 }
 0x7da   :  { %1730 = vmatpush1.bf16.msra.mxu0 %v6998_v12 }
 0x7db   :  { %8785 = vpow2.f32 %v1208_v32  ;;  %1813 = vmatprep.subr.bf16.mxu0 %v6987_v23 }
 0x7e1   :  { %v8784_v33 = vpop.eup %8783 }
 0x7e2   :  { %v1210_v4 = vsel %vm349_vm5, %v8784_v33, 0.0 }
 0x7e3   :  { %1211 = vadd.xlane.f32.xlu0 %v1210_v4 }
 0x7e5   :  { %v8786_v34 = vpop.eup %8785 }
 0x7e6   :  { %v1213_v35 = vsel %vm349_vm5, %v8786_v34, 0.0 }
 0x7e7   :  { %1214 = vadd.xlane.f32.xlu0 %v1213_v35  ;;  %v6980_v35 = vld [vmem:[%s10535_s9] ss:$0 sm:$0xff] }
 0x821   :  { %v8191_v21 = vpop.f32.mrb[6].mxu1 }
 0x822   :  { %v1014_v19 = vpop.f32.mrb[7].mxu1 }
 0x823   :  { %8194 = vmatprep.mubr.msk.f32.mxu1 %vm265_vm3, %v1014_v19 }
 0x824   :  { %8195 = vmatmul.mubr.msk.f32.vlgmr.msra.gmra.mrb[4].mxu1 %vm265_vm3, %v8191_v21 }
 0x825   :  { %8350 = vmatpush3.bf16.msra.mxu1 %v8347_v5  ;;  %v6986_v5 = vcombine.low %v1450_v17, %v1458_v18  ;;  %v7013_v17 = vcombine.high %v1471_v8, %v1479_v9  ;;  %v8503_v18 = vld [vmem:[%s10534_s13 + $0x40] sm:$0xff]  }
 0x826   :  { %8211 = vmatprep.subr.mxu1 %v1307_v36 }
 0x870   :  { %v1212_v37 = vpop.xlane.xlu0 %1211 }
 0x871   :  { %8787 = vrcp.f32 %v1212_v37 }
 0x874   :  { %v1215_v38 = vpop.xlane.xlu0 %1214 }
 0x875   :  { %8789 = vrcp.f32 %v1215_v38 }
 0x87b   :  { %v8788_v39 = vpop.eup %8787 }
 0x87c   :  { %v1218_v40 = vmul.f32 %v8788_v39, %v8784_v33  ;;  %v1466_v39 = vld [vmem:[%s10533_s11 + $0x90] sm:$0xff] }
 0x87e   :  { %8208 = vmatprep.mubr.msk.f32.mxu1 %vm349_vm5, %v1218_v40  ;;  %v1474_v40 = vld [vmem:[%s10533_s11 + $0xd0] sm:$0xff] }
 0x87f   :  { %v8790_v41 = vpop.eup %8789 }
 0x880   :  { %v1219_v42 = vmul.f32 %v8790_v41, %v8786_v34  ;;  %v1467_v41 = vld [vmem:[%s10533_s11 + $0x98] sm:$0xff] }
 0x882   :  { %8209 = vmatmul.mubr.msk.f32.vlgmr.msra.gmra.mrb[8].mxu1 %vm349_vm5, %v1219_v42  ;;  %v1475_v42 = vld [vmem:[%s10533_s11 + $0xd8] sm:$0xff] }
 0x883   :  { %8212 = vmatpush3.msra.mxu1 %v1307_v36  ;;  %v6981_v36 = vld [vmem:[%s10536_s10] ss:$0 sm:$0xff] }
 0x884   :  { %1770 = vmatprep.subr.bf16.mxu1 %v6985_v6  ;;  %v1470_v6 = vld [vmem:[%s10533_s11 + $0xb0] sm:$0xff] }
 0x885   :  { %v7010_v23 = vcombine.low %v1470_v6, %v1478_v7 }
 0x955   :  { %v8210_v43 = vpop.f32.mrb[8].mxu1 }
 0x956   :  { %v1298_v44 = vpop.f32.mrb[9].mxu1 }
 0x957   :  { %8213 = vmatprep.mubr.msk.f32.mxu1 %vm265_vm3, %v1298_v44 }
 0x958   :  { %8214 = vmatmul.mubr.msk.f32.vlgmr.msra.gmra.mrb[4].mxu1 %vm265_vm3, %v8210_v43 }
 0x959   :  { %1771 = vmatpush1.bf16.msra.mxu1 %v6984_v3  ;;  %1802 = vmatprep.mubr.bf16.mxu1 %v8852_v20 }
 0x95a   :  { %1772 = vmatprep.subr.bf16.mxu1 %v7001_v14  ;;  %v7011_v14 = vcombine.high %v1470_v6, %v1478_v7 }
 0x95d   :  { %1773 = vmatpush1.bf16.msra.mxu1 %v7000_v13  ;;  %v6996_v13 = vcombine.low %v1455_v62, %v1463_v63 }
 0x95e   :  { %1856 = vmatprep.subr.bf16.mxu1 %v6989_v25  ;;  %v8507_v25 = vld [vmem:[%s10534_s13 + $0x48] sm:$0xff]  }
 0xa2b   :  { %v8215_v45 = vpop.f32.mrb[4].mxu1 }
 0xa2c   :  { %v1399_v46 = vadd.f32 %v8215_v45, %v6979_v22  ;;  %v1380_v47 = vpop.f32.mrb[5].mxu1  ;;  %v1452_v45 = vld [vmem:[%s10533_s11 + $0x20] sm:$0xff] }
 0xa2d   :  { %v1398_v48 = vadd.f32 %v6979_v22, %v1380_v47  ;;  %v1453_v47 = vld [vmem:[%s10533_s11 + $0x28] sm:$0xff] }
 0xa2e   :  { %v1401_v49 = vadd.f32 %v1399_v46, %v8982_v16  ;;  %v1460_v46 = vld [vmem:[%s10533_s11 + $0x60] sm:$0xff] }
 0xa2f   :  { %v1400_v50 = vadd.f32 %v1398_v48, %v8980_v15  ;;  %v1461_v48 = vld [vmem:[%s10533_s11 + $0x68] sm:$0xff] }
 0xa30   :  { %v1407_v51 = vsel %vm177_vm2, %v1401_v49, 0.0 }
 0xa31   :  { %1408 = vadd.xlane.f32.xlu1 %v1407_v51  ;;  %v1404_v52 = vsel %vm177_vm2, %v1400_v50, 0.0  ;;  %v7005_v51 = vcombine.high %v1467_v41, %v1475_v42 }
 0xa32   :  { %1405 = vadd.xlane.f32.xlu0 %v1404_v52  ;;  %v7002_v52 = vcombine.low %v1466_v39, %v1474_v40 }
 0xabe   :  { %v1409_v53 = vpop.xlane.xlu1 %1408 }
 0xabf   :  { %v1412_v54 = vmul.f32 0.03125, %v1409_v53  ;;  %v1406_v55 = vpop.xlane.xlu0 %1405  ;;  %v7004_v53 = vcombine.low %v1467_v41, %v1475_v42  ;;  %v8523_v41 = vld [vmem:[%s10534_s13 + $0x68] sm:$0xff]  }
 0xac0   :  { %v1411_v56 = vmul.f32 0.03125, %v1406_v55  ;;  %v1476_v55 = vld [vmem:[%s10533_s11 + $0xe0] sm:$0xff]  ;;  %v8524_v42 = vld [vmem:[%s10534_s13 + $0xe8] sm:$0xff]  }
 0xac1   :  { %v9134_v57 = vsub.f32 %v1401_v49, %v1412_v54  ;;  %v1468_v54 = vld [vmem:[%s10533_s11 + $0xa0] sm:$0xff] }
 0xac2   :  { %v1413_v58 = vsub.f32 %v1400_v50, %v1411_v56  ;;  %v7003_v50 = vcombine.high %v1466_v39, %v1474_v40  ;;  %v1469_v56 = vld [vmem:[%s10533_s11 + $0xa8] sm:$0xff]  ;;  %v7007_v0 = vcombine.high %v1468_v54, %v1476_v55  ;;  %v7006_v2 = vcombine.low %v1468_v54, %v1476_v55  ;;  %v8521_v39 = vld [vmem:[%s10534_s13 + $0x20] sm:$0xff]  }
 0xac3   :  { %v1416_v16 = vmul.f32 %v9134_v57, %v9134_v57  ;;  %v8522_v40 = vld [vmem:[%s10534_s13 + $0xa0] sm:$0xff]  }
 0xac4   :  { %v1415_v59 = vmul.f32 %v1413_v58, %v1413_v58  ;;  %v8535_v54 = vld [vmem:[%s10534_s13 + $0x140] sm:$0xff]  }
 0xac5   :  { %v1420_v15 = vsel %vm177_vm2, %v1416_v16, 0.0  ;;  %v6992_v16 = vcombine.low %v1453_v47, %v1461_v48  ;;  %v8536_v55 = vld [vmem:[%s10534_s13 + $0x1c0] sm:$0xff]  }
 0xac6   :  { %v1417_v60 = vsel %vm177_vm2, %v1415_v59, 0.0  ;;  %v6993_v59 = vcombine.high %v1453_v47, %v1461_v48  ;;  %v8528_v47 = vld [vmem:[%s10534_s13 + $0xf0] sm:$0xff]  }
 0xac7   :  { %1418 = vadd.xlane.f32.xlu0 %v1417_v60  ;;  %v6990_v60 = vcombine.low %v1452_v45, %v1460_v46  ;;  %v8529_v48 = vld [vmem:[%s10534_s13 + $0x30] sm:$0xff]  }
 0xacb   :  { %1421 = vadd.xlane.f32.xlu0 %v1420_v15  ;;  %v1454_v15 = vld [vmem:[%s10533_s11 + $0x30] sm:$0xff] }
 0xacc   :  { %v6995_v10 = vcombine.high %v1454_v15, %v1462_v61  ;;  %v6994_v12 = vcombine.low %v1454_v15, %v1462_v61 }
 0xb54   :  { %v1419_v27 = vpop.xlane.xlu0 %1418 }
 0xb55   :  { %v1423_v30 = vmul.f32 0.03125, %v1419_v27  ;;  %v8508_v27 = vld [vmem:[%s10534_s13 + $0xc8] sm:$0xff]  }
 0xb57   :  { %v1425_v31 = vadd.f32 1e-05, %v1423_v30  ;;  %v8509_v30 = vld [vmem:[%s10534_s13 + $0x8] sm:$0xff]  }
 0xb58   :  { %v1422_v32 = vpop.xlane.xlu0 %1421 }
 0xb59   :  { %8791 = vrsqrt.f32 %v1425_v31  ;;  %v1424_v33 = vmul.f32 0.03125, %v1422_v32  ;;  %v8510_v31 = vld [vmem:[%s10534_s13 + $0x88] sm:$0xff]   ;;  %v8511_v32 = vld [vmem:[%s10534_s13 + $0x50] sm:$0xff]  }
 0xb5b   :  { %v1426_v4 = vadd.f32 1e-05, %v1424_v33  ;;  %v8512_v33 = vld [vmem:[%s10534_s13 + $0xd0] sm:$0xff]  }
 0xb5d   :  { %8793 = vrsqrt.f32 %v1426_v4  ;;  %v8513_v4 = vld [vmem:[%s10534_s13 + $0x10] sm:$0xff]  }
 0xb63   :  { %v8792_v34 = vpop.eup %8791 }
 0xb64   :  { %v1429_v21 = vmul.f32 %v8792_v34, %v1413_v58  ;;  %v6991_v58 = vcombine.high %v1452_v45, %v1460_v46  ;;  %v8514_v34 = vld [vmem:[%s10534_s13 + $0x90] sm:$0xff]   ;;  %v8526_v45 = vld [vmem:[%s10534_s13 + $0xa8] sm:$0xff]  }
 0xb65   :  { %v8527_v46 = vld [vmem:[%s10534_s13 + $0x70] sm:$0xff]  }
 0xb66   :  { %v1437_v37 = vmul.f32 %v6980_v35, %v1429_v21  ;;  %v8516_v21 = vld [vmem:[%s10534_s13 + $0xd8] sm:$0xff]  }
 0xb67   :  { %v8794_v19 = vpop.eup %8793 }
 0xb68   :  { %v1430_v38 = vmul.f32 %v8794_v19, %v9134_v57  ;;  %v9197_v44 = vadd.f32 %v6981_v36, %v1437_v37  ;;  %v1477_v57 = vld [vmem:[%s10533_s11 + $0xe8] sm:$0xff]  ;;  %v8517_v19 = vld [vmem:[%s10534_s13 + $0x18] sm:$0xff]   ;;  %v8519_v37 = vld [vmem:[%s10534_s13 + $0x60] sm:$0xff]  }
 0xb69   :  { %v7009_v1 = vcombine.high %v1469_v56, %v1477_v57  ;;  %v7008_v3 = vcombine.low %v1469_v56, %v1477_v57  ;;  %v1484_v56 = vlaneseq }
 0xb6a   :  { %v1438_v43 = vmul.f32 %v6980_v35, %v1430_v38  ;;  %v8515_v35 = vld [vmem:[%s10534_s13 + $0x58] sm:$0xff]   ;;  %v8520_v38 = vld [vmem:[%s10534_s13 + $0xe0] sm:$0xff]  }
 0xb6b   :  { %v1485_v57 = vshrl.u32 %v1484_v56, 7 }
 0xb6c   :  { %v9199_v22 = vadd.f32 %v6981_v36, %v1438_v43  ;;  %v8518_v36 = vld [vmem:[%s10534_s13 + $0x98] sm:$0xff]   ;;  %v8525_v43 = vld [vmem:[%s10534_s13 + $0x28] sm:$0xff]  }
 0xb6d   :  { %v9386_v15 = vsub.s32 3, %v1485_v57  ;;  %v9396_v7 = vsub.s32 5, %v1485_v57  ;;  %v9398_v8 = vsub.s32 7, %v1485_v57 }
 0xb6e   :  { %v9215_v49 = vpack.c.bf16 %v9199_v22, %v9197_v44 }
 0xb70   :  { %7014 = vmatmul.mubr.msk.bf16.vlgmr.msra.gmra.mrb[12].mxu0 %vm177_vm2, %v9215_v49  ;;  %7015 = vmatmul.mubr.msk.bf16.vlgmr.msra.gmra.mrb[12].mxu1 %vm177_vm2, %v9215_v49 }
 0xb71   :  { %1814 = vmatpush1.bf16.msra.mxu0 %v6986_v5  ;;  %1857 = vmatpush1.bf16.msra.mxu1 %v6988_v24  ;;  %v8505_v5 = vld [vmem:[%s10534_s13] sm:$0xff]  }
 0xb72   :  { %1815 = vmatprep.subr.bf16.mxu0 %v7003_v50  ;;  %1858 = vmatprep.subr.bf16.mxu1 %v7005_v51  ;;  %v8506_v24 = vld [vmem:[%s10534_s13 + $0x80] sm:$0xff]   ;;  %v8531_v50 = vld [vmem:[%s10534_s13 + $0x78] sm:$0xff]  }
 0xb73   :  { %1845 = vmatprep.mubr.bf16.mxu0 %v8852_v20  ;;  %1888 = vmatprep.mubr.bf16.mxu1 %v8852_v20  ;;  %v8532_v51 = vld [vmem:[%s10534_s13 + $0xf8] sm:$0xff]  }
 0xb75   :  { %1816 = vmatpush1.bf16.msra.mxu0 %v7002_v52  ;;  %1859 = vmatpush1.bf16.msra.mxu1 %v7004_v53  ;;  %v8533_v52 = vld [vmem:[%s10534_s13 + $0x38] sm:$0xff]  }
 0xb76   :  { %1899 = vmatprep.subr.bf16.mxu0 %v6991_v58  ;;  %1942 = vmatprep.subr.bf16.mxu1 %v6993_v59  ;;  %v8534_v53 = vld [vmem:[%s10534_s13 + $0xb8] sm:$0xff]   ;;  %v9377_v58 = vsub.s32 0, %v1485_v57  ;;  %v9379_v59 = vsub.s32 2, %v1485_v57 }
 0xb78   :  { %7016 = vmatmul.mubr.msk.bf16.vlgmr.msra.gmra.mrb[16].mxu0 %vm177_vm2, %v9215_v49  ;;  %7017 = vmatmul.mubr.msk.bf16.vlgmr.msra.gmra.mrb[16].mxu1 %vm177_vm2, %v9215_v49 }
 0xb79   :  { %1900 = vmatpush1.bf16.msra.mxu0 %v6990_v60  ;;  %1943 = vmatpush1.bf16.msra.mxu1 %v6992_v16  ;;  %v1480_v60 = vld [vmem:[%s10537_s12] sm:$0xff]  ;;  %v9384_v16 = vsub.s32 1, %v1485_v57 }
 0xb7a   :  { %1901 = vmatprep.subr.bf16.mxu0 %v7007_v0  ;;  %1944 = vmatprep.subr.bf16.mxu1 %v7009_v1  ;;  %v1487_v61 = vrot.slane %v1480_v60, %v9377_v58  ;;  %v1495_v62 = vrot.slane %v1480_v60, %v9379_v59  ;;  %v1499_v0 = vrot.slane %v1480_v60, %v9386_v15  ;;  %v9392_v1 = vsub.s32 4, %v1485_v57 }
 0xb7b   :  { %1931 = vmatprep.mubr.bf16.mxu0 %v8852_v20  ;;  %1974 = vmatprep.mubr.bf16.mxu1 %v8852_v20  ;;  %v1491_v63 = vrot.slane %v1480_v60, %v9384_v16 }
 0xb7d   :  { %1902 = vmatpush1.bf16.msra.mxu0 %v7006_v2  ;;  %1945 = vmatpush1.bf16.msra.mxu1 %v7008_v3  ;;  %v9394_v2 = vsub.s32 6, %v1485_v57 }
 0xb7e   :  { %1985 = vmatprep.subr.bf16.mxu0 %v6995_v10  ;;  %2028 = vmatprep.subr.bf16.mxu1 %v6997_v11 }
 0xb80   :  { %7018 = vmatmul.mubr.msk.bf16.vlgmr.msra.gmra.mrb[20].mxu0 %vm177_vm2, %v9215_v49  ;;  %7019 = vmatmul.mubr.msk.bf16.vlgmr.msra.gmra.mrb[20].mxu1 %vm177_vm2, %v9215_v49 }
 0xb81   :  { %1986 = vmatpush1.bf16.msra.mxu0 %v6994_v12  ;;  %2029 = vmatpush1.bf16.msra.mxu1 %v6996_v13 }
 0xb82   :  { %1987 = vmatprep.subr.bf16.mxu0 %v7011_v14  ;;  %2030 = vmatprep.subr.bf16.mxu1 %v7013_v17 }
 0xb83   :  { %2017 = vmatprep.mubr.bf16.mxu0 %v8852_v20  ;;  %2060 = vmatprep.mubr.bf16.mxu1 %v8852_v20 }
 0xb85   :  { %1988 = vmatpush1.bf16.msra.mxu0 %v7010_v23  ;;  %2031 = vmatpush1.bf16.msra.mxu1 %v7012_v28 }
 0xb86   :  { %7722 = vmatprep.subr.bf16.mxu0 %v8503_v18  ;;  %7744 = vmatprep.subr.bf16.mxu1 %v8504_v29 }
 0xb88   :  { %7020 = vmatmul.mubr.msk.bf16.vlgmr.msra.gmra.mrb[24].mxu0 %vm177_vm2, %v9215_v49  ;;  %7021 = vmatmul.mubr.msk.bf16.vlgmr.msra.gmra.mrb[24].mxu1 %vm177_vm2, %v9215_v49  ;;  %v8530_v49 = vld [vmem:[%s10534_s13 + $0xb0] sm:$0xff]  }
 0xb89   :  { %7723 = vmatpush3.bf16.msra.mxu0 %v8505_v5  ;;  %7745 = vmatpush3.bf16.msra.mxu1 %v8506_v24  ;;  %v1503_v24 = vrot.slane %v1480_v60, %v9392_v1 }
 0xb8a   :  { %7724 = vmatprep.subr.bf16.mxu0 %v8507_v25  ;;  %7746 = vmatprep.subr.bf16.mxu1 %v8508_v27  ;;  %v1511_v25 = vrot.slane %v1480_v60, %v9394_v2 }
 0xb8d   :  { %7725 = vmatpush3.bf16.msra.mxu0 %v8509_v30  ;;  %7747 = vmatpush3.bf16.msra.mxu1 %v8510_v31  ;;  %v1507_v31 = vrot.slane %v1480_v60, %v9396_v7 }
 0xb8e   :  { %7726 = vmatprep.subr.bf16.mxu0 %v8511_v32  ;;  %7748 = vmatprep.subr.bf16.mxu1 %v8512_v33  ;;  %v1515_v32 = vrot.slane %v1480_v60, %v9398_v8 }
 0xb91   :  { %7727 = vmatpush3.bf16.msra.mxu0 %v8513_v4  ;;  %7749 = vmatpush3.bf16.msra.mxu1 %v8514_v34 }
 0xb92   :  { %7728 = vmatprep.subr.bf16.mxu0 %v8515_v35  ;;  %7750 = vmatprep.subr.bf16.mxu1 %v8516_v21 }
 0xb95   :  { %7729 = vmatpush3.bf16.msra.mxu0 %v8517_v19  ;;  %7751 = vmatpush3.bf16.msra.mxu1 %v8518_v36 }
 0xb96   :  { %7730 = vmatprep.subr.bf16.mxu0 %v8519_v37  ;;  %7752 = vmatprep.subr.bf16.mxu1 %v8520_v38  ;;  %v9407_v38 = vld [vmem:[%s10537_s12 + $0x8] sm:$0xff] }
 0xb99   :  { %7731 = vmatpush3.bf16.msra.mxu0 %v8521_v39  ;;  %7753 = vmatpush3.bf16.msra.mxu1 %v8522_v40 }
 0xb9a   :  { %7732 = vmatprep.subr.bf16.mxu0 %v8523_v41  ;;  %7754 = vmatprep.subr.bf16.mxu1 %v8524_v42 }
 0xb9d   :  { %7733 = vmatpush3.bf16.msra.mxu0 %v8525_v43  ;;  %7755 = vmatpush3.bf16.msra.mxu1 %v8526_v45 }
 0xb9e   :  { %7734 = vmatprep.subr.bf16.mxu0 %v8527_v46  ;;  %7756 = vmatprep.subr.bf16.mxu1 %v8528_v47  ;;  %v8537_v46 = vld [vmem:[%s10534_s13 + $0x100] sm:$0xff]  }
 0xb9f   :  { %v8538_v47 = vld [vmem:[%s10534_s13 + $0x180] sm:$0xff]  }
 0xba1   :  { %7735 = vmatpush3.bf16.msra.mxu0 %v8529_v48  ;;  %7757 = vmatpush3.bf16.msra.mxu1 %v8530_v49 }
 0xba2   :  { %7736 = vmatprep.subr.bf16.mxu0 %v8531_v50  ;;  %7758 = vmatprep.subr.bf16.mxu1 %v8532_v51 }
 0xba5   :  { %7737 = vmatpush3.bf16.msra.mxu0 %v8533_v52  ;;  %7759 = vmatpush3.bf16.msra.mxu1 %v8534_v53  ;;  %v8539_v52 = vld [vmem:[%s10534_s13 + $0x148] sm:$0xff]  }
 0xba6   :  { %7766 = vmatprep.subr.bf16.mxu0 %v8535_v54  ;;  %7788 = vmatprep.subr.bf16.mxu1 %v8536_v55  ;;  %v8540_v53 = vld [vmem:[%s10534_s13 + $0x1c8] sm:$0xff]   ;;  %v1519_v54 = vrot.slane %v9407_v38, %v9377_v58 }
 0xc43   :  { %v1761_v3 = vpop.f32.mrb[12].mxu0  ;;  %v1804_v6 = vpop.f32.mrb[12].mxu1 }
 0xc44   :  { %v1762_v9 = vadd.f32 %v1761_v3, %v1487_v61  ;;  %v1805_v10 = vadd.f32 %v1804_v6, %v1495_v62  ;;  %v1763_v11 = vpop.f32.mrb[13].mxu0  ;;  %v1806_v12 = vpop.f32.mrb[13].mxu1  ;;  %v1523_v6 = vrot.slane %v9407_v38, %v9384_v16 }
 0xc45   :  { %v1764_v13 = vadd.f32 %v1763_v11, %v1491_v63  ;;  %v1807_v14 = vadd.f32 %v1806_v12, %v1499_v0  ;;  %v1765_v17 = vpop.f32.mrb[14].mxu0  ;;  %v1808_v18 = vpop.f32.mrb[14].mxu1  ;;  %v8541_v11 = vld [vmem:[%s10534_s13 + $0x108] sm:$0xff]  }
 0xc46   :  { %v1766_v29 = vadd.f32 %v1765_v17, %v1487_v61  ;;  %v1809_v23 = vadd.f32 %v1808_v18, %v1495_v62  ;;  %v1767_v28 = vpop.f32.mrb[15].mxu0  ;;  %v1810_v5 = vpop.f32.mrb[15].mxu1  ;;  %v2071_v33 = vmax.f32 %v1762_v9, 0.0  ;;  %v2073_v4 = vmax.f32 %v1805_v10, 0.0  ;;  %v8542_v12 = vld [vmem:[%s10534_s13 + $0x188] sm:$0xff]  }
 0xc47   :  { %v1768_v27 = vadd.f32 %v1767_v28, %v1491_v63  ;;  %v1811_v30 = vadd.f32 %v1810_v5, %v1499_v0  ;;  %v2072_v21 = vmax.f32 %v1764_v13, 0.0  ;;  %v2074_v19 = vmax.f32 %v1807_v14, 0.0  ;;  %v8544_v28 = vld [vmem:[%s10534_s13 + $0x1d0] sm:$0xff]  }
 0xc48   :  { %v2087_v34 = vmax.f32 %v1766_v29, 0.0  ;;  %v2089_v35 = vmax.f32 %v1809_v23, 0.0  ;;  %v1527_v61 = vrot.slane %v9407_v38, %v9379_v59  ;;  %v1531_v13 = vrot.slane %v9407_v38, %v9386_v15  ;;  %v8543_v23 = vld [vmem:[%s10534_s13 + $0x150] sm:$0xff]  }
 0xc49   :  { %v2088_v36 = vmax.f32 %v1768_v27, 0.0  ;;  %v2090_v37 = vmax.f32 %v1811_v30, 0.0 }
 0xc4a   :  { %v2103_v39 = vpack.c.bf16 %v2087_v34, %v2071_v33  ;;  %v2105_v40 = vpack.c.bf16 %v2089_v35, %v2073_v4  ;;  %v8545_v35 = vld [vmem:[%s10534_s13 + $0x110] sm:$0xff]  }
 0xc4b   :  { %v2104_v41 = vpack.c.bf16 %v2088_v36, %v2072_v21  ;;  %v2106_v42 = vpack.c.bf16 %v2090_v37, %v2074_v19  ;;  %v1847_v43 = vpop.f32.mrb[16].mxu0  ;;  %v1890_v45 = vpop.f32.mrb[16].mxu1  ;;  %v8546_v21 = vld [vmem:[%s10534_s13 + $0x190] sm:$0xff]  }
 0xc4c   :  { %v1848_v48 = vadd.f32 %v1847_v43, %v1503_v24  ;;  %v1891_v49 = vadd.f32 %v1890_v45, %v1511_v25  ;;  %v1849_v50 = vpop.f32.mrb[17].mxu0  ;;  %v1892_v51 = vpop.f32.mrb[17].mxu1 }
 0xc4d   :  { %v1850_v55 = vadd.f32 %v1849_v50, %v1507_v31  ;;  %v1893_v56 = vadd.f32 %v1892_v51, %v1515_v32  ;;  %v1851_v57 = vpop.f32.mrb[18].mxu0  ;;  %v1894_v60 = vpop.f32.mrb[18].mxu1  ;;  %3182 = vmatprep.mubr.bf16.mxu0 %v2104_v41  ;;  %3223 = vmatprep.mubr.bf16.mxu1 %v2106_v42  ;;  %v8548_v41 = vld [vmem:[%s10534_s13 + $0x1d8] sm:$0xff]  }
 0xc4e   :  { %v1852_v62 = vadd.f32 %v1851_v57, %v1503_v24  ;;  %v1895_v63 = vadd.f32 %v1894_v60, %v1511_v25  ;;  %v1853_v0 = vpop.f32.mrb[19].mxu0  ;;  %v1896_v3 = vpop.f32.mrb[19].mxu1  ;;  %3183 = vmatmul.mubr.bf16.vlgmr.msra.gmra.mrb[28].mxu0 %v2103_v39  ;;  %3224 = vmatmul.mubr.bf16.vlgmr.msra.gmra.mrb[28].mxu1 %v2105_v40  ;;  %v2075_v14 = vmax.f32 %v1848_v48, 0.0  ;;  %v2077_v17 = vmax.f32 %v1891_v49, 0.0  ;;  %v8547_v40 = vld [vmem:[%s10534_s13 + $0x158] sm:$0xff]  }
 0xc4f   :  { %v1854_v9 = vadd.f32 %v1853_v0, %v1507_v31  ;;  %v1897_v10 = vadd.f32 %v1896_v3, %v1515_v32  ;;  %7767 = vmatpush3.bf16.msra.mxu0 %v8537_v46  ;;  %7789 = vmatpush3.bf16.msra.mxu1 %v8538_v47  ;;  %v2076_v5 = vmax.f32 %v1850_v55, 0.0  ;;  %v2078_v24 = vmax.f32 %v1893_v56, 0.0  ;;  %v8549_v57 = vld [vmem:[%s10534_s13 + $0x118] sm:$0xff]   ;;  %v8551_v3 = vld [vmem:[%s10534_s13 + $0x160] sm:$0xff]  }
 0xc50   :  { %v2091_v18 = vmax.f32 %v1852_v62, 0.0  ;;  %v2093_v29 = vmax.f32 %v1895_v63, 0.0  ;;  %7768 = vmatprep.subr.bf16.mxu0 %v8539_v52  ;;  %7790 = vmatprep.subr.bf16.mxu1 %v8540_v53  ;;  %v1535_v47 = vrot.slane %v9407_v38, %v9392_v1  ;;  %v1543_v52 = vrot.slane %v9407_v38, %v9394_v2 }
 0xc51   :  { %v2092_v25 = vmax.f32 %v1854_v9, 0.0  ;;  %v2094_v27 = vmax.f32 %v1897_v10, 0.0  ;;  %v1539_v53 = vrot.slane %v9407_v38, %v9396_v7  ;;  %v1547_v60 = vrot.slane %v9407_v38, %v9398_v8 }
 0xc52   :  { %v9441_v30 = vpack.c.bf16 %v2091_v18, %v2075_v14  ;;  %v9443_v31 = vpack.c.bf16 %v2093_v29, %v2077_v17 }
 0xc53   :  { %v2108_v32 = vpack.c.bf16 %v2092_v25, %v2076_v5  ;;  %v2110_v33 = vpack.c.bf16 %v2094_v27, %v2078_v24  ;;  %7769 = vmatpush3.bf16.msra.mxu0 %v8541_v11  ;;  %7791 = vmatpush3.bf16.msra.mxu1 %v8542_v12  ;;  %v1933_v4 = vpop.f32.mrb[20].mxu0  ;;  %v1976_v34 = vpop.f32.mrb[20].mxu1 }
 0xc54   :  { %v1934_v19 = vadd.f32 %v1933_v4, %v1519_v54  ;;  %v1977_v36 = vadd.f32 %v1976_v34, %v1527_v61  ;;  %v1935_v37 = vpop.f32.mrb[21].mxu0  ;;  %v1978_v39 = vpop.f32.mrb[21].mxu1  ;;  %7770 = vmatprep.subr.bf16.mxu0 %v8543_v23  ;;  %7792 = vmatprep.subr.bf16.mxu1 %v8544_v28  ;;  %v8553_v23 = vld [vmem:[%s10534_s13 + $0x120] sm:$0xff]  }
 0xc55   :  { %v1936_v42 = vadd.f32 %v1935_v37, %v1523_v6  ;;  %v1979_v43 = vadd.f32 %v1978_v39, %v1531_v13  ;;  %v1937_v45 = vpop.f32.mrb[22].mxu0  ;;  %v1980_v46 = vpop.f32.mrb[22].mxu1  ;;  %3264 = vmatprep.mubr.bf16.mxu0 %v2108_v32  ;;  %3305 = vmatprep.mubr.bf16.mxu1 %v2110_v33  ;;  %v8554_v28 = vld [vmem:[%s10534_s13 + $0x1a0] sm:$0xff]   ;;  %v8555_v32 = vld [vmem:[%s10534_s13 + $0x168] sm:$0xff]  }
 0xc56   :  { %v1938_v48 = vadd.f32 %v1937_v45, %v1519_v54  ;;  %v1981_v49 = vadd.f32 %v1980_v46, %v1527_v61  ;;  %v1939_v50 = vpop.f32.mrb[23].mxu0  ;;  %v1982_v51 = vpop.f32.mrb[23].mxu1  ;;  %v8550_v54 = vld [vmem:[%s10534_s13 + $0x198] sm:$0xff]   ;;  %v2079_v61 = vmax.f32 %v1934_v19, 0.0  ;;  %v2081_v62 = vmax.f32 %v1977_v36, 0.0  ;;  %v8556_v33 = vld [vmem:[%s10534_s13 + $0x1e8] sm:$0xff]  }
 0xc57   :  { %v1940_v55 = vadd.f32 %v1939_v50, %v1523_v6  ;;  %v1983_v56 = vadd.f32 %v1982_v51, %v1531_v13  ;;  %7771 = vmatpush3.bf16.msra.mxu0 %v8545_v35  ;;  %7793 = vmatpush3.bf16.msra.mxu1 %v8546_v21  ;;  %v8552_v6 = vld [vmem:[%s10534_s13 + $0x1e0] sm:$0xff]   ;;  %v2080_v9 = vmax.f32 %v1936_v42, 0.0  ;;  %v2082_v10 = vmax.f32 %v1979_v43, 0.0  ;;  %v8557_v42 = vld [vmem:[%s10534_s13 + $0x128] sm:$0xff]   ;;  %v8560_v50 = vld [vmem:[%s10534_s13 + $0x1f0] sm:$0xff]  }
 0xc58   :  { %v2095_v63 = vmax.f32 %v1938_v48, 0.0  ;;  %v2097_v0 = vmax.f32 %v1981_v49, 0.0  ;;  %7772 = vmatprep.subr.bf16.mxu0 %v8547_v40  ;;  %7794 = vmatprep.subr.bf16.mxu1 %v8548_v41  ;;  %v8558_v43 = vld [vmem:[%s10534_s13 + $0x1a8] sm:$0xff]  }
 0xc59   :  { %v2096_v11 = vmax.f32 %v1940_v55, 0.0  ;;  %v2098_v12 = vmax.f32 %v1983_v56, 0.0 }
 0xc5a   :  { %v9477_v13 = vpack.c.bf16 %v2095_v63, %v2079_v61  ;;  %v9479_v38 = vpack.c.bf16 %v2097_v0, %v2081_v62  ;;  %v8561_v61 = vld [vmem:[%s10534_s13 + $0x130] sm:$0xff]   ;;  %v8563_v63 = vld [vmem:[%s10534_s13 + $0x178] sm:$0xff]  }
 0xc5b   :  { %v9481_v14 = vpack.c.bf16 %v2096_v11, %v2080_v9  ;;  %v9483_v17 = vpack.c.bf16 %v2098_v12, %v2082_v10  ;;  %7773 = vmatpush3.bf16.msra.mxu0 %v8549_v57  ;;  %7795 = vmatpush3.bf16.msra.mxu1 %v8550_v54  ;;  %v2019_v18 = vpop.f32.mrb[24].mxu0  ;;  %v2062_v29 = vpop.f32.mrb[24].mxu1  ;;  %v8562_v62 = vld [vmem:[%s10534_s13 + $0x1b0] sm:$0xff]   ;;  %v8564_v0 = vld [vmem:[%s10534_s13 + $0x1f8] sm:$0xff]   ;;  %v8567_v9 = vld [vmem:[%s10534_s13 + $0x240] sm:$0xff]  }
 0xc5c   :  { %v2020_v5 = vadd.f32 %v2019_v18, %v1535_v47  ;;  %v2063_v24 = vadd.f32 %v2062_v29, %v1543_v52  ;;  %v2021_v25 = vpop.f32.mrb[25].mxu0  ;;  %v2064_v27 = vpop.f32.mrb[25].mxu1  ;;  %7774 = vmatprep.subr.bf16.mxu0 %v8551_v3  ;;  %7796 = vmatprep.subr.bf16.mxu1 %v8552_v6  ;;  %v8565_v3 = vld [vmem:[%s10534_s13 + $0x138] sm:$0xff]   ;;  %v8568_v10 = vld [vmem:[%s10534_s13 + $0x2c0] sm:$0xff]   ;;  %v8571_v18 = vld [vmem:[%s10534_s13 + $0x248] sm:$0xff]  }
 0xc5d   :  { %v2022_v4 = vadd.f32 %v2021_v25, %v1539_v53  ;;  %v2065_v34 = vadd.f32 %v2064_v27, %v1547_v60  ;;  %v2023_v35 = vpop.f32.mrb[26].mxu0  ;;  %v2066_v21 = vpop.f32.mrb[26].mxu1  ;;  %v8566_v6 = vld [vmem:[%s10534_s13 + $0x1b8] sm:$0xff]   ;;  %v8569_v11 = vld [vmem:[%s10534_s13 + $0x200] sm:$0xff]   ;;  %v8572_v29 = vld [vmem:[%s10534_s13 + $0x2c8] sm:$0xff]  }
 0xc5e   :  { %v2024_v19 = vadd.f32 %v2023_v35, %v1535_v47  ;;  %v2067_v36 = vadd.f32 %v2066_v21, %v1543_v52  ;;  %v2025_v37 = vpop.f32.mrb[27].mxu0  ;;  %v2068_v39 = vpop.f32.mrb[27].mxu1  ;;  %v2083_v45 = vmax.f32 %v2020_v5, 0.0  ;;  %v2085_v46 = vmax.f32 %v2063_v24, 0.0  ;;  %v8559_v47 = vld [vmem:[%s10534_s13 + $0x170] sm:$0xff]   ;;  %v8570_v12 = vld [vmem:[%s10534_s13 + $0x280] sm:$0xff]  }
 0xc5f   :  { %v2026_v40 = vadd.f32 %v2025_v37, %v1539_v53  ;;  %v2069_v41 = vadd.f32 %v2068_v39, %v1547_v60  ;;  %7775 = vmatpush3.bf16.msra.mxu0 %v8553_v23  ;;  %7797 = vmatpush3.bf16.msra.mxu1 %v8554_v28  ;;  %v2084_v51 = vmax.f32 %v2022_v4, 0.0  ;;  %v2086_v52 = vmax.f32 %v2065_v34, 0.0  ;;  %v8573_v23 = vld [vmem:[%s10534_s13 + $0x208] sm:$0xff]   ;;  %v8579_v5 = vld [vmem:[%s10534_s13 + $0x258] sm:$0xff]   ;;  %v8585_v4 = vld [vmem:[%s10534_s13 + $0x220] sm:$0xff]  }
 0xc60   :  { %v2099_v48 = vmax.f32 %v2024_v19, 0.0  ;;  %v2101_v49 = vmax.f32 %v2067_v36, 0.0  ;;  %7776 = vmatprep.subr.bf16.mxu0 %v8555_v32  ;;  %7798 = vmatprep.subr.bf16.mxu1 %v8556_v33  ;;  %v8574_v28 = vld [vmem:[%s10534_s13 + $0x288] sm:$0xff]   ;;  %v8580_v24 = vld [vmem:[%s10534_s13 + $0x2d8] sm:$0xff]   ;;  %v8583_v32 = vld [vmem:[%s10534_s13 + $0x260] sm:$0xff]  }
 0xc61   :  { %v2100_v53 = vmax.f32 %v2026_v40, 0.0  ;;  %v2102_v55 = vmax.f32 %v2069_v41, 0.0  ;;  %v8581_v25 = vld [vmem:[%s10534_s13 + $0x218] sm:$0xff]   ;;  %v8584_v33 = vld [vmem:[%s10534_s13 + $0x2e0] sm:$0xff]   ;;  %v8587_v35 = vld [vmem:[%s10534_s13 + $0x268] sm:$0xff]  }
 0xc62   :  { %v9509_v56 = vpack.c.bf16 %v2099_v48, %v2083_v45  ;;  %v9511_v57 = vpack.c.bf16 %v2101_v49, %v2085_v46  ;;  %v8582_v27 = vld [vmem:[%s10534_s13 + $0x298] sm:$0xff]   ;;  %v8586_v34 = vld [vmem:[%s10534_s13 + $0x2a0] sm:$0xff]   ;;  %v8588_v21 = vld [vmem:[%s10534_s13 + $0x2e8] sm:$0xff]  }
 0xc63   :  { %v9513_v54 = vpack.c.bf16 %v2100_v53, %v2084_v51  ;;  %v9515_v60 = vpack.c.bf16 %v2102_v55, %v2086_v52  ;;  %7777 = vmatpush3.bf16.msra.mxu0 %v8557_v42  ;;  %7799 = vmatpush3.bf16.msra.mxu1 %v8558_v43  ;;  %v8589_v19 = vld [vmem:[%s10534_s13 + $0x228] sm:$0xff]   ;;  %v8591_v37 = vld [vmem:[%s10534_s13 + $0x270] sm:$0xff]   ;;  %v8595_v42 = vld [vmem:[%s10534_s13 + $0x278] sm:$0xff]  }
 0xc64   :  { %7778 = vmatprep.subr.bf16.mxu0 %v8559_v47  ;;  %7800 = vmatprep.subr.bf16.mxu1 %v8560_v50  ;;  %v8590_v36 = vld [vmem:[%s10534_s13 + $0x2a8] sm:$0xff]   ;;  %v8592_v39 = vld [vmem:[%s10534_s13 + $0x2f0] sm:$0xff]   ;;  %v8596_v43 = vld [vmem:[%s10534_s13 + $0x2f8] sm:$0xff]  }
 0xc65   :  { %v8593_v40 = vld [vmem:[%s10534_s13 + $0x230] sm:$0xff]   ;;  %v8597_v45 = vld [vmem:[%s10534_s13 + $0x238] sm:$0xff]   ;;  %v8599_v48 = vld [vmem:[%s10534_s13 + $0x340] sm:$0xff]  }
 0xc66   :  { %v8594_v41 = vld [vmem:[%s10534_s13 + $0x2b0] sm:$0xff]   ;;  %v8598_v46 = vld [vmem:[%s10534_s13 + $0x2b8] sm:$0xff]   ;;  %v8600_v49 = vld [vmem:[%s10534_s13 + $0x3c0] sm:$0xff]  }
 0xc67   :  { %7779 = vmatpush3.bf16.msra.mxu0 %v8561_v61  ;;  %7801 = vmatpush3.bf16.msra.mxu1 %v8562_v62  ;;  %v8601_v47 = vld [vmem:[%s10534_s13 + $0x300] sm:$0xff]   ;;  %v8603_v51 = vld [vmem:[%s10534_s13 + $0x348] sm:$0xff]   ;;  %v8610_v61 = vld [vmem:[%s10534_s13 + $0x390] sm:$0xff]  }
 0xc68   :  { %7780 = vmatprep.subr.bf16.mxu0 %v8563_v63  ;;  %7802 = vmatprep.subr.bf16.mxu1 %v8564_v0  ;;  %v8602_v50 = vld [vmem:[%s10534_s13 + $0x380] sm:$0xff]   ;;  %v8604_v52 = vld [vmem:[%s10534_s13 + $0x3c8] sm:$0xff]   ;;  %v8612_v62 = vld [vmem:[%s10534_s13 + $0x3d8] sm:$0xff]  }
 0xc69   :  { %v8605_v53 = vld [vmem:[%s10534_s13 + $0x308] sm:$0xff]   ;;  %v8613_v63 = vld [vmem:[%s10534_s13 + $0x318] sm:$0xff]  }
 0xc6a   :  { %v8606_v55 = vld [vmem:[%s10534_s13 + $0x388] sm:$0xff]   ;;  %v8614_v0 = vld [vmem:[%s10534_s13 + $0x398] sm:$0xff]  }
 0xc6b   :  { %7781 = vmatpush3.bf16.msra.mxu0 %v8565_v3  ;;  %7803 = vmatpush3.bf16.msra.mxu1 %v8566_v6  ;;  %v8615_v3 = vld [vmem:[%s10534_s13 + $0x360] sm:$0xff]  }
 0xc6c   :  { %7810 = vmatprep.subr.bf16.mxu0 %v8567_v9  ;;  %7832 = vmatprep.subr.bf16.mxu1 %v8568_v10  ;;  %v8616_v6 = vld [vmem:[%s10534_s13 + $0x3e0] sm:$0xff]  }
 0xc6d   :  { %v8617_v9 = vld [vmem:[%s10534_s13 + $0x320] sm:$0xff]  }
 0xc6e   :  { %3265 = vmatmul.mubr.bf16.vlgmr.msra.gmra.mrb[32].mxu0 %v9441_v30  ;;  %3306 = vmatmul.mubr.bf16.vlgmr.msra.gmra.mrb[32].mxu1 %v9443_v31  ;;  %v8575_v30 = vld [vmem:[%s10534_s13 + $0x250] sm:$0xff]   ;;  %v8618_v10 = vld [vmem:[%s10534_s13 + $0x3a0] sm:$0xff]  }
 0xc6f   :  { %7811 = vmatpush3.bf16.msra.mxu0 %v8569_v11  ;;  %3346 = vmatprep.mubr.bf16.mxu0 %v9481_v14  ;;  %v8576_v31 = vld [vmem:[%s10534_s13 + $0x2d0] sm:$0xff]   ;;  %v8619_v11 = vld [vmem:[%s10534_s13 + $0x368] sm:$0xff]  }
 0xc70   :  { %7833 = vmatpush3.bf16.msra.mxu1 %v8570_v12  ;;  %3387 = vmatprep.mubr.bf16.mxu1 %v9483_v17  ;;  %v8577_v14 = vld [vmem:[%s10534_s13 + $0x210] sm:$0xff]   ;;  %v8620_v12 = vld [vmem:[%s10534_s13 + $0x3e8] sm:$0xff]  }
 0xc71   :  { %7812 = vmatprep.subr.bf16.mxu0 %v8571_v18  ;;  %7834 = vmatprep.subr.bf16.mxu1 %v8572_v29  ;;  %v8578_v17 = vld [vmem:[%s10534_s13 + $0x290] sm:$0xff]   ;;  %v8621_v18 = vld [vmem:[%s10534_s13 + $0x328] sm:$0xff]  }
 0xc72   :  { %v8622_v29 = vld [vmem:[%s10534_s13 + $0x3a8] sm:$0xff]  }
 0xc73   :  { %7813 = vmatpush3.bf16.msra.mxu0 %v8573_v23  ;;  %v8623_v23 = vld [vmem:[%s10534_s13 + $0x370] sm:$0xff]  }
 0xc74   :  { %7835 = vmatpush3.bf16.msra.mxu1 %v8574_v28  ;;  %7814 = vmatprep.subr.bf16.mxu0 %v8575_v30  ;;  %v8624_v28 = vld [vmem:[%s10534_s13 + $0x3f0] sm:$0xff]  }
 0xc75   :  { %7836 = vmatprep.subr.bf16.mxu1 %v8576_v31  ;;  %v8625_v30 = vld [vmem:[%s10534_s13 + $0x330] sm:$0xff]  }
 0xc76   :  { %v8626_v31 = vld [vmem:[%s10534_s13 + $0x3b0] sm:$0xff]  }
 0xc77   :  { %7815 = vmatpush3.bf16.msra.mxu0 %v8577_v14  ;;  %v8627_v14 = vld [vmem:[%s10534_s13 + $0x378] sm:$0xff]  }
 0xc78   :  { %7837 = vmatpush3.bf16.msra.mxu1 %v8578_v17  ;;  %7816 = vmatprep.subr.bf16.mxu0 %v8579_v5  ;;  %v8628_v17 = vld [vmem:[%s10534_s13 + $0x3f8] sm:$0xff]  }
 0xc79   :  { %7838 = vmatprep.subr.bf16.mxu1 %v8580_v24  ;;  %v8629_v5 = vld [vmem:[%s10534_s13 + $0x338] sm:$0xff]  }
 0xc7a   :  { %v8630_v24 = vld [vmem:[%s10534_s13 + $0x3b8] sm:$0xff]  }
 0xc7b   :  { %7817 = vmatpush3.bf16.msra.mxu0 %v8581_v25 }
 0xc7c   :  { %7839 = vmatpush3.bf16.msra.mxu1 %v8582_v27  ;;  %7818 = vmatprep.subr.bf16.mxu0 %v8583_v32  ;;  %v7022_v32 = vld [vmem:[%s10538_s14] ss:$0 sm:$0xff] }
 0xc7d   :  { %7840 = vmatprep.subr.bf16.mxu1 %v8584_v33 }
 0xc7f   :  { %7819 = vmatpush3.bf16.msra.mxu0 %v8585_v4 }
 0xc80   :  { %7841 = vmatpush3.bf16.msra.mxu1 %v8586_v34  ;;  %7820 = vmatprep.subr.bf16.mxu0 %v8587_v35 }
 0xc81   :  { %7842 = vmatprep.subr.bf16.mxu1 %v8588_v21 }
 0xc83   :  { %7821 = vmatpush3.bf16.msra.mxu0 %v8589_v19 }
 0xc84   :  { %7843 = vmatpush3.bf16.msra.mxu1 %v8590_v36  ;;  %7822 = vmatprep.subr.bf16.mxu0 %v8591_v37 }
 0xc85   :  { %7844 = vmatprep.subr.bf16.mxu1 %v8592_v39 }
 0xc87   :  { %7823 = vmatpush3.bf16.msra.mxu0 %v8593_v40 }
 0xc88   :  { %7845 = vmatpush3.bf16.msra.mxu1 %v8594_v41  ;;  %7824 = vmatprep.subr.bf16.mxu0 %v8595_v42 }
 0xc89   :  { %7846 = vmatprep.subr.bf16.mxu1 %v8596_v43 }
 0xc8b   :  { %7825 = vmatpush3.bf16.msra.mxu0 %v8597_v45 }
 0xc8c   :  { %7847 = vmatpush3.bf16.msra.mxu1 %v8598_v46  ;;  %7854 = vmatprep.subr.bf16.mxu0 %v8599_v48 }
 0xc8d   :  { %7876 = vmatprep.subr.bf16.mxu1 %v8600_v49 }
 0xc8e   :  { %3347 = vmatmul.mubr.bf16.vlgmr.msra.gmra.mrb[36].mxu0 %v9477_v13  ;;  %v8607_v13 = vld [vmem:[%s10534_s13 + $0x350] sm:$0xff]  }
 0xc8f   :  { %3388 = vmatmul.mubr.bf16.vlgmr.msra.gmra.mrb[36].mxu1 %v9479_v38  ;;  %7855 = vmatpush3.bf16.msra.mxu0 %v8601_v47  ;;  %v8608_v38 = vld [vmem:[%s10534_s13 + $0x3d0] sm:$0xff]  }
 0xc90   :  { %3428 = vmatprep.mubr.bf16.mxu0 %v9513_v54  ;;  %7877 = vmatpush3.bf16.msra.mxu1 %v8602_v50  ;;  %v8609_v54 = vld [vmem:[%s10534_s13 + $0x310] sm:$0xff]  }
 0xc91   :  { %3469 = vmatprep.mubr.bf16.mxu1 %v9515_v60  ;;  %7856 = vmatprep.subr.bf16.mxu0 %v8603_v51  ;;  %v8611_v60 = vld [vmem:[%s10534_s13 + $0x358] sm:$0xff]  }
 0xc92   :  { %7878 = vmatprep.subr.bf16.mxu1 %v8604_v52 }
 0xc93   :  { %7857 = vmatpush3.bf16.msra.mxu0 %v8605_v53 }
 0xc94   :  { %7879 = vmatpush3.bf16.msra.mxu1 %v8606_v55  ;;  %7858 = vmatprep.subr.bf16.mxu0 %v8607_v13 }
 0xc95   :  { %7880 = vmatprep.subr.bf16.mxu1 %v8608_v38 }
 0xc97   :  { %7859 = vmatpush3.bf16.msra.mxu0 %v8609_v54 }
 0xc98   :  { %7881 = vmatpush3.bf16.msra.mxu1 %v8610_v61  ;;  %7860 = vmatprep.subr.bf16.mxu0 %v8611_v60 }
 0xc99   :  { %7882 = vmatprep.subr.bf16.mxu1 %v8612_v62 }
 0xc9b   :  { %7861 = vmatpush3.bf16.msra.mxu0 %v8613_v63 }
 0xc9c   :  { %7883 = vmatpush3.bf16.msra.mxu1 %v8614_v0  ;;  %7862 = vmatprep.subr.bf16.mxu0 %v8615_v3 }
 0xc9d   :  { %7884 = vmatprep.subr.bf16.mxu1 %v8616_v6 }
 0xc9f   :  { %7863 = vmatpush3.bf16.msra.mxu0 %v8617_v9 }
 0xca0   :  { %7885 = vmatpush3.bf16.msra.mxu1 %v8618_v10  ;;  %7864 = vmatprep.subr.bf16.mxu0 %v8619_v11 }
 0xca1   :  { %7886 = vmatprep.subr.bf16.mxu1 %v8620_v12 }
 0xca3   :  { %7865 = vmatpush3.bf16.msra.mxu0 %v8621_v18 }
 0xca4   :  { %7887 = vmatpush3.bf16.msra.mxu1 %v8622_v29  ;;  %7866 = vmatprep.subr.bf16.mxu0 %v8623_v23 }
 0xca5   :  { %7888 = vmatprep.subr.bf16.mxu1 %v8624_v28 }
 0xca7   :  { %7867 = vmatpush3.bf16.msra.mxu0 %v8625_v30 }
 0xca8   :  { %7889 = vmatpush3.bf16.msra.mxu1 %v8626_v31  ;;  %7868 = vmatprep.subr.bf16.mxu0 %v8627_v14 }
 0xca9   :  { %7890 = vmatprep.subr.bf16.mxu1 %v8628_v17 }
 0xcab   :  { %7869 = vmatpush3.bf16.msra.mxu0 %v8629_v5 }
 0xcac   :  { %7891 = vmatpush3.bf16.msra.mxu1 %v8630_v24 }
 0xcae   :  { %3429 = vmatmul.mubr.bf16.vlgmr.msra.gmra.mrb[40].mxu0 %v9509_v56 }
 0xcaf   :  { %3470 = vmatmul.mubr.bf16.vlgmr.msra.gmra.mrb[40].mxu1 %v9511_v57 }
 0xd21   :  { %v7738_v25 = vpop.f32.mrb[28].mxu0  ;;  %v7760_v27 = vpop.f32.mrb[28].mxu1 }
 0xd22   :  { %v7739_v33 = vpop.f32.mrb[29].mxu0  ;;  %v7761_v4 = vpop.f32.mrb[29].mxu1 }
 0xd23   :  { %v7740_v34 = vadd.f32 %v7739_v33, %v7738_v25  ;;  %v7762_v35 = vadd.f32 %v7761_v4, %v7760_v27  ;;  %v7741_v21 = vpop.f32.mrb[30].mxu0  ;;  %v7763_v19 = vpop.f32.mrb[30].mxu1 }
 0xd24   :  { %v7742_v36 = vpop.f32.mrb[31].mxu0  ;;  %v7764_v37 = vpop.f32.mrb[31].mxu1 }
 0xd25   :  { %v3185_v39 = vadd.f32 %v7740_v34, %v7022_v32  ;;  %v7743_v40 = vadd.f32 %v7742_v36, %v7741_v21  ;;  %v7765_v41 = vadd.f32 %v7764_v37, %v7763_v19 }
 0xd27   :  { %v3226_v56 = vadd.f32 %v7762_v35, %v3185_v39  ;;  %v3188_v42 = vadd.f32 %v7743_v40, %v7022_v32 }
 0xd29   :  { %v3229_v57 = vadd.f32 %v7765_v41, %v3188_v42 }
 0xd41   :  { %v7782_v43 = vpop.f32.mrb[32].mxu0  ;;  %v7804_v45 = vpop.f32.mrb[32].mxu1 }
 0xd42   :  { %v7783_v46 = vpop.f32.mrb[33].mxu0  ;;  %v7805_v48 = vpop.f32.mrb[33].mxu1 }
 0xd43   :  { %v7784_v49 = vadd.f32 %v7783_v46, %v7782_v43  ;;  %v7806_v47 = vadd.f32 %v7805_v48, %v7804_v45  ;;  %v7785_v50 = vpop.f32.mrb[34].mxu0  ;;  %v7807_v51 = vpop.f32.mrb[34].mxu1 }
 0xd44   :  { %v7786_v52 = vpop.f32.mrb[35].mxu0  ;;  %v7808_v53 = vpop.f32.mrb[35].mxu1 }
 0xd45   :  { %v3267_v55 = vadd.f32 %v7784_v49, %v3226_v56  ;;  %v7787_v13 = vadd.f32 %v7786_v52, %v7785_v50  ;;  %v7809_v38 = vadd.f32 %v7808_v53, %v7807_v51  ;;  %v7154_v53 = vld [vmem:[%s10560_s4 + $0x28] sm:$0xff] }
 0xd47   :  { %v3308_v54 = vadd.f32 %v7806_v47, %v3267_v55  ;;  %v3270_v61 = vadd.f32 %v7787_v13, %v3229_v57  ;;  %v7155_v13 = vld [vmem:[%s10560_s4 + $0x30] sm:$0xff] }
 0xd49   :  { %v3311_v60 = vadd.f32 %v7809_v38, %v3270_v61  ;;  %v7156_v38 = vld [vmem:[%s10560_s4 + $0x38] sm:$0xff] }
 0xd61   :  { %v7826_v62 = vpop.f32.mrb[36].mxu0 }
 0xd62   :  { %v7848_v63 = vpop.f32.mrb[36].mxu1  ;;  %v7827_v0 = vpop.f32.mrb[37].mxu0 }
 0xd63   :  { %v7828_v3 = vadd.f32 %v7827_v0, %v7826_v62  ;;  %v7849_v6 = vpop.f32.mrb[37].mxu1  ;;  %v7829_v9 = vpop.f32.mrb[38].mxu0 }
 0xd64   :  { %v7850_v10 = vadd.f32 %v7849_v6, %v7848_v63  ;;  %v7851_v11 = vpop.f32.mrb[38].mxu1  ;;  %v7830_v12 = vpop.f32.mrb[39].mxu0 }
 0xd65   :  { %v3349_v18 = vadd.f32 %v7828_v3, %v3308_v54  ;;  %v7831_v29 = vadd.f32 %v7830_v12, %v7829_v9  ;;  %v7852_v23 = vpop.f32.mrb[39].mxu1  ;;  %v8355_v54 = vpack.c.bf16 %v7156_v38, %v7155_v13  ;;  %v7151_v9 = vld [vmem:[%s10539_s15] ss:$0 sm:$0xff] }
 0xd66   :  { %v7853_v28 = vadd.f32 %v7852_v23, %v7851_v11  ;;  %v7152_v11 = vld [vmem:[%s10540_s16] ss:$0 sm:$0xff] }
 0xd67   :  { %v3390_v30 = vadd.f32 %v7850_v10, %v3349_v18  ;;  %v3352_v31 = vadd.f32 %v7831_v29, %v3311_v60 }
 0xd69   :  { %v3393_v14 = vadd.f32 %v7853_v28, %v3352_v31  ;;  %v7158_v31 = vld [vmem:[%s10529_s6 + $0x1] ss:$0 sm:$0xff] }
 0xd81   :  { %v7870_v17 = vpop.f32.mrb[40].mxu0 }
 0xd82   :  { %v7892_v5 = vpop.f32.mrb[40].mxu1  ;;  %v7871_v24 = vpop.f32.mrb[41].mxu0 }
 0xd83   :  { %v7872_v25 = vadd.f32 %v7871_v24, %v7870_v17  ;;  %v7893_v27 = vpop.f32.mrb[41].mxu1  ;;  %v7873_v32 = vpop.f32.mrb[42].mxu0 }
 0xd84   :  { %v7894_v33 = vadd.f32 %v7893_v27, %v7892_v5  ;;  %v7895_v4 = vpop.f32.mrb[42].mxu1  ;;  %v7874_v34 = vpop.f32.mrb[43].mxu0 }
 0xd85   :  { %v3431_v35 = vadd.f32 %v7872_v25, %v3390_v30  ;;  %v7875_v21 = vadd.f32 %v7874_v34, %v7873_v32  ;;  %v7896_v19 = vpop.f32.mrb[43].mxu1 }
 0xd86   :  { %v7897_v36 = vadd.f32 %v7896_v19, %v7895_v4 }
 0xd87   :  { %v3472_v37 = vadd.f32 %v7894_v33, %v3431_v35  ;;  %v3434_v39 = vadd.f32 %v7875_v21, %v3393_v14  ;;  %v9796_v21 = vld [vmem:[%s10530_s1] sm:$0xff] }
 0xd89   :  { %v3475_v40 = vadd.f32 %v7897_v36, %v3434_v39  ;;  %v3478_v41 = vadd.f32 %v3472_v37, %v9197_v44  ;;  %v9802_v36 = vld [vmem:[%s10530_s1 + $0x8] sm:$0xff]  ;;  %s10564_s1 = smov 112  }
 0xd8b   :  { %v3482_v56 = vsel %vm177_vm2, %v3478_v41, 0.0  ;;  %v3479_v42 = vadd.f32 %v3475_v40, %v9199_v22  ;;  %v7153_v22 = vld [vmem:[%s10560_s4 + $0x20] sm:$0xff] }
 0xd8c   :  { %3483 = vadd.xlane.f32.xlu0 %v3482_v56  ;;  %v8351_v55 = vpack.c.bf16 %v7154_v53, %v7153_v22 }
 0xd8d   :  { %v3485_v57 = vsel %vm177_vm2, %v3479_v42, 0.0 }
 0xd8e   :  { %8352 = vmatprep.subr.bf16.mxu0 %v8351_v55 }
 0xd8f   :  { %8354 = vmatpush3.bf16.msra.mxu0 %v8351_v55 }
 0xd90   :  { %3486 = vadd.xlane.f32.xlu0 %v3485_v57  ;;  %8356 = vmatprep.subr.bf16.mxu0 %v8355_v54 }
 0xd93   :  { %8358 = vmatpush3.bf16.msra.mxu0 %v8355_v54 }
 0xe19   :  { %v3484_v43 = vpop.xlane.xlu0 %3483 }
 0xe1a   :  { %v3488_v45 = vmul.f32 0.03125, %v3484_v43 }
 0xe1c   :  { %v3490_v46 = vsub.f32 %v3478_v41, %v3488_v45 }
 0xe1d   :  { %v3487_v48 = vpop.xlane.xlu0 %3486 }
 0xe1e   :  { %v3489_v49 = vmul.f32 0.03125, %v3487_v48  ;;  %v3492_v47 = vmul.f32 %v3490_v46, %v3490_v46 }
 0xe20   :  { %v3491_v50 = vsub.f32 %v3479_v42, %v3489_v49  ;;  %v3494_v51 = vsel %vm177_vm2, %v3492_v47, 0.0 }
 0xe21   :  { %3495 = vadd.xlane.f32.xlu0 %v3494_v51 }
 0xe22   :  { %v3493_v52 = vmul.f32 %v3491_v50, %v3491_v50 }
 0xe24   :  { %v3497_v44 = vsel %vm177_vm2, %v3493_v52, 0.0 }
 0xe25   :  { %3498 = vadd.xlane.f32.xlu0 %v3497_v44 }
 0xeae   :  { %v3496_v61 = vpop.xlane.xlu0 %3495 }
 0xeaf   :  { %v3500_v60 = vmul.f32 0.03125, %v3496_v61 }
 0xeb1   :  { %v3502_v62 = vadd.f32 1e-05, %v3500_v60 }
 0xeb2   :  { %v3499_v63 = vpop.xlane.xlu0 %3498 }
 0xeb3   :  { %8795 = vrsqrt.f32 %v3502_v62  ;;  %v3501_v0 = vmul.f32 0.03125, %v3499_v63 }
 0xeb5   :  { %v3503_v3 = vadd.f32 1e-05, %v3501_v0 }
 0xeb7   :  { %8797 = vrsqrt.f32 %v3503_v3 }
 0xebd   :  { %v8796_v6 = vpop.eup %8795 }
 0xebe   :  { %v3506_v10 = vmul.f32 %v8796_v6, %v3490_v46 }
 0xec0   :  { %v3514_v12 = vmul.f32 %v7151_v9, %v3506_v10 }
 0xec1   :  { %v8798_v18 = vpop.eup %8797 }
 0xec2   :  { %v3507_v29 = vmul.f32 %v8798_v18, %v3491_v50  ;;  %v9764_v23 = vadd.f32 %v7152_v11, %v3514_v12 }
 0xec4   :  { %v3515_v28 = vmul.f32 %v7151_v9, %v3507_v29  ;;  %8224 = vmatprep.mubr.msk.f32.mxu0 %vm177_vm2, %v9764_v23 }
 0xec6   :  { %v9768_v30 = vadd.f32 %v7152_v11, %v3515_v28 }
 0xec8   :  { %8225 = vmatmul.mubr.msk.f32.vlgmr.msra.gmra.mrb[44].mxu0 %vm177_vm2, %v9768_v30 }
 0xf9b   :  { %v8226_v14 = vpop.f32.mrb[44].mxu0 }
 0xf9c   :  { %v9775_v17 = vadd.f32 %v8226_v14, %v7158_v31  ;;  %v3609_v5 = vpop.f32.mrb[45].mxu0 }
 0xf9d   :  { %v9777_v24 = vadd.f32 %v7158_v31, %v3609_v5 }
 0xf9f   :  { %8231 = vmatprep.mubr.msk.f32.mxu1 %vm265_vm3, %v9777_v24  ;;  %v9783_v25 = vpack.i.bf16 %v9775_v17, %v9777_v24 }
 0xfa1   :  { %8464 = vrot.lane.b32.xlu0 %v9783_v25, %s8841_s2 }
0x1013   :  { %v8465_v27 = vpop.permute.xlu0 %8464 }
0x1014   :  { %v8467_v32 = vunpack.i.h.bf16 %v8465_v27  ;;  %v8466_v33 = vunpack.i.l.bf16 %v8465_v27 }
0x1016   :  { %v8359_v4 = vpack.c.bf16 %v8467_v32, %v8466_v33 }
0x1018   :  { %8361 = vmatprep.subr.msk.bf16.mxu1 %vm9005_vm4, %v8359_v4 }
0x1019   :  { %8364 = vmatpush3.bf16.xpose.msk.msra.mxu1 %vm9005_vm4, %v8359_v4 }
0x1020   :  { %8232 = vmatmul.mubr.msk.f32.vlgmr.msra.gmra.mrb[10].mxu1 %vm265_vm3, %v9775_v17 }
0x10f3   :  { %v8233_v34 = vpop.f32.mrb[10].mxu1 }
0x10f4   :  { %v3698_v35 = vpop.f32.mrb[11].mxu1  ;;  %v3704_v37 = vadd.f32 %v9802_v36, %v8233_v34 }
0x10f5   :  { %v3699_v19 = vadd.f32 %v9796_v21, %v3698_v35 }
0x10f6   :  { %v3710_v40 = vsel %vm349_vm5, %v3704_v37, -inf }
0x10f7   :  { %v3707_v39 = vsel %vm349_vm5, %v3699_v19, -inf }
0x10f8   :  { %3708 = vmax.xlane.f32.xlu1 %v3707_v39 }
0x10fc   :  { %3711 = vmax.xlane.f32.xlu1 %v3710_v40 }
0x110d   :  { %8469 = vrot.lane.b32.xlu1 %v9783_v25, %s8842_s29  ;;  %s10565_s29 = smov 72  }
0x1111   :  { %8474 = vrot.lane.b32.xlu1 %v9783_v25, %s8843_s3  ;;  %s10566_s3 = smov 56  }
0x1115   :  { %3818 = vrot.lane.b32.xlu1 %v9777_v24, %s8844_s30 }
0x1185   :  { %v3709_v41 = vpop.xlane.xlu1 %3708 }
0x1186   :  { %v3713_v56 = vsub.f32 %v3699_v19, %v3709_v41 }
0x1188   :  { %v3715_v42 = vmul.f32 1.442695, %v3713_v56 }
0x1189   :  { %v3712_v57 = vpop.xlane.xlu1 %3711 }
0x118a   :  { %8799 = vpow2.f32 %v3715_v42  ;;  %v3714_v43 = vsub.f32 %v3704_v37, %v3712_v57 }
0x118c   :  { %v3717_v45 = vmul.f32 1.442695, %v3714_v43 }
0x118d   :  { %v8470_v46 = vpop.permute.xlu1 %8469 }
0x118e   :  { %8801 = vpow2.f32 %v3717_v45  ;;  %v8472_v48 = vunpack.i.h.bf16 %v8470_v46  ;;  %v8471_v49 = vunpack.i.l.bf16 %v8470_v46 }
0x1190   :  { %v8365_v47 = vpack.c.bf16 %v8472_v48, %v8471_v49 }
0x1191   :  { %v8475_v50 = vpop.permute.xlu1 %8474 }
0x1192   :  { %v8477_v51 = vunpack.i.h.bf16 %v8475_v50  ;;  %v8476_v52 = vunpack.i.l.bf16 %v8475_v50  ;;  %8366 = vmatprep.subr.bf16.mxu0 %v8365_v47 }
0x1193   :  { %8368 = vmatpush3.bf16.msra.mxu0 %v8365_v47 }
0x1194   :  { %v8800_v44 = vpop.eup %8799  ;;  %v8369_v22 = vpack.c.bf16 %v8477_v51, %v8476_v52 }
0x1195   :  { %v3719_v53 = vsel %vm349_vm5, %v8800_v44, 0.0  ;;  %v3819_v38 = vpop.permute.xlu1 %3818 }
0x1196   :  { %3720 = vadd.xlane.f32.xlu1 %v3719_v53  ;;  %8371 = vmatprep.subr.msk.bf16.mxu0 %vm9005_vm4, %v8369_v22 }
0x1198   :  { %v8802_v55 = vpop.eup %8801 }
0x1199   :  { %v3722_v13 = vsel %vm349_vm5, %v8802_v55, 0.0 }
0x119a   :  { %3723 = vadd.xlane.f32.xlu0 %v3722_v13 }
0x11a7   :  { %3820 = vrot.lane.b32.xlu1 %v9775_v17, %s8844_s30  ;;  %s10567_s30 = smov 104  }
0x11ab   :  { %8479 = vrot.lane.b32.xlu1 %v9783_v25, %s8845_s20  ;;  %s10568_s20 = smov 48  }
0x11af   :  { %4183 = vrot.lane.b32.xlu1 %v9775_v17, %s10564_s1 }
0x11b0   :  { %4181 = vrot.lane.b32.xlu0 %v9777_v24, %s10564_s1 }
0x1223   :  { %v3721_v54 = vpop.xlane.xlu1 %3720 }
0x1224   :  { %8803 = vrcp.f32 %v3721_v54 }
0x1227   :  { %v3724_v61 = vpop.xlane.xlu0 %3723  ;;  %v3821_v60 = vpop.permute.xlu1 %3820 }
0x1228   :  { %8805 = vrcp.f32 %v3724_v61 }
0x122b   :  { %v8480_v63 = vpop.permute.xlu1 %8479  ;;  %v4182_v12 = vpop.permute.xlu0 %4181 }
0x122c   :  { %v8482_v3 = vunpack.i.h.bf16 %v8480_v63  ;;  %v8481_v6 = vunpack.i.l.bf16 %v8480_v63 }
0x122e   :  { %v8804_v62 = vpop.eup %8803  ;;  %v8379_v11 = vpack.c.bf16 %v8482_v3, %v8481_v6 }
0x122f   :  { %v3727_v0 = vmul.f32 %v8804_v62, %v8800_v44  ;;  %v4184_v18 = vpop.permute.xlu1 %4183 }
0x1231   :  { %8238 = vmatprep.mubr.msk.f32.mxu0 %vm349_vm5, %v3727_v0 }
0x1232   :  { %v8806_v9 = vpop.eup %8805 }
0x1233   :  { %v3728_v10 = vmul.f32 %v8806_v9, %v8802_v55 }
0x1235   :  { %8239 = vmatmul.mubr.msk.f32.vlgmr.msra.gmra.mrb[46].mxu0 %vm349_vm5, %v3728_v10 }
0x1236   :  { %8374 = vmatpush3.bf16.xpose.msk.msra.mxu0 %vm9005_vm4, %v8369_v22  ;;  %8245 = vmatprep.mubr.msk.f32.mxu0 %vm265_vm3, %v3819_v38 }
0x1237   :  { %8381 = vmatprep.subr.msk.bf16.mxu0 %vm9005_vm4, %v8379_v11 }
0x123d   :  { %8246 = vmatmul.mubr.msk.f32.vlgmr.msra.gmra.mrb[48].mxu0 %vm265_vm3, %v3821_v60 }
0x123e   :  { %8384 = vmatpush3.bf16.xpose.msk.msra.mxu0 %vm9005_vm4, %v8379_v11  ;;  %8269 = vmatprep.mubr.msk.f32.mxu0 %vm265_vm3, %v4182_v12 }
0x1245   :  { %8270 = vmatmul.mubr.msk.f32.vlgmr.msra.gmra.mrb[50].mxu0 %vm265_vm3, %v4184_v18  ;;  %v7174_v18 = vld [vmem:[%s10531_s7 + $0x28] sm:$0xff] }
0x1308   :  { %v9837_v29 = vpop.f32.mrb[46].mxu0 }
0x1309   :  { %v9839_v28 = vpop.f32.mrb[47].mxu0 }
0x1310   :  { %v8247_v31 = vpop.f32.mrb[48].mxu0 }
0x1311   :  { %v3906_v14 = vadd.f32 %v9802_v36, %v8247_v31  ;;  %v3900_v5 = vpop.f32.mrb[49].mxu0  ;;  %v7167_v31 = vld [vmem:[%s10531_s7 + $0x20] sm:$0xff] }
0x1312   :  { %v3901_v27 = vadd.f32 %v9796_v21, %v3900_v5 }
0x1313   :  { %v3912_v32 = vsel %vm349_vm5, %v3906_v14, -inf }
0x1314   :  { %3913 = vmax.xlane.f32.xlu0 %v3912_v32  ;;  %v3909_v33 = vsel %vm349_vm5, %v3901_v27, -inf }
0x1315   :  { %3910 = vmax.xlane.f32.xlu1 %v3909_v33 }
0x1318   :  { %v8271_v4 = vpop.f32.mrb[50].mxu0 }
0x1319   :  { %v4263_v34 = vpop.f32.mrb[51].mxu0  ;;  %v4269_v53 = vadd.f32 %v9802_v36, %v8271_v4 }
0x131a   :  { %v4264_v35 = vadd.f32 %v9796_v21, %v4263_v34 }
0x131b   :  { %v4275_v55 = vsel %vm349_vm5, %v4269_v53, -inf }
0x131c   :  { %v4272_v19 = vsel %vm349_vm5, %v4264_v35, -inf }
0x132a   :  { %8489 = vrot.lane.b32.xlu0 %v9783_v25, %s10565_s29 }
0x1349   :  { %4273 = vmax.xlane.f32.xlu0 %v4272_v19 }
0x13a1   :  { %v3914_v37 = vpop.xlane.xlu0 %3913 }
0x13a2   :  { %v3916_v39 = vsub.f32 %v3906_v14, %v3914_v37  ;;  %v3911_v40 = vpop.xlane.xlu1 %3910 }
0x13a3   :  { %v3915_v41 = vsub.f32 %v3901_v27, %v3911_v40 }
0x13a4   :  { %v3919_v56 = vmul.f32 1.442695, %v3916_v39 }
0x13a5   :  { %v3917_v42 = vmul.f32 1.442695, %v3915_v41  ;;  %v8490_v57 = vpop.permute.xlu0 %8489 }
0x13a6   :  { %8807 = vpow2.f32 %v3919_v56  ;;  %v8492_v43 = vunpack.i.h.bf16 %v8490_v57  ;;  %v8491_v45 = vunpack.i.l.bf16 %v8490_v57 }
0x13a7   :  { %8809 = vpow2.f32 %v3917_v42 }
0x13a8   :  { %v8389_v46 = vpack.c.bf16 %v8492_v43, %v8491_v45  ;;  %v7185_v43 = vld [vmem:[%s10531_s7 + $0x30] sm:$0xff] }
0x13aa   :  { %8391 = vmatprep.subr.msk.bf16.mxu0 %vm9005_vm4, %v8389_v46 }
0x13ab   :  { %8394 = vmatpush3.bf16.xpose.msk.msra.mxu0 %vm9005_vm4, %v8389_v46 }
0x13b0   :  { %v8808_v48 = vpop.eup %8807 }
0x13b1   :  { %v3924_v49 = vsel %vm349_vm5, %v8808_v48, 0.0  ;;  %v8810_v47 = vpop.eup %8809 }
0x13b2   :  { %3925 = vadd.xlane.f32.xlu1 %v3924_v49  ;;  %v3921_v50 = vsel %vm349_vm5, %v8810_v47, 0.0 }
0x13b6   :  { %3922 = vadd.xlane.f32.xlu1 %v3921_v50 }
0x13c7   :  { %8484 = vrot.lane.b32.xlu1 %v9783_v25, %s10566_s3 }
0x13cb   :  { %4465 = vrot.lane.b32.xlu1 %v9777_v24, %s10567_s30 }
0x13cf   :  { %4467 = vrot.lane.b32.xlu1 %v9775_v17, %s10567_s30 }
0x13d6   :  { %v4274_v51 = vpop.xlane.xlu0 %4273 }
0x13d7   :  { %v4278_v26 = vsub.f32 %v4264_v35, %v4274_v51 }
0x13d9   :  { %v4280_v52 = vmul.f32 1.442695, %v4278_v26 }
0x13db   :  { %8811 = vpow2.f32 %v4280_v52 }
0x13e5   :  { %v9861_v44 = vpop.eup %8811 }
0x13e6   :  { %v4284_v22 = vsel %vm349_vm5, %v9861_v44, 0.0 }
0x13e7   :  { %4285 = vadd.xlane.f32.xlu0 %v4284_v22 }
0x13f3   :  { %4276 = vmax.xlane.f32.xlu1 %v4275_v55 }
0x1404   :  { %8494 = vrot.lane.b32.xlu1 %v9783_v25, %s10568_s20 }
0x1408   :  { %8499 = vrot.lane.b32.xlu1 %v9783_v25, %s10569_s28 }
0x143f   :  { %v3926_v17 = vpop.xlane.xlu1 %3925 }
0x1440   :  { %8813 = vrcp.f32 %v3926_v17 }
0x1443   :  { %v3923_v24 = vpop.xlane.xlu1 %3922 }
0x1444   :  { %8815 = vrcp.f32 %v3923_v24  ;;  %v7194_v24 = vld [vmem:[%s10531_s7 + $0x38] sm:$0xff] }
0x1447   :  { %v8485_v13 = vpop.permute.xlu1 %8484 }
0x1448   :  { %v8487_v38 = vunpack.i.h.bf16 %v8485_v13  ;;  %v8486_v54 = vunpack.i.l.bf16 %v8485_v13 }
0x144a   :  { %v8375_v61 = vpack.c.bf16 %v8487_v38, %v8486_v54  ;;  %v8814_v62 = vpop.eup %8813 }
0x144b   :  { %v4466_v60 = vpop.permute.xlu1 %4465  ;;  %v3930_v6 = vmul.f32 %v8814_v62, %v8808_v48 }
0x144c   :  { %8376 = vmatprep.subr.bf16.mxu1 %v8375_v61  ;;  %8288 = vmatprep.mubr.msk.f32.mxu0 %vm265_vm3, %v4466_v60 }
0x144d   :  { %8378 = vmatpush3.bf16.msra.mxu1 %v8375_v61 }
0x144e   :  { %v8816_v63 = vpop.eup %8815  ;;  %8255 = vmatprep.subr.mxu1 %v7174_v18 }
0x144f   :  { %v4468_v0 = vpop.permute.xlu1 %4467  ;;  %v3929_v3 = vmul.f32 %v8816_v63, %v8810_v47 }
0x1450   :  { %8289 = vmatmul.mubr.msk.f32.vlgmr.msra.gmra.mrb[52].mxu0 %vm265_vm3, %v4468_v0 }
0x1451   :  { %8252 = vmatprep.mubr.msk.f32.mxu1 %vm349_vm5, %v3929_v3  ;;  %5121 = vmatprep.mubr.bf16.mxu0 %v8852_v20  ;;  %v7198_v3 = vld [vmem:[%s10532_s8 + $0x1] ss:$0 sm:$0xff] }
0x1452   :  { %8253 = vmatmul.mubr.msk.f32.vlgmr.msra.gmra.mrb[44].mxu1 %vm349_vm5, %v3930_v6 }
0x1453   :  { %8256 = vmatpush3.msra.mxu1 %v7174_v18 }
0x1454   :  { %8260 = vmatprep.subr.mxu1 %v7167_v31 }
0x1474   :  { %v4286_v14 = vpop.xlane.xlu0 %4285 }
0x1480   :  { %v4277_v25 = vpop.xlane.xlu1 %4276 }
0x1481   :  { %v4279_v9 = vsub.f32 %v4269_v53, %v4277_v25 }
0x1483   :  { %v4282_v10 = vmul.f32 1.442695, %v4279_v9 }
0x1484   :  { %v8495_v5 = vpop.permute.xlu1 %8494 }
0x1485   :  { %8817 = vpow2.f32 %v4282_v10  ;;  %v8497_v33 = vunpack.i.h.bf16 %v8495_v5  ;;  %v8496_v4 = vunpack.i.l.bf16 %v8495_v5 }
0x1486   :  { %8819 = vrcp.f32 %v4286_v14 }
0x1487   :  { %v8385_v41 = vpack.c.bf16 %v8497_v33, %v8496_v4 }
0x1488   :  { %v8500_v42 = vpop.permute.xlu1 %8499 }
0x1489   :  { %v8502_v45 = vunpack.i.h.bf16 %v8500_v42  ;;  %v8501_v46 = vunpack.i.l.bf16 %v8500_v42 }
0x148b   :  { %v8395_v48 = vpack.c.bf16 %v8502_v45, %v8501_v46  ;;  %v7228_v46 = vld [vmem:[%s10533_s11 + $0x1c8] sm:$0xff] }
0x148f   :  { %v8818_v11 = vpop.eup %8817 }
0x1490   :  { %v4287_v12 = vsel %vm349_vm5, %v8818_v11, 0.0 }
0x1491   :  { %4288 = vadd.xlane.f32.xlu0 %v4287_v12 }
0x151e   :  { %v4289_v27 = vpop.xlane.xlu0 %4288 }
0x151f   :  { %8821 = vrcp.f32 %v4289_v27 }
0x1523   :  { %v8290_v32 = vpop.f32.mrb[52].mxu0 }
0x1524   :  { %v4547_v34 = vpop.f32.mrb[53].mxu0  ;;  %v4553_v39 = vadd.f32 %v9802_v36, %v8290_v32 }
0x1525   :  { %v4548_v35 = vadd.f32 %v9796_v21, %v4547_v34  ;;  %v8254_v19 = vpop.f32.mrb[44].mxu1  ;;  %v8820_v21 = vpop.eup %8819 }
0x1526   :  { %v4009_v37 = vpop.f32.mrb[45].mxu1  ;;  %v4559_v56 = vsel %vm349_vm5, %v4553_v39, -inf  ;;  %v4292_v36 = vmul.f32 %v8820_v21, %v9861_v44 }
0x1527   :  { %8257 = vmatprep.mubr.msk.f32.mxu1 %vm265_vm3, %v4009_v37  ;;  %v4556_v40 = vsel %vm349_vm5, %v4548_v35, -inf  ;;  %v7211_v37 = vld [vmem:[%s10533_s11 + $0x140] sm:$0xff] }
0x1528   :  { %4557 = vmax.xlane.f32.xlu0 %v4556_v40  ;;  %8258 = vmatmul.mubr.msk.f32.vlgmr.msra.gmra.mrb[46].mxu1 %vm265_vm3, %v8254_v19 }
0x1529   :  { %8261 = vmatpush3.msra.mxu1 %v7167_v31  ;;  %8262 = vmatprep.mubr.msk.f32.mxu1 %vm265_vm3, %v9839_v28  ;;  %v8822_v57 = vpop.eup %8821 }
0x152a   :  { %8386 = vmatprep.subr.bf16.mxu1 %v8385_v41  ;;  %v4293_v28 = vmul.f32 %v8822_v57, %v8818_v11  ;;  %v7219_v57 = vld [vmem:[%s10533_s11 + $0x180] sm:$0xff] }
0x152c   :  { %4560 = vmax.xlane.f32.xlu0 %v4559_v56 }
0x1530   :  { %8263 = vmatmul.mubr.msk.f32.vlgmr.msra.gmra.mrb[46].mxu1 %vm265_vm3, %v9837_v29 }
0x1531   :  { %8388 = vmatpush3.bf16.msra.mxu1 %v8385_v41  ;;  %8276 = vmatprep.mubr.msk.f32.mxu1 %vm349_vm5, %v4292_v36  ;;  %v7212_v41 = vld [vmem:[%s10533_s11 + $0x148] sm:$0xff]  ;;  %v7227_v36 = vld [vmem:[%s10533_s11 + $0x1c0] sm:$0xff] }
0x1532   :  { %8279 = vmatprep.subr.mxu1 %v7185_v43  ;;  %v7254_v45 = vcombine.high %v7219_v57, %v7227_v36 }
0x1534   :  { %8277 = vmatmul.mubr.msk.f32.vlgmr.msra.gmra.mrb[48].mxu1 %vm349_vm5, %v4293_v28  ;;  %v7253_v28 = vcombine.low %v7219_v57, %v7227_v36  ;;  %v7209_v57 = vld [vmem:[%s10533_s11 + $0x130] sm:$0xff] }
0x1535   :  { %8280 = vmatpush3.msra.mxu1 %v7185_v43  ;;  %v7220_v43 = vld [vmem:[%s10533_s11 + $0x188] sm:$0xff]  ;;  %v7217_v36 = vld [vmem:[%s10533_s11 + $0x170] sm:$0xff] }
0x1536   :  { %8396 = vmatprep.subr.bf16.mxu1 %v8395_v48 }
0x15b5   :  { %v4558_v49 = vpop.xlane.xlu0 %4557 }
0x15b6   :  { %v4562_v47 = vsub.f32 %v4548_v35, %v4558_v49  ;;  %v7256_v49 = vcombine.high %v7220_v43, %v7228_v46 }
0x15b8   :  { %v4564_v50 = vmul.f32 1.442695, %v4562_v47  ;;  %v7205_v47 = vld [vmem:[%s10533_s11 + $0x110] sm:$0xff] }
0x15b9   :  { %v4561_v51 = vpop.xlane.xlu0 %4560 }
0x15ba   :  { %8823 = vpow2.f32 %v4564_v50  ;;  %v4563_v26 = vsub.f32 %v4553_v39, %v4561_v51  ;;  %v7204_v39 = vld [vmem:[%s10533_s11 + $0x108] sm:$0xff]  ;;  %v7213_v50 = vld [vmem:[%s10533_s11 + $0x150] sm:$0xff]  ;;  %v7206_v51 = vld [vmem:[%s10533_s11 + $0x118] sm:$0xff] }
0x15bb   :  { %v7239_v21 = vcombine.low %v7204_v39, %v7212_v41  ;;  %v7240_v42 = vcombine.high %v7204_v39, %v7212_v41  ;;  %v7224_v39 = vld [vmem:[%s10533_s11 + $0x1a8] sm:$0xff] }
0x15bc   :  { %v4566_v52 = vmul.f32 1.442695, %v4563_v26  ;;  %v7242_v26 = vcombine.high %v7205_v47, %v7213_v50 }
0x15be   :  { %8825 = vpow2.f32 %v4566_v52  ;;  %v7214_v52 = vld [vmem:[%s10533_s11 + $0x158] sm:$0xff] }
0x15c4   :  { %v8824_v44 = vpop.eup %8823 }
0x15c5   :  { %v4568_v29 = vsel %vm349_vm5, %v8824_v44, 0.0 }
0x15c6   :  { %4569 = vadd.xlane.f32.xlu0 %v4568_v29  ;;  %v7243_v29 = vcombine.low %v7206_v51, %v7214_v52 }
0x15c8   :  { %v8826_v22 = vpop.eup %8825 }
0x15c9   :  { %v4571_v53 = vsel %vm349_vm5, %v8826_v22, 0.0 }
0x15ca   :  { %4572 = vadd.xlane.f32.xlu0 %v4571_v53 }
0x1607   :  { %v8278_v55 = vpop.f32.mrb[48].mxu1 }
0x1608   :  { %v4372_v17 = vpop.f32.mrb[49].mxu1 }
0x1609   :  { %8281 = vmatprep.mubr.msk.f32.mxu1 %vm265_vm3, %v4372_v17 }
0x160a   :  { %8282 = vmatmul.mubr.msk.f32.vlgmr.msra.gmra.mrb[46].mxu1 %vm265_vm3, %v8278_v55 }
0x160b   :  { %8398 = vmatpush3.bf16.msra.mxu1 %v8395_v48  ;;  %v7255_v48 = vcombine.low %v7220_v43, %v7228_v46  ;;  %v7210_v43 = vld [vmem:[%s10533_s11 + $0x138] sm:$0xff] }
0x160c   :  { %8298 = vmatprep.subr.mxu1 %v7194_v24 }
0x1653   :  { %v4570_v13 = vpop.xlane.xlu0 %4569 }
0x1654   :  { %8827 = vrcp.f32 %v4570_v13 }
0x1657   :  { %v4573_v38 = vpop.xlane.xlu0 %4572 }
0x1658   :  { %8829 = vrcp.f32 %v4573_v38 }
0x165e   :  { %v8828_v54 = vpop.eup %8827 }
0x165f   :  { %v4576_v61 = vmul.f32 %v8828_v54, %v8824_v44  ;;  %v7241_v44 = vcombine.low %v7205_v47, %v7213_v50  ;;  %v7225_v47 = vld [vmem:[%s10533_s11 + $0x1b0] sm:$0xff] }
0x1660   :  { %v7233_v50 = vld [vmem:[%s10533_s11 + $0x1f0] sm:$0xff] }
0x1661   :  { %8295 = vmatprep.mubr.msk.f32.mxu1 %vm349_vm5, %v4576_v61 }
0x1662   :  { %v8830_v60 = vpop.eup %8829 }
0x1663   :  { %v4577_v62 = vmul.f32 %v8830_v60, %v8826_v22  ;;  %v7244_v22 = vcombine.high %v7206_v51, %v7214_v52  ;;  %v7201_v60 = vld [vmem:[%s10535_s9 + $0x1] ss:$0 sm:$0xff]  ;;  %v7226_v51 = vld [vmem:[%s10533_s11 + $0x1b8] sm:$0xff]  ;;  %v7249_v52 = vcombine.low %v7209_v57, %v7217_v36 }
0x1665   :  { %8296 = vmatmul.mubr.msk.f32.vlgmr.msra.gmra.mrb[50].mxu1 %vm349_vm5, %v4577_v62 }
0x1666   :  { %8299 = vmatpush3.msra.mxu1 %v7194_v24 }
0x1667   :  { %5132 = vmatprep.subr.bf16.mxu1 %v7240_v42 }
0x1738   :  { %v8297_v63 = vpop.f32.mrb[50].mxu1 }
0x1739   :  { %v4656_v0 = vpop.f32.mrb[51].mxu1 }
0x173a   :  { %8300 = vmatprep.mubr.msk.f32.mxu1 %vm265_vm3, %v4656_v0 }
0x173b   :  { %8301 = vmatmul.mubr.msk.f32.vlgmr.msra.gmra.mrb[46].mxu1 %vm265_vm3, %v8297_v63 }
0x173c   :  { %5164 = vmatprep.mubr.bf16.mxu1 %v8852_v20  ;;  %5133 = vmatpush1.bf16.msra.mxu1 %v7239_v21 }
0x173d   :  { %5134 = vmatprep.subr.bf16.mxu1 %v7256_v49 }
0x1740   :  { %5135 = vmatpush1.bf16.msra.mxu1 %v7255_v48  ;;  %v7250_v48 = vcombine.high %v7209_v57, %v7217_v36 }
0x1741   :  { %5218 = vmatprep.subr.bf16.mxu1 %v7244_v22 }
0x180e   :  { %v8302_v6 = vpop.f32.mrb[46].mxu1 }
0x180f   :  { %v4758_v25 = vadd.f32 %v8302_v6, %v7198_v3  ;;  %v4738_v9 = vpop.f32.mrb[47].mxu1 }
0x1810   :  { %v4757_v10 = vadd.f32 %v7198_v3, %v4738_v9  ;;  %v7202_v3 = vld [vmem:[%s10536_s10 + $0x1] ss:$0 sm:$0xff]  ;;  %v7229_v9 = vld [vmem:[%s10533_s11 + $0x1d0] sm:$0xff] }
0x1811   :  { %v4760_v11 = vadd.f32 %v4758_v25, %v9768_v30  ;;  %v7221_v25 = vld [vmem:[%s10533_s11 + $0x190] sm:$0xff] }
0x1812   :  { %v4759_v12 = vadd.f32 %v4757_v10, %v9764_v23  ;;  %v7203_v23 = vld [vmem:[%s10533_s11 + $0x100] sm:$0xff]  ;;  %v7222_v10 = vld [vmem:[%s10533_s11 + $0x198] sm:$0xff] }
0x1813   :  { %v4768_v18 = vsel %vm177_vm2, %v4760_v11, 0.0  ;;  %v7238_v40 = vcombine.high %v7203_v23, %v7211_v37  ;;  %v7237_v56 = vcombine.low %v7203_v23, %v7211_v37  ;;  %v7223_v23 = vld [vmem:[%s10533_s11 + $0x1a0] sm:$0xff] }
0x1814   :  { %4769 = vadd.xlane.f32.xlu1 %v4768_v18  ;;  %v4765_v31 = vsel %vm177_vm2, %v4759_v12, 0.0  ;;  %v7231_v37 = vld [vmem:[%s10533_s11 + $0x1e0] sm:$0xff] }
0x1815   :  { %4766 = vadd.xlane.f32.xlu0 %v4765_v31  ;;  %5089 = vmatprep.subr.bf16.mxu0 %v7238_v40  ;;  %v7232_v40 = vld [vmem:[%s10533_s11 + $0x1e8] sm:$0xff]  ;;  %v7262_v21 = vcombine.high %v7223_v23, %v7231_v37  ;;  %v7261_v46 = vcombine.low %v7223_v23, %v7231_v37  ;;  %v8659_v23 = vld [vmem:[%s10534_s13 + $0x478] sm:$0xff]  }
0x1816   :  { %5090 = vmatpush1.bf16.msra.mxu0 %v7237_v56  ;;  %v7264_v42 = vcombine.high %v7224_v39, %v7232_v40  ;;  %v8660_v37 = vld [vmem:[%s10534_s13 + $0x4f8] sm:$0xff]  }
0x1817   :  { %5091 = vmatprep.subr.bf16.mxu0 %v7254_v45  ;;  %v7218_v45 = vld [vmem:[%s10533_s11 + $0x178] sm:$0xff] }
0x1818   :  { %v7252_v49 = vcombine.high %v7210_v43, %v7218_v45 }
0x181a   :  { %5092 = vmatpush1.bf16.msra.mxu0 %v7253_v28  ;;  %v7263_v28 = vcombine.low %v7224_v39, %v7232_v40  ;;  %v8661_v39 = vld [vmem:[%s10534_s13 + $0x438] sm:$0xff]  }
0x181b   :  { %5175 = vmatprep.subr.bf16.mxu0 %v7242_v26  ;;  %v7234_v26 = vld [vmem:[%s10533_s11 + $0x1f8] sm:$0xff] }
0x181c   :  { %v7268_v22 = vcombine.high %v7226_v51, %v7234_v26  ;;  %v8662_v40 = vld [vmem:[%s10534_s13 + $0x4b8] sm:$0xff]  }
0x18a1   :  { %v4770_v14 = vpop.xlane.xlu1 %4769 }
0x18a2   :  { %v4772_v5 = vmul.f32 0.03125, %v4770_v14  ;;  %v4767_v27 = vpop.xlane.xlu0 %4766  ;;  %v7258_v14 = vcombine.high %v7221_v25, %v7229_v9 }
0x18a3   :  { %v4771_v32 = vmul.f32 0.03125, %v4767_v27  ;;  %v7207_v27 = vld [vmem:[%s10533_s11 + $0x120] sm:$0xff] }
0x18a4   :  { %v4774_v33 = vsub.f32 %v4760_v11, %v4772_v5  ;;  %v7230_v11 = vld [vmem:[%s10533_s11 + $0x1d8] sm:$0xff] }
0x18a5   :  { %v4773_v4 = vsub.f32 %v4759_v12, %v4771_v32  ;;  %v7260_v5 = vcombine.high %v7222_v10, %v7230_v11  ;;  %v7215_v32 = vld [vmem:[%s10533_s11 + $0x160] sm:$0xff] }
0x18a6   :  { %v4776_v19 = vmul.f32 %v4774_v33, %v4774_v33  ;;  %v7245_v41 = vcombine.low %v7207_v27, %v7215_v32 }
0x18a7   :  { %v4775_v34 = vmul.f32 %v4773_v4, %v4773_v4 }
0x18a8   :  { %v4780_v30 = vsel %vm177_vm2, %v4776_v19, 0.0  ;;  %v7246_v19 = vcombine.high %v7207_v27, %v7215_v32  ;;  %v8651_v27 = vld [vmem:[%s10534_s13 + $0x468] sm:$0xff]  }
0x18a9   :  { %v4777_v35 = vsel %vm177_vm2, %v4775_v34, 0.0  ;;  %v7257_v34 = vcombine.low %v7221_v25, %v7229_v9  ;;  %v8644_v25 = vld [vmem:[%s10534_s13 + $0x4d8] sm:$0xff]   ;;  %v8652_v32 = vld [vmem:[%s10534_s13 + $0x4e8] sm:$0xff]  }
0x18aa   :  { %4778 = vadd.xlane.f32.xlu0 %v4777_v35  ;;  %v7259_v35 = vcombine.low %v7222_v10, %v7230_v11  ;;  %v8645_v9 = vld [vmem:[%s10534_s13 + $0x418] sm:$0xff]   ;;  %v8647_v11 = vld [vmem:[%s10534_s13 + $0x460] sm:$0xff]  }
0x18ab   :  { %v8646_v10 = vld [vmem:[%s10534_s13 + $0x498] sm:$0xff]  }
0x18ae   :  { %4781 = vadd.xlane.f32.xlu0 %v4780_v30 }
0x1937   :  { %v4779_v53 = vpop.xlane.xlu0 %4778 }
0x1938   :  { %v4783_v55 = vmul.f32 0.03125, %v4779_v53  ;;  %v7265_v53 = vcombine.low %v7225_v47, %v7233_v50 }
0x193a   :  { %v4785_v17 = vadd.f32 1e-05, %v4783_v55  ;;  %v7267_v55 = vcombine.low %v7226_v51, %v7234_v26 }
0x193b   :  { %v4782_v24 = vpop.xlane.xlu0 %4781 }
0x193c   :  { %8831 = vrsqrt.f32 %v4785_v17  ;;  %v4784_v13 = vmul.f32 0.03125, %v4782_v24  ;;  %v8631_v17 = vld [vmem:[%s10534_s13 + $0x440] sm:$0xff]  }
0x193d   :  { %v8632_v24 = vld [vmem:[%s10534_s13 + $0x4c0] sm:$0xff]  }
0x193e   :  { %v4786_v38 = vadd.f32 1e-05, %v4784_v13  ;;  %v8633_v13 = vld [vmem:[%s10534_s13 + $0x400] sm:$0xff]  }
0x1940   :  { %8833 = vrsqrt.f32 %v4786_v38  ;;  %v8634_v38 = vld [vmem:[%s10534_s13 + $0x480] sm:$0xff]  }
0x1946   :  { %v8832_v54 = vpop.eup %8831 }
0x1947   :  { %v4789_v61 = vmul.f32 %v8832_v54, %v4773_v4  ;;  %v7216_v4 = vld [vmem:[%s10533_s11 + $0x168] sm:$0xff] }
0x1948   :  { %v8635_v54 = vld [vmem:[%s10534_s13 + $0x448] sm:$0xff]  }
0x1949   :  { %v4797_v63 = vmul.f32 %v7201_v60, %v4789_v61  ;;  %v8637_v61 = vld [vmem:[%s10534_s13 + $0x408] sm:$0xff]  }
0x194a   :  { %v8834_v62 = vpop.eup %8833 }
0x194b   :  { %v4790_v0 = vmul.f32 %v8834_v62, %v4774_v33  ;;  %v9974_v12 = vadd.f32 %v7202_v3, %v4797_v63  ;;  %v7208_v33 = vld [vmem:[%s10533_s11 + $0x128] sm:$0xff]  ;;  %v8639_v62 = vld [vmem:[%s10534_s13 + $0x450] sm:$0xff]  }
0x194c   :  { %v7248_v30 = vcombine.high %v7208_v33, %v7216_v4  ;;  %v7247_v56 = vcombine.low %v7208_v33, %v7216_v4  ;;  %v8640_v63 = vld [vmem:[%s10534_s13 + $0x4d0] sm:$0xff]   ;;  %v8653_v33 = vld [vmem:[%s10534_s13 + $0x428] sm:$0xff]  }
0x194d   :  { %v4798_v6 = vmul.f32 %v7201_v60, %v4790_v0  ;;  %v8638_v60 = vld [vmem:[%s10534_s13 + $0x488] sm:$0xff]   ;;  %v8641_v0 = vld [vmem:[%s10534_s13 + $0x410] sm:$0xff]  }
0x194e   :  { %v8654_v4 = vld [vmem:[%s10534_s13 + $0x4a8] sm:$0xff]  }
0x194f   :  { %v9976_v18 = vadd.f32 %v7202_v3, %v4798_v6  ;;  %v8642_v3 = vld [vmem:[%s10534_s13 + $0x490] sm:$0xff]   ;;  %v8643_v6 = vld [vmem:[%s10534_s13 + $0x458] sm:$0xff]  }
0x1951   :  { %v9980_v31 = vpack.c.bf16 %v9976_v18, %v9974_v12 }
0x1953   :  { %7269 = vmatmul.mubr.msk.bf16.vlgmr.msra.gmra.mrb[56].mxu0 %vm177_vm2, %v9980_v31  ;;  %7270 = vmatmul.mubr.msk.bf16.vlgmr.msra.gmra.mrb[52].mxu1 %vm177_vm2, %v9980_v31 }
0x1954   :  { %5176 = vmatpush1.bf16.msra.mxu0 %v7241_v44  ;;  %5219 = vmatpush1.bf16.msra.mxu1 %v7243_v29  ;;  %v7251_v44 = vcombine.low %v7210_v43, %v7218_v45  ;;  %v7266_v29 = vcombine.high %v7225_v47, %v7233_v50 }
0x1955   :  { %5177 = vmatprep.subr.bf16.mxu0 %v7258_v14  ;;  %5220 = vmatprep.subr.bf16.mxu1 %v7260_v5  ;;  %v8649_v14 = vld [vmem:[%s10534_s13 + $0x420] sm:$0xff]  }
0x1956   :  { %5207 = vmatprep.mubr.bf16.mxu0 %v8852_v20  ;;  %5250 = vmatprep.mubr.bf16.mxu1 %v8852_v20  ;;  %v8650_v5 = vld [vmem:[%s10534_s13 + $0x4a0] sm:$0xff]  }
0x1958   :  { %5178 = vmatpush1.bf16.msra.mxu0 %v7257_v34  ;;  %5221 = vmatpush1.bf16.msra.mxu1 %v7259_v35  ;;  %v8655_v34 = vld [vmem:[%s10534_s13 + $0x470] sm:$0xff]  }
0x1959   :  { %5261 = vmatprep.subr.bf16.mxu0 %v7246_v19  ;;  %5304 = vmatprep.subr.bf16.mxu1 %v7248_v30  ;;  %v8656_v35 = vld [vmem:[%s10534_s13 + $0x4f0] sm:$0xff]  }
0x195a   :  { %v8657_v19 = vld [vmem:[%s10534_s13 + $0x430] sm:$0xff]  }
0x195b   :  { %7271 = vmatmul.mubr.msk.bf16.vlgmr.msra.gmra.mrb[60].mxu0 %vm177_vm2, %v9980_v31  ;;  %7272 = vmatmul.mubr.msk.bf16.vlgmr.msra.gmra.mrb[56].mxu1 %vm177_vm2, %v9980_v31  ;;  %v8658_v30 = vld [vmem:[%s10534_s13 + $0x4b0] sm:$0xff]  }
0x195c   :  { %5262 = vmatpush1.bf16.msra.mxu0 %v7245_v41  ;;  %5305 = vmatpush1.bf16.msra.mxu1 %v7247_v56  ;;  %v8663_v41 = vld [vmem:[%s10534_s13 + $0x540] sm:$0xff]  }
0x195d   :  { %5263 = vmatprep.subr.bf16.mxu0 %v7262_v21  ;;  %5306 = vmatprep.subr.bf16.mxu1 %v7264_v42  ;;  %v8664_v56 = vld [vmem:[%s10534_s13 + $0x5c0] sm:$0xff]   ;;  %v7235_v21 = vld [vmem:[%s10537_s12 + $0x10] sm:$0xff] }
0x195e   :  { %5293 = vmatprep.mubr.bf16.mxu0 %v8852_v20  ;;  %5336 = vmatprep.mubr.bf16.mxu1 %v8852_v20  ;;  %v4849_v42 = vrot.slane %v7235_v21, %v9377_v58  ;;  %v4857_v57 = vrot.slane %v7235_v21, %v9379_v59  ;;  %v4853_v36 = vrot.slane %v7235_v21, %v9384_v16 }
0x195f   :  { %v4861_v43 = vrot.slane %v7235_v21, %v9386_v15 }
0x1960   :  { %5264 = vmatpush1.bf16.msra.mxu0 %v7261_v46  ;;  %5307 = vmatpush1.bf16.msra.mxu1 %v7263_v28 }
0x1961   :  { %5347 = vmatprep.subr.bf16.mxu0 %v7250_v48  ;;  %5390 = vmatprep.subr.bf16.mxu1 %v7252_v49 }
0x1963   :  { %7273 = vmatmul.mubr.msk.bf16.vlgmr.msra.gmra.mrb[64].mxu0 %vm177_vm2, %v9980_v31  ;;  %7274 = vmatmul.mubr.msk.bf16.vlgmr.msra.gmra.mrb[60].mxu1 %vm177_vm2, %v9980_v31 }
0x1964   :  { %5348 = vmatpush1.bf16.msra.mxu0 %v7249_v52  ;;  %5391 = vmatpush1.bf16.msra.mxu1 %v7251_v44 }
0x1965   :  { %5349 = vmatprep.subr.bf16.mxu0 %v7266_v29  ;;  %5392 = vmatprep.subr.bf16.mxu1 %v7268_v22 }
0x1966   :  { %5379 = vmatprep.mubr.bf16.mxu0 %v8852_v20  ;;  %5422 = vmatprep.mubr.bf16.mxu1 %v8852_v20  ;;  %v8636_v20 = vld [vmem:[%s10534_s13 + $0x4c8] sm:$0xff]  }
0x1968   :  { %5350 = vmatpush1.bf16.msra.mxu0 %v7265_v53  ;;  %5393 = vmatpush1.bf16.msra.mxu1 %v7267_v55  ;;  %v4865_v55 = vrot.slane %v7235_v21, %v9392_v1 }
0x1969   :  { %7948 = vmatprep.subr.bf16.mxu0 %v8631_v17  ;;  %7970 = vmatprep.subr.bf16.mxu1 %v8632_v24  ;;  %v4873_v17 = vrot.slane %v7235_v21, %v9394_v2 }
0x196b   :  { %7275 = vmatmul.mubr.msk.bf16.vlgmr.msra.gmra.mrb[68].mxu0 %vm177_vm2, %v9980_v31  ;;  %7276 = vmatmul.mubr.msk.bf16.vlgmr.msra.gmra.mrb[64].mxu1 %vm177_vm2, %v9980_v31  ;;  %v8648_v31 = vld [vmem:[%s10534_s13 + $0x4e0] sm:$0xff]  }
0x196c   :  { %7949 = vmatpush3.bf16.msra.mxu0 %v8633_v13  ;;  %7971 = vmatpush3.bf16.msra.mxu1 %v8634_v38  ;;  %v4869_v38 = vrot.slane %v7235_v21, %v9396_v7 }
0x196d   :  { %7950 = vmatprep.subr.bf16.mxu0 %v8635_v54  ;;  %7972 = vmatprep.subr.bf16.mxu1 %v8636_v20  ;;  %v4877_v54 = vrot.slane %v7235_v21, %v9398_v8 }
0x1970   :  { %7951 = vmatpush3.bf16.msra.mxu0 %v8637_v61  ;;  %7973 = vmatpush3.bf16.msra.mxu1 %v8638_v60 }
0x1971   :  { %7952 = vmatprep.subr.bf16.mxu0 %v8639_v62  ;;  %7974 = vmatprep.subr.bf16.mxu1 %v8640_v63 }
0x1974   :  { %7953 = vmatpush3.bf16.msra.mxu0 %v8641_v0  ;;  %7975 = vmatpush3.bf16.msra.mxu1 %v8642_v3 }
0x1975   :  { %7954 = vmatprep.subr.bf16.mxu0 %v8643_v6  ;;  %7976 = vmatprep.subr.bf16.mxu1 %v8644_v25  ;;  %v10168_v25 = vld [vmem:[%s10537_s12 + $0x18] sm:$0xff] }
0x1978   :  { %7955 = vmatpush3.bf16.msra.mxu0 %v8645_v9  ;;  %7977 = vmatpush3.bf16.msra.mxu1 %v8646_v10 }
0x1979   :  { %7956 = vmatprep.subr.bf16.mxu0 %v8647_v11  ;;  %7978 = vmatprep.subr.bf16.mxu1 %v8648_v31 }
0x197c   :  { %7957 = vmatpush3.bf16.msra.mxu0 %v8649_v14  ;;  %7979 = vmatpush3.bf16.msra.mxu1 %v8650_v5 }
0x197d   :  { %7958 = vmatprep.subr.bf16.mxu0 %v8651_v27  ;;  %7980 = vmatprep.subr.bf16.mxu1 %v8652_v32  ;;  %v8665_v27 = vld [vmem:[%s10534_s13 + $0x500] sm:$0xff]  }
0x197e   :  { %v8666_v32 = vld [vmem:[%s10534_s13 + $0x580] sm:$0xff]  }
0x1980   :  { %7959 = vmatpush3.bf16.msra.mxu0 %v8653_v33  ;;  %7981 = vmatpush3.bf16.msra.mxu1 %v8654_v4 }
0x1981   :  { %7960 = vmatprep.subr.bf16.mxu0 %v8655_v34  ;;  %7982 = vmatprep.subr.bf16.mxu1 %v8656_v35 }
0x1984   :  { %7961 = vmatpush3.bf16.msra.mxu0 %v8657_v19  ;;  %7983 = vmatpush3.bf16.msra.mxu1 %v8658_v30  ;;  %v8667_v19 = vld [vmem:[%s10534_s13 + $0x548] sm:$0xff]  }
0x1985   :  { %7962 = vmatprep.subr.bf16.mxu0 %v8659_v23  ;;  %7984 = vmatprep.subr.bf16.mxu1 %v8660_v37  ;;  %v8668_v30 = vld [vmem:[%s10534_s13 + $0x5c8] sm:$0xff]   ;;  %v4881_v23 = vrot.slane %v10168_v25, %v9377_v58 }
0x1988   :  { %7963 = vmatpush3.bf16.msra.mxu0 %v8661_v39  ;;  %7985 = vmatpush3.bf16.msra.mxu1 %v8662_v40 }
0x1989   :  { %7992 = vmatprep.subr.bf16.mxu0 %v8663_v41  ;;  %8014 = vmatprep.subr.bf16.mxu1 %v8664_v56  ;;  %v4889_v56 = vrot.slane %v10168_v25, %v9379_v59  ;;  %v8670_v59 = vld [vmem:[%s10534_s13 + $0x588] sm:$0xff]  }
0x1a26   :  { %v5123_v45 = vpop.f32.mrb[56].mxu0  ;;  %v5166_v46 = vpop.f32.mrb[52].mxu1 }
0x1a27   :  { %v5124_v28 = vadd.f32 %v5123_v45, %v4849_v42  ;;  %v5167_v48 = vadd.f32 %v5166_v46, %v4857_v57  ;;  %v5125_v49 = vpop.f32.mrb[57].mxu0  ;;  %v5168_v47 = vpop.f32.mrb[53].mxu1  ;;  %v8669_v46 = vld [vmem:[%s10534_s13 + $0x508] sm:$0xff]  }
0x1a28   :  { %v5126_v50 = vadd.f32 %v5125_v49, %v4853_v36  ;;  %v5169_v51 = vadd.f32 %v5168_v47, %v4861_v43  ;;  %v5127_v26 = vpop.f32.mrb[58].mxu0  ;;  %v5170_v52 = vpop.f32.mrb[54].mxu1 }
0x1a29   :  { %v5128_v44 = vadd.f32 %v5127_v26, %v4849_v42  ;;  %v5171_v29 = vadd.f32 %v5170_v52, %v4857_v57  ;;  %v5129_v22 = vpop.f32.mrb[59].mxu0  ;;  %v5172_v53 = vpop.f32.mrb[55].mxu1  ;;  %v5433_v20 = vmax.f32 %v5124_v28, 0.0  ;;  %v5435_v61 = vmax.f32 %v5167_v48, 0.0 }
0x1a2a   :  { %v5130_v24 = vadd.f32 %v5129_v22, %v4853_v36  ;;  %v5173_v13 = vadd.f32 %v5172_v53, %v4861_v43  ;;  %v5434_v63 = vmax.f32 %v5126_v50, 0.0  ;;  %v5436_v0 = vmax.f32 %v5169_v51, 0.0  ;;  %v8672_v51 = vld [vmem:[%s10534_s13 + $0x5d0] sm:$0xff]  }
0x1a2b   :  { %v5449_v60 = vmax.f32 %v5128_v44, 0.0  ;;  %v5451_v62 = vmax.f32 %v5171_v29, 0.0  ;;  %v4885_v43 = vrot.slane %v10168_v25, %v9384_v16  ;;  %v4893_v28 = vrot.slane %v10168_v25, %v9386_v15  ;;  %v8671_v16 = vld [vmem:[%s10534_s13 + $0x550] sm:$0xff]  }
0x1a2c   :  { %v5450_v3 = vmax.f32 %v5130_v24, 0.0  ;;  %v5452_v6 = vmax.f32 %v5173_v13, 0.0  ;;  %v8673_v13 = vld [vmem:[%s10534_s13 + $0x510] sm:$0xff]  }
0x1a2d   :  { %v5465_v9 = vpack.c.bf16 %v5449_v60, %v5433_v20  ;;  %v5467_v10 = vpack.c.bf16 %v5451_v62, %v5435_v61  ;;  %v8675_v62 = vld [vmem:[%s10534_s13 + $0x558] sm:$0xff]  }
0x1a2e   :  { %v5466_v11 = vpack.c.bf16 %v5450_v3, %v5434_v63  ;;  %v5468_v31 = vpack.c.bf16 %v5452_v6, %v5436_v0  ;;  %v5209_v14 = vpop.f32.mrb[60].mxu0  ;;  %v5252_v5 = vpop.f32.mrb[56].mxu1  ;;  %v8676_v63 = vld [vmem:[%s10534_s13 + $0x5d8] sm:$0xff]  }
0x1a2f   :  { %v5210_v33 = vadd.f32 %v5209_v14, %v4865_v55  ;;  %v5253_v4 = vadd.f32 %v5252_v5, %v4873_v17  ;;  %v5211_v34 = vpop.f32.mrb[61].mxu0  ;;  %v5254_v35 = vpop.f32.mrb[57].mxu1 }
0x1a30   :  { %v5212_v37 = vadd.f32 %v5211_v34, %v4869_v38  ;;  %v5255_v39 = vadd.f32 %v5254_v35, %v4877_v54  ;;  %v5213_v40 = vpop.f32.mrb[62].mxu0  ;;  %v5256_v41 = vpop.f32.mrb[58].mxu1  ;;  %6546 = vmatprep.mubr.bf16.mxu0 %v5466_v11  ;;  %6587 = vmatprep.mubr.bf16.mxu1 %v5468_v31  ;;  %v8677_v34 = vld [vmem:[%s10534_s13 + $0x518] sm:$0xff]   ;;  %v4909_v35 = vrot.slane %v10168_v25, %v9398_v8 }
0x1a31   :  { %v5214_v21 = vadd.f32 %v5213_v40, %v4865_v55  ;;  %v5257_v42 = vadd.f32 %v5256_v41, %v4873_v17  ;;  %v5215_v57 = vpop.f32.mrb[63].mxu0  ;;  %v5258_v36 = vpop.f32.mrb[59].mxu1  ;;  %6547 = vmatmul.mubr.bf16.vlgmr.msra.gmra.mrb[72].mxu0 %v5465_v9  ;;  %6588 = vmatmul.mubr.bf16.vlgmr.msra.gmra.mrb[68].mxu1 %v5467_v10  ;;  %v5437_v48 = vmax.f32 %v5210_v33, 0.0  ;;  %v5439_v49 = vmax.f32 %v5253_v4, 0.0 }
0x1a32   :  { %v5216_v45 = vadd.f32 %v5215_v57, %v4869_v38  ;;  %v5259_v58 = vadd.f32 %v5258_v36, %v4877_v54  ;;  %7993 = vmatpush3.bf16.msra.mxu0 %v8665_v27  ;;  %8015 = vmatpush3.bf16.msra.mxu1 %v8666_v32  ;;  %v5438_v26 = vmax.f32 %v5212_v37, 0.0  ;;  %v5440_v52 = vmax.f32 %v5255_v39, 0.0  ;;  %v8674_v38 = vld [vmem:[%s10534_s13 + $0x590] sm:$0xff]   ;;  %v8680_v37 = vld [vmem:[%s10534_s13 + $0x5e0] sm:$0xff]  }
0x1a33   :  { %v5453_v47 = vmax.f32 %v5214_v21, 0.0  ;;  %v5455_v50 = vmax.f32 %v5257_v42, 0.0  ;;  %7994 = vmatprep.subr.bf16.mxu0 %v8667_v19  ;;  %8016 = vmatprep.subr.bf16.mxu1 %v8668_v30  ;;  %v4897_v10 = vrot.slane %v10168_v25, %v9392_v1  ;;  %v4905_v27 = vrot.slane %v10168_v25, %v9394_v2  ;;  %v8678_v1 = vld [vmem:[%s10534_s13 + $0x598] sm:$0xff]  }
0x1a34   :  { %v5454_v44 = vmax.f32 %v5216_v45, 0.0  ;;  %v5456_v29 = vmax.f32 %v5259_v58, 0.0  ;;  %v4901_v32 = vrot.slane %v10168_v25, %v9396_v7  ;;  %v8679_v7 = vld [vmem:[%s10534_s13 + $0x560] sm:$0xff]  }
0x1a35   :  { %v10202_v22 = vpack.c.bf16 %v5453_v47, %v5437_v48  ;;  %v10204_v15 = vpack.c.bf16 %v5455_v50, %v5439_v49  ;;  %v8682_v45 = vld [vmem:[%s10534_s13 + $0x5a0] sm:$0xff]   ;;  %v8683_v48 = vld [vmem:[%s10534_s13 + $0x568] sm:$0xff]  }
0x1a36   :  { %v5470_v53 = vpack.c.bf16 %v5454_v44, %v5438_v26  ;;  %v5472_v55 = vpack.c.bf16 %v5456_v29, %v5440_v52  ;;  %7995 = vmatpush3.bf16.msra.mxu0 %v8669_v46  ;;  %8017 = vmatpush3.bf16.msra.mxu1 %v8670_v59  ;;  %v5295_v17 = vpop.f32.mrb[64].mxu0  ;;  %v5338_v24 = vpop.f32.mrb[60].mxu1  ;;  %v8684_v49 = vld [vmem:[%s10534_s13 + $0x5e8] sm:$0xff]  }
0x1a37   :  { %v5296_v54 = vadd.f32 %v5295_v17, %v4881_v23  ;;  %v5339_v20 = vadd.f32 %v5338_v24, %v4889_v56  ;;  %v5297_v61 = vpop.f32.mrb[65].mxu0  ;;  %v5340_v60 = vpop.f32.mrb[61].mxu1  ;;  %7996 = vmatprep.subr.bf16.mxu0 %v8671_v16  ;;  %8018 = vmatprep.subr.bf16.mxu1 %v8672_v51  ;;  %v8685_v17 = vld [vmem:[%s10534_s13 + $0x528] sm:$0xff]  }
0x1a38   :  { %v5298_v0 = vadd.f32 %v5297_v61, %v4885_v43  ;;  %v5341_v3 = vadd.f32 %v5340_v60, %v4893_v28  ;;  %v5299_v6 = vpop.f32.mrb[66].mxu0  ;;  %v5342_v9 = vpop.f32.mrb[62].mxu1  ;;  %6628 = vmatprep.mubr.bf16.mxu0 %v5470_v53  ;;  %6669 = vmatprep.mubr.bf16.mxu1 %v5472_v55  ;;  %v8686_v24 = vld [vmem:[%s10534_s13 + $0x5a8] sm:$0xff]   ;;  %v8687_v61 = vld [vmem:[%s10534_s13 + $0x570] sm:$0xff]  }
0x1a39   :  { %v5300_v11 = vadd.f32 %v5299_v6, %v4881_v23  ;;  %v5343_v31 = vadd.f32 %v5342_v9, %v4889_v56  ;;  %v5301_v14 = vpop.f32.mrb[67].mxu0  ;;  %v5344_v5 = vpop.f32.mrb[63].mxu1  ;;  %v5441_v19 = vmax.f32 %v5296_v54, 0.0  ;;  %v5443_v2 = vmax.f32 %v5339_v20, 0.0  ;;  %v8688_v60 = vld [vmem:[%s10534_s13 + $0x5f0] sm:$0xff]  }
0x1a3a   :  { %v5302_v33 = vadd.f32 %v5301_v14, %v4885_v43  ;;  %v5345_v4 = vadd.f32 %v5344_v5, %v4893_v28  ;;  %7997 = vmatpush3.bf16.msra.mxu0 %v8673_v13  ;;  %8019 = vmatpush3.bf16.msra.mxu1 %v8674_v38  ;;  %v5442_v39 = vmax.f32 %v5298_v0, 0.0  ;;  %v5444_v40 = vmax.f32 %v5341_v3, 0.0  ;;  %v8681_v43 = vld [vmem:[%s10534_s13 + $0x520] sm:$0xff]   ;;  %v8690_v14 = vld [vmem:[%s10534_s13 + $0x5b0] sm:$0xff]   ;;  %v8691_v5 = vld [vmem:[%s10534_s13 + $0x578] sm:$0xff]  }
0x1a3b   :  { %v5457_v30 = vmax.f32 %v5300_v11, 0.0  ;;  %v5459_v23 = vmax.f32 %v5343_v31, 0.0  ;;  %7998 = vmatprep.subr.bf16.mxu0 %v8675_v62  ;;  %8020 = vmatprep.subr.bf16.mxu1 %v8676_v63  ;;  %v8689_v31 = vld [vmem:[%s10534_s13 + $0x530] sm:$0xff]  }
0x1a3c   :  { %v5458_v41 = vmax.f32 %v5302_v33, 0.0  ;;  %v5460_v56 = vmax.f32 %v5345_v4, 0.0  ;;  %v8694_v33 = vld [vmem:[%s10534_s13 + $0x5b8] sm:$0xff]   ;;  %v8695_v4 = vld [vmem:[%s10534_s13 + $0x640] sm:$0xff]  }
0x1a3d   :  { %v10238_v21 = vpack.c.bf16 %v5457_v30, %v5441_v19  ;;  %v10240_v8 = vpack.c.bf16 %v5459_v23, %v5443_v2  ;;  %v8699_v19 = vld [vmem:[%s10534_s13 + $0x648] sm:$0xff]  }
0x1a3e   :  { %v10242_v25 = vpack.c.bf16 %v5458_v41, %v5442_v39  ;;  %v10244_v42 = vpack.c.bf16 %v5460_v56, %v5444_v40  ;;  %7999 = vmatpush3.bf16.msra.mxu0 %v8677_v34  ;;  %8021 = vmatpush3.bf16.msra.mxu1 %v8678_v1  ;;  %v5381_v57 = vpop.f32.mrb[68].mxu0  ;;  %v5424_v36 = vpop.f32.mrb[64].mxu1  ;;  %v8696_v34 = vld [vmem:[%s10534_s13 + $0x6c0] sm:$0xff]   ;;  %v8700_v2 = vld [vmem:[%s10534_s13 + $0x6c8] sm:$0xff]   ;;  %v8707_v39 = vld [vmem:[%s10534_s13 + $0x658] sm:$0xff]  }
0x1a3f   :  { %v5382_v58 = vadd.f32 %v5381_v57, %v4897_v10  ;;  %v5425_v46 = vadd.f32 %v5424_v36, %v4905_v27  ;;  %v5383_v59 = vpop.f32.mrb[69].mxu0  ;;  %v5426_v28 = vpop.f32.mrb[65].mxu1  ;;  %8000 = vmatprep.subr.bf16.mxu0 %v8679_v7  ;;  %8022 = vmatprep.subr.bf16.mxu1 %v8680_v37  ;;  %v8697_v1 = vld [vmem:[%s10534_s13 + $0x600] sm:$0xff]   ;;  %v8701_v30 = vld [vmem:[%s10534_s13 + $0x608] sm:$0xff]   ;;  %v8705_v7 = vld [vmem:[%s10534_s13 + $0x610] sm:$0xff]  }
0x1a40   :  { %v5384_v47 = vadd.f32 %v5383_v59, %v4901_v32  ;;  %v5427_v50 = vadd.f32 %v5426_v28, %v4909_v35  ;;  %v5385_v16 = vpop.f32.mrb[70].mxu0  ;;  %v5428_v51 = vpop.f32.mrb[66].mxu1  ;;  %v8702_v23 = vld [vmem:[%s10534_s13 + $0x688] sm:$0xff]   ;;  %v8706_v37 = vld [vmem:[%s10534_s13 + $0x690] sm:$0xff]   ;;  %v8708_v40 = vld [vmem:[%s10534_s13 + $0x6d8] sm:$0xff]  }
0x1a41   :  { %v5386_v26 = vadd.f32 %v5385_v16, %v4897_v10  ;;  %v5429_v52 = vadd.f32 %v5428_v51, %v4905_v27  ;;  %v5387_v44 = vpop.f32.mrb[71].mxu0  ;;  %v5430_v29 = vpop.f32.mrb[67].mxu1  ;;  %v5445_v13 = vmax.f32 %v5382_v58, 0.0  ;;  %v5447_v38 = vmax.f32 %v5425_v46, 0.0  ;;  %v8692_v27 = vld [vmem:[%s10534_s13 + $0x5f8] sm:$0xff]   ;;  %v8713_v57 = vld [vmem:[%s10534_s13 + $0x620] sm:$0xff]  }
0x1a42   :  { %v5388_v53 = vadd.f32 %v5387_v44, %v4901_v32  ;;  %v5431_v55 = vadd.f32 %v5430_v29, %v4909_v35  ;;  %8001 = vmatpush3.bf16.msra.mxu0 %v8681_v43  ;;  %8023 = vmatpush3.bf16.msra.mxu1 %v8682_v45  ;;  %v5446_v62 = vmax.f32 %v5384_v47, 0.0  ;;  %v5448_v63 = vmax.f32 %v5427_v50, 0.0  ;;  %v8693_v32 = vld [vmem:[%s10534_s13 + $0x538] sm:$0xff]   ;;  %v8698_v35 = vld [vmem:[%s10534_s13 + $0x680] sm:$0xff]   ;;  %v8715_v43 = vld [vmem:[%s10534_s13 + $0x668] sm:$0xff]  }
0x1a43   :  { %v5461_v54 = vmax.f32 %v5386_v26, 0.0  ;;  %v5463_v20 = vmax.f32 %v5429_v52, 0.0  ;;  %8002 = vmatprep.subr.bf16.mxu0 %v8683_v48  ;;  %8024 = vmatprep.subr.bf16.mxu1 %v8684_v49  ;;  %v8709_v41 = vld [vmem:[%s10534_s13 + $0x618] sm:$0xff]   ;;  %v8714_v36 = vld [vmem:[%s10534_s13 + $0x6a0] sm:$0xff]   ;;  %v8716_v45 = vld [vmem:[%s10534_s13 + $0x6e8] sm:$0xff]  }
0x1a44   :  { %v5462_v0 = vmax.f32 %v5388_v53, 0.0  ;;  %v5464_v3 = vmax.f32 %v5431_v55, 0.0  ;;  %v8710_v56 = vld [vmem:[%s10534_s13 + $0x698] sm:$0xff]   ;;  %v8717_v58 = vld [vmem:[%s10534_s13 + $0x628] sm:$0xff]   ;;  %v8719_v59 = vld [vmem:[%s10534_s13 + $0x670] sm:$0xff]  }
0x1a45   :  { %v10270_v6 = vpack.c.bf16 %v5461_v54, %v5445_v13  ;;  %v10272_v9 = vpack.c.bf16 %v5463_v20, %v5447_v38  ;;  %v8718_v46 = vld [vmem:[%s10534_s13 + $0x6a8] sm:$0xff]   ;;  %v8720_v28 = vld [vmem:[%s10534_s13 + $0x6f0] sm:$0xff]   ;;  %v8723_v47 = vld [vmem:[%s10534_s13 + $0x678] sm:$0xff]  }
0x1a46   :  { %v10274_v10 = vpack.c.bf16 %v5462_v0, %v5446_v62  ;;  %v10276_v11 = vpack.c.bf16 %v5464_v3, %v5448_v63  ;;  %8003 = vmatpush3.bf16.msra.mxu0 %v8685_v17  ;;  %8025 = vmatpush3.bf16.msra.mxu1 %v8686_v24  ;;  %v8721_v48 = vld [vmem:[%s10534_s13 + $0x630] sm:$0xff]   ;;  %v8724_v50 = vld [vmem:[%s10534_s13 + $0x6f8] sm:$0xff]   ;;  %v8727_v26 = vld [vmem:[%s10534_s13 + $0x740] sm:$0xff]  }
0x1a47   :  { %8004 = vmatprep.subr.bf16.mxu0 %v8687_v61  ;;  %8026 = vmatprep.subr.bf16.mxu1 %v8688_v60  ;;  %v8722_v49 = vld [vmem:[%s10534_s13 + $0x6b0] sm:$0xff]   ;;  %v8725_v16 = vld [vmem:[%s10534_s13 + $0x638] sm:$0xff]   ;;  %v8728_v52 = vld [vmem:[%s10534_s13 + $0x7c0] sm:$0xff]  }
0x1a48   :  { %v8726_v51 = vld [vmem:[%s10534_s13 + $0x6b8] sm:$0xff]   ;;  %v8729_v44 = vld [vmem:[%s10534_s13 + $0x700] sm:$0xff]   ;;  %v8731_v53 = vld [vmem:[%s10534_s13 + $0x748] sm:$0xff]  }
0x1a49   :  { %v8730_v29 = vld [vmem:[%s10534_s13 + $0x780] sm:$0xff]   ;;  %v8732_v55 = vld [vmem:[%s10534_s13 + $0x7c8] sm:$0xff]   ;;  %v8737_v13 = vld [vmem:[%s10534_s13 + $0x710] sm:$0xff]  }
0x1a4a   :  { %8005 = vmatpush3.bf16.msra.mxu0 %v8689_v31  ;;  %8027 = vmatpush3.bf16.msra.mxu1 %v8690_v14  ;;  %v8733_v17 = vld [vmem:[%s10534_s13 + $0x708] sm:$0xff]   ;;  %v8738_v38 = vld [vmem:[%s10534_s13 + $0x790] sm:$0xff]   ;;  %v8739_v54 = vld [vmem:[%s10534_s13 + $0x758] sm:$0xff]  }
0x1a4b   :  { %8006 = vmatprep.subr.bf16.mxu0 %v8691_v5  ;;  %8028 = vmatprep.subr.bf16.mxu1 %v8692_v27  ;;  %v8734_v24 = vld [vmem:[%s10534_s13 + $0x788] sm:$0xff]   ;;  %v8740_v20 = vld [vmem:[%s10534_s13 + $0x7d8] sm:$0xff]   ;;  %v8743_v62 = vld [vmem:[%s10534_s13 + $0x760] sm:$0xff]  }
0x1a4c   :  { %v8741_v61 = vld [vmem:[%s10534_s13 + $0x718] sm:$0xff]   ;;  %v8744_v63 = vld [vmem:[%s10534_s13 + $0x7e0] sm:$0xff]   ;;  %v8749_v31 = vld [vmem:[%s10534_s13 + $0x728] sm:$0xff]  }
0x1a4d   :  { %v8742_v60 = vld [vmem:[%s10534_s13 + $0x798] sm:$0xff]   ;;  %v8745_v0 = vld [vmem:[%s10534_s13 + $0x720] sm:$0xff]   ;;  %v8750_v14 = vld [vmem:[%s10534_s13 + $0x7a8] sm:$0xff]  }
0x1a4e   :  { %8007 = vmatpush3.bf16.msra.mxu0 %v8693_v32  ;;  %8029 = vmatpush3.bf16.msra.mxu1 %v8694_v33  ;;  %v8746_v3 = vld [vmem:[%s10534_s13 + $0x7a0] sm:$0xff]   ;;  %v8751_v5 = vld [vmem:[%s10534_s13 + $0x770] sm:$0xff]  }
0x1a4f   :  { %8036 = vmatprep.subr.bf16.mxu0 %v8695_v4  ;;  %8058 = vmatprep.subr.bf16.mxu1 %v8696_v34  ;;  %v8752_v27 = vld [vmem:[%s10534_s13 + $0x7f0] sm:$0xff]   ;;  %v8755_v4 = vld [vmem:[%s10534_s13 + $0x778] sm:$0xff]  }
0x1a50   :  { %v8753_v32 = vld [vmem:[%s10534_s13 + $0x730] sm:$0xff]   ;;  %v8756_v34 = vld [vmem:[%s10534_s13 + $0x7f8] sm:$0xff]  }
0x1a51   :  { %6629 = vmatmul.mubr.bf16.vlgmr.msra.gmra.mrb[76].mxu0 %v10202_v22  ;;  %6670 = vmatmul.mubr.bf16.vlgmr.msra.gmra.mrb[72].mxu1 %v10204_v15  ;;  %v8703_v22 = vld [vmem:[%s10534_s13 + $0x650] sm:$0xff]  }
0x1a52   :  { %8037 = vmatpush3.bf16.msra.mxu0 %v8697_v1  ;;  %6710 = vmatprep.mubr.bf16.mxu0 %v10242_v25  ;;  %v8704_v15 = vld [vmem:[%s10534_s13 + $0x6d0] sm:$0xff]   ;;  %v8711_v25 = vld [vmem:[%s10534_s13 + $0x660] sm:$0xff]   ;;  %v8757_v1 = vld [vmem:[%s10534_s13 + $0x738] sm:$0xff]  }
0x1a53   :  { %8059 = vmatpush3.bf16.msra.mxu1 %v8698_v35  ;;  %6751 = vmatprep.mubr.bf16.mxu1 %v10244_v42  ;;  %v8712_v42 = vld [vmem:[%s10534_s13 + $0x6e0] sm:$0xff]   ;;  %v8754_v33 = vld [vmem:[%s10534_s13 + $0x7b0] sm:$0xff]   ;;  %v8758_v35 = vld [vmem:[%s10534_s13 + $0x7b8] sm:$0xff]  }
0x1a54   :  { %8038 = vmatprep.subr.bf16.mxu0 %v8699_v19  ;;  %8060 = vmatprep.subr.bf16.mxu1 %v8700_v2 }
0x1a56   :  { %8039 = vmatpush3.bf16.msra.mxu0 %v8701_v30  ;;  %v7534_v30 = vld [vmem:[%s10538_s14 + $0x1] ss:$0 sm:$0xff] }
0x1a57   :  { %8061 = vmatpush3.bf16.msra.mxu1 %v8702_v23  ;;  %8040 = vmatprep.subr.bf16.mxu0 %v8703_v22 }
0x1a58   :  { %8062 = vmatprep.subr.bf16.mxu1 %v8704_v15 }
0x1a5a   :  { %8041 = vmatpush3.bf16.msra.mxu0 %v8705_v7 }
0x1a5b   :  { %8063 = vmatpush3.bf16.msra.mxu1 %v8706_v37  ;;  %8042 = vmatprep.subr.bf16.mxu0 %v8707_v39 }
0x1a5c   :  { %8064 = vmatprep.subr.bf16.mxu1 %v8708_v40 }
0x1a5e   :  { %8043 = vmatpush3.bf16.msra.mxu0 %v8709_v41 }
0x1a5f   :  { %8065 = vmatpush3.bf16.msra.mxu1 %v8710_v56  ;;  %8044 = vmatprep.subr.bf16.mxu0 %v8711_v25 }
0x1a60   :  { %8066 = vmatprep.subr.bf16.mxu1 %v8712_v42 }
0x1a62   :  { %8045 = vmatpush3.bf16.msra.mxu0 %v8713_v57 }
0x1a63   :  { %8067 = vmatpush3.bf16.msra.mxu1 %v8714_v36  ;;  %8046 = vmatprep.subr.bf16.mxu0 %v8715_v43 }
0x1a64   :  { %8068 = vmatprep.subr.bf16.mxu1 %v8716_v45 }
0x1a66   :  { %8047 = vmatpush3.bf16.msra.mxu0 %v8717_v58 }
0x1a67   :  { %8069 = vmatpush3.bf16.msra.mxu1 %v8718_v46  ;;  %8048 = vmatprep.subr.bf16.mxu0 %v8719_v59 }
0x1a68   :  { %8070 = vmatprep.subr.bf16.mxu1 %v8720_v28 }
0x1a6a   :  { %8049 = vmatpush3.bf16.msra.mxu0 %v8721_v48 }
0x1a6b   :  { %8071 = vmatpush3.bf16.msra.mxu1 %v8722_v49  ;;  %8050 = vmatprep.subr.bf16.mxu0 %v8723_v47 }
0x1a6c   :  { %8072 = vmatprep.subr.bf16.mxu1 %v8724_v50 }
0x1a6e   :  { %8051 = vmatpush3.bf16.msra.mxu0 %v8725_v16 }
0x1a6f   :  { %8073 = vmatpush3.bf16.msra.mxu1 %v8726_v51  ;;  %8080 = vmatprep.subr.bf16.mxu0 %v8727_v26 }
0x1a70   :  { %8102 = vmatprep.subr.bf16.mxu1 %v8728_v52 }
0x1a71   :  { %6711 = vmatmul.mubr.bf16.vlgmr.msra.gmra.mrb[80].mxu0 %v10238_v21  ;;  %v8735_v21 = vld [vmem:[%s10534_s13 + $0x750] sm:$0xff]  }
0x1a72   :  { %6752 = vmatmul.mubr.bf16.vlgmr.msra.gmra.mrb[76].mxu1 %v10240_v8  ;;  %8081 = vmatpush3.bf16.msra.mxu0 %v8729_v44  ;;  %v8736_v8 = vld [vmem:[%s10534_s13 + $0x7d0] sm:$0xff]  }
0x1a73   :  { %6792 = vmatprep.mubr.bf16.mxu0 %v10274_v10  ;;  %8103 = vmatpush3.bf16.msra.mxu1 %v8730_v29  ;;  %v8747_v10 = vld [vmem:[%s10534_s13 + $0x768] sm:$0xff]  }
0x1a74   :  { %6833 = vmatprep.mubr.bf16.mxu1 %v10276_v11  ;;  %8082 = vmatprep.subr.bf16.mxu0 %v8731_v53  ;;  %v8748_v11 = vld [vmem:[%s10534_s13 + $0x7e8] sm:$0xff]  }
0x1a75   :  { %8104 = vmatprep.subr.bf16.mxu1 %v8732_v55 }
0x1a76   :  { %8083 = vmatpush3.bf16.msra.mxu0 %v8733_v17 }
0x1a77   :  { %8105 = vmatpush3.bf16.msra.mxu1 %v8734_v24  ;;  %8084 = vmatprep.subr.bf16.mxu0 %v8735_v21 }
0x1a78   :  { %8106 = vmatprep.subr.bf16.mxu1 %v8736_v8 }
0x1a7a   :  { %8085 = vmatpush3.bf16.msra.mxu0 %v8737_v13 }
0x1a7b   :  { %8107 = vmatpush3.bf16.msra.mxu1 %v8738_v38  ;;  %8086 = vmatprep.subr.bf16.mxu0 %v8739_v54 }
0x1a7c   :  { %8108 = vmatprep.subr.bf16.mxu1 %v8740_v20 }
0x1a7e   :  { %8087 = vmatpush3.bf16.msra.mxu0 %v8741_v61 }
0x1a7f   :  { %8109 = vmatpush3.bf16.msra.mxu1 %v8742_v60  ;;  %8088 = vmatprep.subr.bf16.mxu0 %v8743_v62 }
0x1a80   :  { %8110 = vmatprep.subr.bf16.mxu1 %v8744_v63 }
0x1a82   :  { %8089 = vmatpush3.bf16.msra.mxu0 %v8745_v0 }
0x1a83   :  { %8111 = vmatpush3.bf16.msra.mxu1 %v8746_v3  ;;  %8090 = vmatprep.subr.bf16.mxu0 %v8747_v10 }
0x1a84   :  { %8112 = vmatprep.subr.bf16.mxu1 %v8748_v11 }
0x1a86   :  { %8091 = vmatpush3.bf16.msra.mxu0 %v8749_v31 }
0x1a87   :  { %8113 = vmatpush3.bf16.msra.mxu1 %v8750_v14  ;;  %8092 = vmatprep.subr.bf16.mxu0 %v8751_v5 }
0x1a88   :  { %8114 = vmatprep.subr.bf16.mxu1 %v8752_v27 }
0x1a8a   :  { %8093 = vmatpush3.bf16.msra.mxu0 %v8753_v32 }
0x1a8b   :  { %8115 = vmatpush3.bf16.msra.mxu1 %v8754_v33  ;;  %8094 = vmatprep.subr.bf16.mxu0 %v8755_v4 }
0x1a8c   :  { %8116 = vmatprep.subr.bf16.mxu1 %v8756_v34 }
0x1a8e   :  { %8095 = vmatpush3.bf16.msra.mxu0 %v8757_v1 }
0x1a8f   :  { %8117 = vmatpush3.bf16.msra.mxu1 %v8758_v35 }
0x1a91   :  { %6793 = vmatmul.mubr.bf16.vlgmr.msra.gmra.mrb[84].mxu0 %v10270_v6 }
0x1a92   :  { %6834 = vmatmul.mubr.bf16.vlgmr.msra.gmra.mrb[80].mxu1 %v10272_v9 }
0x1b04   :  { %v7964_v19 = vpop.f32.mrb[72].mxu0  ;;  %v7986_v2 = vpop.f32.mrb[68].mxu1 }
0x1b05   :  { %v7965_v23 = vpop.f32.mrb[73].mxu0  ;;  %v7987_v22 = vpop.f32.mrb[69].mxu1 }
0x1b06   :  { %v7966_v15 = vadd.f32 %v7965_v23, %v7964_v19  ;;  %v7988_v7 = vadd.f32 %v7987_v22, %v7986_v2  ;;  %v7967_v37 = vpop.f32.mrb[74].mxu0  ;;  %v7989_v39 = vpop.f32.mrb[70].mxu1 }
0x1b07   :  { %v7968_v40 = vpop.f32.mrb[75].mxu0  ;;  %v7990_v41 = vpop.f32.mrb[71].mxu1 }
0x1b08   :  { %v6549_v56 = vadd.f32 %v7966_v15, %v7534_v30  ;;  %v7969_v25 = vadd.f32 %v7968_v40, %v7967_v37  ;;  %v7991_v42 = vadd.f32 %v7990_v41, %v7989_v39 }
0x1b0a   :  { %v6590_v6 = vadd.f32 %v7988_v7, %v6549_v56  ;;  %v6552_v57 = vadd.f32 %v7969_v25, %v7534_v30 }
0x1b0c   :  { %v6593_v9 = vadd.f32 %v7991_v42, %v6552_v57 }
0x1b24   :  { %v8008_v36 = vpop.f32.mrb[76].mxu0  ;;  %v8030_v43 = vpop.f32.mrb[72].mxu1 }
0x1b25   :  { %v8009_v45 = vpop.f32.mrb[77].mxu0  ;;  %v8031_v58 = vpop.f32.mrb[73].mxu1 }
0x1b26   :  { %v8010_v46 = vadd.f32 %v8009_v45, %v8008_v36  ;;  %v8032_v59 = vadd.f32 %v8031_v58, %v8030_v43  ;;  %v8011_v28 = vpop.f32.mrb[78].mxu0  ;;  %v8033_v48 = vpop.f32.mrb[74].mxu1 }
0x1b27   :  { %v8012_v49 = vpop.f32.mrb[79].mxu0  ;;  %v8034_v47 = vpop.f32.mrb[75].mxu1 }
0x1b28   :  { %v6631_v50 = vadd.f32 %v8010_v46, %v6590_v6  ;;  %v8013_v16 = vadd.f32 %v8012_v49, %v8011_v28  ;;  %v8035_v51 = vadd.f32 %v8034_v47, %v8033_v48  ;;  %v7665_v28 = vld [vmem:[%s10539_s15 + $0x1] ss:$0 sm:$0xff] }
0x1b29   :  { %v7666_v49 = vld [vmem:[%s10540_s16 + $0x1] ss:$0 sm:$0xff] }
0x1b2a   :  { %v6672_v26 = vadd.f32 %v8032_v59, %v6631_v50  ;;  %v6634_v52 = vadd.f32 %v8013_v16, %v6593_v9 }
0x1b2c   :  { %v6675_v44 = vadd.f32 %v8035_v51, %v6634_v52 }
0x1b44   :  { %v8052_v29 = vpop.f32.mrb[80].mxu0 }
0x1b45   :  { %v8074_v53 = vpop.f32.mrb[76].mxu1  ;;  %v8053_v55 = vpop.f32.mrb[81].mxu0 }
0x1b46   :  { %v8054_v17 = vadd.f32 %v8053_v55, %v8052_v29  ;;  %v8075_v24 = vpop.f32.mrb[77].mxu1  ;;  %v8055_v21 = vpop.f32.mrb[82].mxu0 }
0x1b47   :  { %v8076_v8 = vadd.f32 %v8075_v24, %v8074_v53  ;;  %v8077_v13 = vpop.f32.mrb[78].mxu1  ;;  %v8056_v38 = vpop.f32.mrb[83].mxu0 }
0x1b48   :  { %v6713_v54 = vadd.f32 %v8054_v17, %v6672_v26  ;;  %v8057_v20 = vadd.f32 %v8056_v38, %v8055_v21  ;;  %v8078_v61 = vpop.f32.mrb[79].mxu1 }
0x1b49   :  { %v8079_v60 = vadd.f32 %v8078_v61, %v8077_v13  ;;  %v7667_v61 = vld [vmem:[%s10542_s17] ss:$0 sm:$0xff] }
0x1b4a   :  { %v6754_v62 = vadd.f32 %v8076_v8, %v6713_v54  ;;  %v6716_v63 = vadd.f32 %v8057_v20, %v6675_v44 }
0x1b4c   :  { %v6757_v0 = vadd.f32 %v8079_v60, %v6716_v63 }
0x1b64   :  { %v8096_v3 = vpop.f32.mrb[84].mxu0 }
0x1b65   :  { %v8118_v10 = vpop.f32.mrb[80].mxu1  ;;  %v8097_v11 = vpop.f32.mrb[85].mxu0 }
0x1b66   :  { %v8098_v31 = vadd.f32 %v8097_v11, %v8096_v3  ;;  %v8119_v14 = vpop.f32.mrb[81].mxu1  ;;  %v8099_v5 = vpop.f32.mrb[86].mxu0 }
0x1b67   :  { %v8120_v27 = vadd.f32 %v8119_v14, %v8118_v10  ;;  %v8121_v32 = vpop.f32.mrb[82].mxu1  ;;  %v8100_v33 = vpop.f32.mrb[87].mxu0 }
0x1b68   :  { %v6795_v4 = vadd.f32 %v8098_v31, %v6754_v62  ;;  %v8101_v34 = vadd.f32 %v8100_v33, %v8099_v5  ;;  %v8122_v1 = vpop.f32.mrb[83].mxu1 }
0x1b69   :  { %v8123_v35 = vadd.f32 %v8122_v1, %v8121_v32 }
0x1b6a   :  { %v6836_v19 = vadd.f32 %v8120_v27, %v6795_v4  ;;  %v6798_v2 = vadd.f32 %v8101_v34, %v6757_v0 }
0x1b6c   :  { %v6839_v30 = vadd.f32 %v8123_v35, %v6798_v2  ;;  %v6842_v15 = vadd.f32 %v6836_v19, %v9974_v12  ;;  %v24_v12 = vstv %s10541_s18 }
0x1b6d   :  { %25 = vst [vmem:[#allocation2] sm:$0x1] %v24_v12 }
0x1b6e   :  { %v6843_v23 = vadd.f32 %v6839_v30, %v9976_v18  ;;  %v6848_v7 = vsel %vm177_vm2, %v6842_v15, 0.0 }
0x1b70   :  { %v6851_v22 = vsel %vm177_vm2, %v6843_v23, 0.0 }
0x1b71   :  { %6852 = vadd.xlane.f32.xlu0 %v6851_v22 }
0x1b74   :  { %v7668_v5 = vld [vmem:[#allocation2] ss:$0 sm:$0xff] }
0x1b75   :  { %6849 = vadd.xlane.f32.xlu0 %v6848_v7 }
0x1bfe   :  { %v6853_v37 = vpop.xlane.xlu0 %6852 }
0x1bff   :  { %v6855_v39 = vmul.f32 0.03125, %v6853_v37 }
0x1c01   :  { %v6857_v40 = vsub.f32 %v6843_v23, %v6855_v39 }
0x1c02   :  { %v6850_v41 = vpop.xlane.xlu0 %6849 }
0x1c03   :  { %v6854_v56 = vmul.f32 0.03125, %v6850_v41  ;;  %v6859_v25 = vmul.f32 %v6857_v40, %v6857_v40 }
0x1c05   :  { %v6856_v42 = vsub.f32 %v6842_v15, %v6854_v56  ;;  %v6863_v6 = vsel %vm177_vm2, %v6859_v25, 0.0 }
0x1c06   :  { %6864 = vadd.xlane.f32.xlu0 %v6863_v6 }
0x1c07   :  { %v6858_v57 = vmul.f32 %v6856_v42, %v6856_v42 }
0x1c09   :  { %v6860_v18 = vsel %vm177_vm2, %v6858_v57, 0.0 }
0x1c0a   :  { %6861 = vadd.xlane.f32.xlu0 %v6860_v18 }
0x1c93   :  { %v6865_v9 = vpop.xlane.xlu0 %6864 }
0x1c94   :  { %v6867_v36 = vmul.f32 0.03125, %v6865_v9 }
0x1c96   :  { %v6869_v43 = vadd.f32 1e-05, %v6867_v36 }
0x1c97   :  { %v6862_v45 = vpop.xlane.xlu0 %6861 }
0x1c98   :  { %8835 = vrsqrt.f32 %v6869_v43  ;;  %v6866_v58 = vmul.f32 0.03125, %v6862_v45 }
0x1c9a   :  { %v6868_v46 = vadd.f32 1e-05, %v6866_v58 }
0x1c9c   :  { %8837 = vrsqrt.f32 %v6868_v46 }
0x1ca2   :  { %v8836_v59 = vpop.eup %8835 }
0x1ca3   :  { %v6873_v48 = vmul.f32 %v8836_v59, %v6857_v40 }
0x1ca5   :  { %v6881_v47 = vmul.f32 %v7665_v28, %v6873_v48 }
0x1ca6   :  { %v8838_v50 = vpop.eup %8837 }
0x1ca7   :  { %v6872_v16 = vmul.f32 %v8838_v50, %v6856_v42  ;;  %v6889_v51 = vadd.f32 %v7666_v49, %v6881_v47 }
0x1ca9   :  { %v6880_v26 = vmul.f32 %v7665_v28, %v6872_v16  ;;  %v6897_v52 = vsel %vm177_vm2, %v6889_v51, 0.0 }
0x1caa   :  { %v6898_v44 = vrot.slane %v6897_v52, 4 }
0x1cab   :  { %v6888_v29 = vadd.f32 %v7666_v49, %v6880_v26 }
0x1cac   :  { %v6899_v53 = vadd.f32 %v6898_v44, %v6897_v52 }
0x1cad   :  { %v6890_v55 = vsel %vm177_vm2, %v6888_v29, 0.0 }
0x1cae   :  { %v6891_v17 = vrot.slane %v6890_v55, 4  ;;  %v6900_v24 = vrot.slane %v6899_v53, 2 }
0x1cb0   :  { %v6892_v21 = vadd.f32 %v6891_v17, %v6890_v55  ;;  %v6901_v8 = vadd.f32 %v6900_v24, %v6899_v53 }
0x1cb2   :  { %v6893_v13 = vrot.slane %v6892_v21, 2  ;;  %v6902_v38 = vrot.slane %v6901_v8, 1 }
0x1cb4   :  { %v6894_v54 = vadd.f32 %v6893_v13, %v6892_v21  ;;  %v6903_v20 = vadd.f32 %v6902_v38, %v6901_v8 }
0x1cb6   :  { %v6895_v60 = vrot.slane %v6894_v54, 1  ;;  %v6906_v62 = vmul.f32 0.125, %v6903_v20 }
0x1cb8   :  { %v6896_v63 = vadd.f32 %v6895_v60, %v6894_v54  ;;  %v6915_v0 = vmul.f32 %v7667_v61, %v6906_v62 }
0x1cba   :  { %v6905_v3 = vmul.f32 0.125, %v6896_v63  ;;  %v6918_v11 = vrot.slane %v6915_v0, 7 }
0x1cbc   :  { %v6914_v10 = vmul.f32 %v7667_v61, %v6905_v3 }
0x1cbe   :  { %v6920_v31 = vsel %vm6919_vm6, %v6918_v11, %v6914_v10 }
0x1cbf   :  { %v6923_v14 = vsel %vm6922_vm7, %v6920_v31, 0.0 }
0x1cc0   :  { %6924 = vadd.xlane.f32.xlu0 %v6923_v14 }
0x1d4d   :  { %v6925_v27 = vpop.xlane.xlu0 %6924 }
0x1d4e   :  { %v6933_v32 = vadd.f32 %v7668_v5, %v6925_v27 }
0x1d50   :  { %6935 = vst.msk [vmem:[%s10543_s19] sm:$0x3] %vm6934_vm8, %v6933_v32 }

</bundles_post_ra>
